<compile_context>
chip_gen: v7x
topology: tpu7x:2x2x1
jax: 0.10.0
libtpu: 0.0.40
codegen_flags: <defaults>
</compile_context>

<pallas_src>
import functools

import jax
import jax.numpy as jnp
from jax import lax
from jax.experimental import pallas as pl
from jax.experimental.pallas import tpu as pltpu


_UNROLL_T_MAX = 32  # fully unroll the timestep loop up to this many steps


def _round_up(v, m):
    return ((v + m - 1) // m) * m


def _pad_gate_cols(w, H, Hp):
    """(..., 4H) with gate order (i,f,g,o) -> (..., 4Hp), each gate 128-lane aligned."""
    if Hp == H:
        return w
    lead = w.shape[:-1]
    w4 = w.reshape(lead + (4, H))
    w4 = jnp.pad(w4, [(0, 0)] * (len(lead) + 1) + [(0, Hp - H)])
    return w4.reshape(lead + (4 * Hp,))


def _prepare_kernel_args(params, num_layers, H, O, Hp, Op, compute_dtype):
    """Pad weights for lane alignment and cast matmul operands to compute_dtype."""
    args = []
    for l in range(num_layers):
        wih = _pad_gate_cols(params[f'wih{l}'], H, Hp)       # (Din, 4Hp)
        whh = _pad_gate_cols(params[f'whh{l}'], H, Hp)       # (H,   4Hp)
        b = _pad_gate_cols(params[f'b{l}'], H, Hp)           # (1,   4Hp)
        if l > 0 and Hp != H:
            wih = jnp.pad(wih, ((0, Hp - H), (0, 0)))        # rows follow padded h
        if Hp != H:
            whh = jnp.pad(whh, ((0, Hp - H), (0, 0)))        # (Hp, 4Hp)
        # Padded gate columns / bias are exactly 0 and padded weight rows are 0:
        # this keeps padded h/c lanes exactly 0 through the recurrence.
        args += [wih.astype(compute_dtype), whh.astype(compute_dtype),
                 b.astype(jnp.float32)]
    wfc = jnp.pad(params['wfc'], ((0, Hp - H), (0, Op - O))).astype(compute_dtype)
    # Padded logit lanes must be -inf-like so log-softmax stays exact.
    # (Safe only while the logits stay f32 — they do: preferred_element_type=f32.)
    bfc = jnp.pad(params['bfc'], ((0, 0), (0, Op - O)),
                  constant_values=-1e30).astype(jnp.float32)
    args += [wfc, bfc]
    return args


def make_lstm_kernel(num_layers, T, B_pad, compute_dtype):
    """Kernel refs: (x, [W_ih, W_hh, b]*L, W_fc, b_fc, out, h_buf, xw_buf)."""

    def kernel(*refs):
        x_ref = refs[0]
        layer_refs = refs[1:1 + 3 * num_layers]
        wfc_ref = refs[1 + 3 * num_layers]
        bfc_ref = refs[2 + 3 * num_layers]
        out_ref = refs[3 + 3 * num_layers]
        h_buf, xw_buf = refs[4 + 3 * num_layers:]

        Hp = h_buf.shape[1]                       # padded hidden size (mult of 128)

        def lstm_step(xw_blk, h, c, whh_ref):
            # f32 gate accumulation: upcast the stored (compute_dtype) xW+b and
            # accumulate the recurrent MXU matmul in f32.
            gates = xw_blk.astype(jnp.float32) + jnp.dot(
                h.astype(compute_dtype), whh_ref[...],
                preferred_element_type=jnp.float32)           # (B_pad, 4Hp)
            i_g = jax.nn.sigmoid(gates[:, 0 * Hp:1 * Hp])
            f_g = jax.nn.sigmoid(gates[:, 1 * Hp:2 * Hp])
            g_g = jnp.tanh(gates[:, 2 * Hp:3 * Hp])
            o_g = jax.nn.sigmoid(gates[:, 3 * Hp:4 * Hp])
            c = f_g * c + i_g * g_g
            h = o_g * jnp.tanh(c)
            return h, c

        def run_recurrence(whh_ref):
            h = jnp.zeros((B_pad, Hp), jnp.float32)
            c = jnp.zeros((B_pad, Hp), jnp.float32)
            if T <= _UNROLL_T_MAX:
                # Fully unrolled over static T: every slice is static and
                # tile-aligned (r is a multiple of B_pad >= 16), so loads and
                # stores on the serial critical path are unmasked.
                for t in range(T):
                    r = t * B_pad
                    h, c = lstm_step(xw_buf[r:r + B_pad, :], h, c, whh_ref)
                    h_buf[r:r + B_pad, :] = h.astype(h_buf.dtype)
            else:
                # Long sequences: partially-unrolled fori_loop keeps scheduler
                # visibility while bounding code size; alignment hint keeps
                # vld/vst unmasked.
                def body(t, carry):
                    h_t, c_t = carry
                    r = pl.multiple_of(t * B_pad, 8)
                    h_t, c_t = lstm_step(xw_buf[pl.ds(r, B_pad), :],
                                         h_t, c_t, whh_ref)
                    h_buf[pl.ds(r, B_pad), :] = h_t.astype(h_buf.dtype)
                    return (h_t, c_t)
                lax.fori_loop(0, T, body, (h, c), unroll=4)

        cur = x_ref[0]                            # (T*B_pad, Din), compute_dtype
        for l in range(num_layers):
            wih_ref, whh_ref, b_ref = layer_refs[3 * l:3 * l + 3]
            # Hoisted input projection: ONE big MXU matmul per layer, bias folded
            # in once, stored in compute_dtype (f32 accumulation happens here).
            xw_buf[...] = (jnp.dot(cur, wih_ref[...],
                                   preferred_element_type=jnp.float32)
                           + b_ref[...]).astype(xw_buf.dtype)
            run_recurrence(whh_ref)
            cur = h_buf[...]                      # already compute_dtype, no recast

        # Lane-dense FC + log-softmax epilogue as a single 2-D matmul (f32 logits).
        logits = (jnp.dot(cur, wfc_ref[...], preferred_element_type=jnp.float32)
                  + bfc_ref[...])                 # (T*B_pad, Op), pad lanes = -1e30
        m = jnp.max(logits, axis=-1, keepdims=True)
        z = logits - m
        lse = jnp.log(jnp.sum(jnp.exp(z), axis=-1, keepdims=True))
        out_ref[0] = (z - lse).astype(out_ref.dtype)

    return kernel


def _pick_vmem_limit():
    """Per-generation VMEM budget: v5e/v6e have 128 MiB, v7x has 64 MiB per TC."""
    try:
        kind = jax.devices()[0].device_kind.lower()
    except Exception:
        kind = ""
    if ("v5" in kind) or ("v6" in kind):
        return 100 * 1024 * 1024
    return 48 * 1024 * 1024


def medium_lstm_forward(x, params, num_layers, compute_dtype=jnp.bfloat16):
    """x: (B, T, D) batch_first float32. Returns (B, T, O) log-probabilities."""
    B, T, D = x.shape
    H = params['whh0'].shape[0]
    O = params['wfc'].shape[1]
    Hp = _round_up(H, 128)                 # lane-aligned gate blocks
    Op = _round_up(O, 128)                 # lane-dense logits / unmasked stores

    # Megacore split only when each core's block is big enough to feed the MXU
    # (>= 128 rows) — otherwise grid=(1,) avoids duplicated weight DMA and
    # per-step grid overhead on single-TC chips.
    if B >= 256 and (B // 2) % 16 == 0:
        B_blk = B // 2
    else:
        B_blk = B
    G = B // B_blk
    # Sublane-align every per-timestep row block (bf16 scratch tile = (16,128)).
    B_pad = _round_up(B_blk, 16)
    TB = T * B_pad

    # Pad the batch (padded rows are computed but discarded; rows are independent),
    # arrange each group time-major contiguous, cast for the MXU.
    xg = x.reshape(G, B_blk, T, D)
    if B_pad != B_blk:
        xg = jnp.pad(xg, ((0, 0), (0, B_pad - B_blk), (0, 0), (0, 0)))
    xg = xg.transpose(0, 2, 1, 3).reshape(G, TB, D).astype(compute_dtype)

    weight_args = _prepare_kernel_args(params, num_layers, H, O, Hp, Op,
                                       compute_dtype)

    in_specs = [pl.BlockSpec((1, TB, D), lambda g: (g, 0, 0))]
    for w in weight_args:
        in_specs.append(pl.BlockSpec(w.shape, lambda g: (0, 0)))

    out = pl.pallas_call(
        make_lstm_kernel(num_layers, T, B_pad, compute_dtype),
        out_shape=jax.ShapeDtypeStruct((G, TB, Op), jnp.float32),
        grid_spec=pltpu.PrefetchScalarGridSpec(
            num_scalar_prefetch=0,
            grid=(G,),
            in_specs=in_specs,
            out_specs=pl.BlockSpec((1, TB, Op), lambda g: (g, 0, 0)),
            scratch_shapes=[
                pltpu.VMEM((TB, Hp), compute_dtype),       # hidden states (reused per layer)
                pltpu.VMEM((TB, 4 * Hp), compute_dtype),   # hoisted xW + b (reused per layer)
            ],
        ),
        compiler_params=pltpu.CompilerParams(
            dimension_semantics=("parallel",),
            vmem_limit_bytes=_pick_vmem_limit(),
        ),
    )(xg, *weight_args)

    out = (out.reshape(G, T, B_pad, Op)
              .transpose(0, 2, 1, 3)
              .reshape(G * B_pad, T, Op))
    return out[:B, :, :O]


def init_params(key, input_dim, hidden_dim, num_layers, output_dim):
    """Deterministic init mirroring PyTorch's default uniform(-1/sqrt(H), 1/sqrt(H))."""
    params = {}
    k = 1.0 / jnp.sqrt(jnp.float32(hidden_dim))
    keys = jax.random.split(key, 4 * num_layers + 2)
    ki = 0
    for l in range(num_layers):
        d_in = input_dim if l == 0 else hidden_dim
        w_ih = jax.random.uniform(keys[ki], (4 * hidden_dim, d_in),
                                  jnp.float32, -k, k); ki += 1
        w_hh = jax.random.uniform(keys[ki], (4 * hidden_dim, hidden_dim),
                                  jnp.float32, -k, k); ki += 1
        b_ih = jax.random.uniform(keys[ki], (4 * hidden_dim,),
                                  jnp.float32, -k, k); ki += 1
        b_hh = jax.random.uniform(keys[ki], (4 * hidden_dim,),
                                  jnp.float32, -k, k); ki += 1
        # Store transposed for x @ W_ih^T convention; fuse the two biases.
        params[f'wih{l}'] = w_ih.T                            # (d_in, 4H)
        params[f'whh{l}'] = w_hh.T                            # (H, 4H)
        params[f'b{l}'] = (b_ih + b_hh)[None, :]              # (1, 4H)
    kf = 1.0 / jnp.sqrt(jnp.float32(hidden_dim))
    w_fc = jax.random.uniform(keys[ki], (output_dim, hidden_dim),
                              jnp.float32, -kf, kf); ki += 1
    b_fc = jax.random.uniform(keys[ki], (output_dim,),
                              jnp.float32, -kf, kf); ki += 1
    params['wfc'] = w_fc.T                                    # (H, O)
    params['bfc'] = b_fc[None, :]                             # (1, O)
    return params


def reference_forward(x, params, num_layers):
    """Pure-JAX f32 reference of the PyTorch forward pass."""
    B, T, _ = x.shape
    h_in = x
    for l in range(num_layers):
        wih, whh, b = params[f'wih{l}'], params[f'whh{l}'], params[f'b{l}']
        H = whh.shape[0]

        def step(carry, x_t):
            h, c = carry
            gates = x_t @ wih + h @ whh + b[0]
            i = jax.nn.sigmoid(gates[:, :H])
            f = jax.nn.sigmoid(gates[:, H:2 * H])
            g = jnp.tanh(gates[:, 2 * H:3 * H])
            o = jax.nn.sigmoid(gates[:, 3 * H:])
            c = f * c + i * g
            h = o * jnp.tanh(c)
            return (h, c), h

        init = (jnp.zeros((B, H), jnp.float32), jnp.zeros((B, H), jnp.float32))
        _, hs = lax.scan(step, init, jnp.transpose(h_in, (1, 0, 2)))
        h_in = jnp.transpose(hs, (1, 0, 2))
    logits = h_in @ params['wfc'] + params['bfc'][0]
    return jax.nn.log_softmax(logits, axis=-1)


if __name__ == "__main__":
    # Small shapes consistent with the module's forward: x: (batch, seq, input_dim)
    B, T = 2, 8
    input_dim, hidden_dim, num_layers, output_dim = 16, 32, 2, 10

    root = jax.random.PRNGKey(0)
    kx, kp = jax.random.split(root)
    x = jax.random.normal(kx, (B, T, input_dim), jnp.float32)
    params = init_params(kp, input_dim, hidden_dim, num_layers, output_dim)

    ref = reference_forward(x, params, num_layers)

    # Default bf16 MXU path.
    fwd = jax.jit(functools.partial(medium_lstm_forward, num_layers=num_layers))
    out = jax.block_until_ready(fwd(x, params))
    assert out.shape == (B, T, output_dim)
    assert bool(jnp.all(jnp.isfinite(out)))
    assert bool(jnp.max(jnp.abs(out - ref)) < 2e-1), "bf16 path mismatch vs reference"

    # f32-parity path (addresses the bf16-divergence correctness concern).
    fwd32 = jax.jit(functools.partial(medium_lstm_forward, num_layers=num_layers,
                                      compute_dtype=jnp.float32))
    out32 = jax.block_until_ready(fwd32(x, params))
    assert out32.shape == (B, T, output_dim)
    assert bool(jnp.max(jnp.abs(out32 - ref)) < 5e-2), "f32 path mismatch vs reference"

    print("KERNEL_OK")
</pallas_src>

<mosaic_0001>
module attributes {stable_mosaic.version = 11 : i64} {
  func.func @kernel(%arg0: i32, %arg1: memref<1x128x16xbf16, #tpu.memory_space<vmem>>, %arg2: memref<16x512xbf16, #tpu.memory_space<vmem>>, %arg3: memref<128x512xbf16, #tpu.memory_space<vmem>>, %arg4: memref<1x512xf32, #tpu.memory_space<vmem>>, %arg5: memref<128x512xbf16, #tpu.memory_space<vmem>>, %arg6: memref<128x512xbf16, #tpu.memory_space<vmem>>, %arg7: memref<1x512xf32, #tpu.memory_space<vmem>>, %arg8: memref<128x128xbf16, #tpu.memory_space<vmem>>, %arg9: memref<1x128xf32, #tpu.memory_space<vmem>>, %arg10: memref<1x128x128xf32, #tpu.memory_space<vmem>>, %arg11: memref<128x128xbf16, #tpu.memory_space<vmem>>, %arg12: memref<128x512xbf16, #tpu.memory_space<vmem>>) attributes {dimension_semantics = [#tpu.dimension_semantics<parallel>], iteration_bounds = array<i64: 1>, scalar_prefetch = 0 : i64, scratch_operands = 2 : i64, tpu.core_type = #tpu.core_type<tc>, window_params = [{transform_indices = @transform_0, window_bounds = array<i64: 1, 128, 16>}, {pipeline_mode = #tpu.pipeline_mode<synchronous>, transform_indices = @transform_1, window_bounds = array<i64: 16, 512>}, {pipeline_mode = #tpu.pipeline_mode<synchronous>, transform_indices = @transform_2, window_bounds = array<i64: 128, 512>}, {pipeline_mode = #tpu.pipeline_mode<synchronous>, transform_indices = @transform_3, window_bounds = array<i64: 1, 512>}, {pipeline_mode = #tpu.pipeline_mode<synchronous>, transform_indices = @transform_4, window_bounds = array<i64: 128, 512>}, {pipeline_mode = #tpu.pipeline_mode<synchronous>, transform_indices = @transform_5, window_bounds = array<i64: 128, 512>}, {pipeline_mode = #tpu.pipeline_mode<synchronous>, transform_indices = @transform_6, window_bounds = array<i64: 1, 512>}, {pipeline_mode = #tpu.pipeline_mode<synchronous>, transform_indices = @transform_7, window_bounds = array<i64: 128, 128>}, {pipeline_mode = #tpu.pipeline_mode<synchronous>, transform_indices = @transform_8, window_bounds = array<i64: 1, 128>}, {transform_indices = @transform_9, window_bounds = array<i64: 1, 128, 128>}]} {
    %c0 = arith.constant 0 : index
    %c0_0 = arith.constant 0 : index
    %c0_1 = arith.constant 0 : index
    %0 = vector.load %arg1[%c0, %c0_0, %c0_1] : memref<1x128x16xbf16, #tpu.memory_space<vmem>>, vector<1x128x16xbf16>
    %1 = vector.shape_cast %0 : vector<1x128x16xbf16> to vector<128x16xbf16>
    %c0_2 = arith.constant 0 : index
    %c0_3 = arith.constant 0 : index
    %2 = vector.load %arg2[%c0_2, %c0_3] : memref<16x512xbf16, #tpu.memory_space<vmem>>, vector<16x512xbf16>
    %cst = arith.constant dense<0.000000e+00> : vector<128x512xf32>
    %3 = tpu.matmul %1, %2, %cst {dimension_numbers = #tpu.dot_dimension_numbers<[1], [0], [0], [1], [0, 0, 1, 1], [], []>} : vector<128x16xbf16>, vector<16x512xbf16>, vector<128x512xf32> -> vector<128x512xf32>
    %c0_4 = arith.constant 0 : index
    %c0_5 = arith.constant 0 : index
    %4 = vector.load %arg4[%c0_4, %c0_5] : memref<1x512xf32, #tpu.memory_space<vmem>>, vector<1x512xf32>
    %5 = vector.broadcast %4 : vector<1x512xf32> to vector<128x512xf32>
    %6 = arith.addf %3, %5 : vector<128x512xf32>
    %7 = arith.truncf %6 : vector<128x512xf32> to vector<128x512xbf16>
    %c0_6 = arith.constant 0 : index
    %c0_7 = arith.constant 0 : index
    %8 = vector.load %arg12[%c0_6, %c0_7] : memref<128x512xbf16, #tpu.memory_space<vmem>>, vector<128x512xbf16>
    tpu.vector_store %arg12[%c0_6, %c0_7], %7 {strides = array<i32>} : memref<128x512xbf16, #tpu.memory_space<vmem>>, vector<128x512xbf16>,
    %cst_8 = arith.constant 0.000000e+00 : f32
    %9 = vector.broadcast %cst_8 : f32 to vector<16x128xf32>
    %cst_9 = arith.constant 0.000000e+00 : f32
    %10 = vector.broadcast %cst_9 : f32 to vector<16x128xf32>
    %c0_10 = arith.constant 0 : index
    %c0_11 = arith.constant 0 : index
    %11 = vector.load %arg12[%c0_10, %c0_11] : memref<128x512xbf16, #tpu.memory_space<vmem>>, vector<16x512xbf16>
    %12 = arith.extf %11 : vector<16x512xbf16> to vector<16x512xf32>
    %13 = arith.truncf %9 : vector<16x128xf32> to vector<16x128xbf16>
    %c0_12 = arith.constant 0 : index
    %c0_13 = arith.constant 0 : index
    %14 = vector.load %arg3[%c0_12, %c0_13] : memref<128x512xbf16, #tpu.memory_space<vmem>>, vector<128x512xbf16>
    %cst_14 = arith.constant dense<0.000000e+00> : vector<16x512xf32>
    %15 = tpu.matmul %13, %14, %cst_14 {dimension_numbers = #tpu.dot_dimension_numbers<[1], [0], [0], [1], [0, 0, 1, 1], [], []>} : vector<16x128xbf16>, vector<128x512xbf16>, vector<16x512xf32> -> vector<16x512xf32>
    %16 = arith.addf %12, %15 : vector<16x512xf32>
    %17 = vector.extract_strided_slice %16 {offsets = [0, 0], sizes = [16, 128], strides = [1, 1]} : vector<16x512xf32> to vector<16x128xf32>
    %18 = arith.negf %17 : vector<16x128xf32>
    %19 = math.exp %18 : vector<16x128xf32>
    %cst_15 = arith.constant 1.000000e+00 : f32
    %20 = vector.broadcast %cst_15 : f32 to vector<16x128xf32>
    %21 = arith.addf %20, %19 : vector<16x128xf32>
    %22 = arith.divf %20, %21 : vector<16x128xf32>
    %23 = vector.extract_strided_slice %16 {offsets = [0, 128], sizes = [16, 128], strides = [1, 1]} : vector<16x512xf32> to vector<16x128xf32>
    %24 = arith.negf %23 : vector<16x128xf32>
    %25 = math.exp %24 : vector<16x128xf32>
    %cst_16 = arith.constant 1.000000e+00 : f32
    %26 = vector.broadcast %cst_16 : f32 to vector<16x128xf32>
    %27 = arith.addf %26, %25 : vector<16x128xf32>
    %28 = arith.divf %26, %27 : vector<16x128xf32>
    %29 = vector.extract_strided_slice %16 {offsets = [0, 256], sizes = [16, 128], strides = [1, 1]} : vector<16x512xf32> to vector<16x128xf32>
    %30 = math.tanh %29 : vector<16x128xf32>
    %31 = vector.extract_strided_slice %16 {offsets = [0, 384], sizes = [16, 128], strides = [1, 1]} : vector<16x512xf32> to vector<16x128xf32>
    %32 = arith.negf %31 : vector<16x128xf32>
    %33 = math.exp %32 : vector<16x128xf32>
    %cst_17 = arith.constant 1.000000e+00 : f32
    %34 = vector.broadcast %cst_17 : f32 to vector<16x128xf32>
    %35 = arith.addf %34, %33 : vector<16x128xf32>
    %36 = arith.divf %34, %35 : vector<16x128xf32>
    %37 = arith.mulf %28, %10 : vector<16x128xf32>
    %38 = arith.mulf %22, %30 : vector<16x128xf32>
    %39 = arith.addf %37, %38 : vector<16x128xf32>
    %40 = math.tanh %39 : vector<16x128xf32>
    %41 = arith.mulf %36, %40 : vector<16x128xf32>
    %42 = arith.truncf %41 : vector<16x128xf32> to vector<16x128xbf16>
    %c0_18 = arith.constant 0 : index
    %c0_19 = arith.constant 0 : index
    %43 = vector.load %arg11[%c0_18, %c0_19] : memref<128x128xbf16, #tpu.memory_space<vmem>>, vector<16x128xbf16>
    tpu.vector_store %arg11[%c0_18, %c0_19], %42 {strides = array<i32>} : memref<128x128xbf16, #tpu.memory_space<vmem>>, vector<16x128xbf16>,
    %c16 = arith.constant 16 : index
    %c0_20 = arith.constant 0 : index
    %44 = vector.load %arg12[%c16, %c0_20] : memref<128x512xbf16, #tpu.memory_space<vmem>>, vector<16x512xbf16>
    %45 = arith.extf %44 : vector<16x512xbf16> to vector<16x512xf32>
    %46 = arith.truncf %41 : vector<16x128xf32> to vector<16x128xbf16>
    %c0_21 = arith.constant 0 : index
    %c0_22 = arith.constant 0 : index
    %47 = vector.load %arg3[%c0_21, %c0_22] : memref<128x512xbf16, #tpu.memory_space<vmem>>, vector<128x512xbf16>
    %cst_23 = arith.constant dense<0.000000e+00> : vector<16x512xf32>
    %48 = tpu.matmul %46, %47, %cst_23 {dimension_numbers = #tpu.dot_dimension_numbers<[1], [0], [0], [1], [0, 0, 1, 1], [], []>} : vector<16x128xbf16>, vector<128x512xbf16>, vector<16x512xf32> -> vector<16x512xf32>
    %49 = arith.addf %45, %48 : vector<16x512xf32>
    %50 = vector.extract_strided_slice %49 {offsets = [0, 0], sizes = [16, 128], strides = [1, 1]} : vector<16x512xf32> to vector<16x128xf32>
    %51 = arith.negf %50 : vector<16x128xf32>
    %52 = math.exp %51 : vector<16x128xf32>
    %cst_24 = arith.constant 1.000000e+00 : f32
    %53 = vector.broadcast %cst_24 : f32 to vector<16x128xf32>
    %54 = arith.addf %53, %52 : vector<16x128xf32>
    %55 = arith.divf %53, %54 : vector<16x128xf32>
    %56 = vector.extract_strided_slice %49 {offsets = [0, 128], sizes = [16, 128], strides = [1, 1]} : vector<16x512xf32> to vector<16x128xf32>
    %57 = arith.negf %56 : vector<16x128xf32>
    %58 = math.exp %57 : vector<16x128xf32>
    %cst_25 = arith.constant 1.000000e+00 : f32
    %59 = vector.broadcast %cst_25 : f32 to vector<16x128xf32>
    %60 = arith.addf %59, %58 : vector<16x128xf32>
    %61 = arith.divf %59, %60 : vector<16x128xf32>
    %62 = vector.extract_strided_slice %49 {offsets = [0, 256], sizes = [16, 128], strides = [1, 1]} : vector<16x512xf32> to vector<16x128xf32>
    %63 = math.tanh %62 : vector<16x128xf32>
    %64 = vector.extract_strided_slice %49 {offsets = [0, 384], sizes = [16, 128], strides = [1, 1]} : vector<16x512xf32> to vector<16x128xf32>
    %65 = arith.negf %64 : vector<16x128xf32>
    %66 = math.exp %65 : vector<16x128xf32>
    %cst_26 = arith.constant 1.000000e+00 : f32
    %67 = vector.broadcast %cst_26 : f32 to vector<16x128xf32>
    %68 = arith.addf %67, %66 : vector<16x128xf32>
    %69 = arith.divf %67, %68 : vector<16x128xf32>
    %70 = arith.mulf %61, %39 : vector<16x128xf32>
    %71 = arith.mulf %55, %63 : vector<16x128xf32>
    %72 = arith.addf %70, %71 : vector<16x128xf32>
    %73 = math.tanh %72 : vector<16x128xf32>
    %74 = arith.mulf %69, %73 : vector<16x128xf32>
    %75 = arith.truncf %74 : vector<16x128xf32> to vector<16x128xbf16>
    %c16_27 = arith.constant 16 : index
    %c0_28 = arith.constant 0 : index
    %76 = vector.load %arg11[%c16_27, %c0_28] : memref<128x128xbf16, #tpu.memory_space<vmem>>, vector<16x128xbf16>
    tpu.vector_store %arg11[%c16_27, %c0_28], %75 {strides = array<i32>} : memref<128x128xbf16, #tpu.memory_space<vmem>>, vector<16x128xbf16>,
    %c32 = arith.constant 32 : index
    %c0_29 = arith.constant 0 : index
    %77 = vector.load %arg12[%c32, %c0_29] : memref<128x512xbf16, #tpu.memory_space<vmem>>, vector<16x512xbf16>
    %78 = arith.extf %77 : vector<16x512xbf16> to vector<16x512xf32>
    %79 = arith.truncf %74 : vector<16x128xf32> to vector<16x128xbf16>
    %c0_30 = arith.constant 0 : index
    %c0_31 = arith.constant 0 : index
    %80 = vector.load %arg3[%c0_30, %c0_31] : memref<128x512xbf16, #tpu.memory_space<vmem>>, vector<128x512xbf16>
    %cst_32 = arith.constant dense<0.000000e+00> : vector<16x512xf32>
    %81 = tpu.matmul %79, %80, %cst_32 {dimension_numbers = #tpu.dot_dimension_numbers<[1], [0], [0], [1], [0, 0, 1, 1], [], []>} : vector<16x128xbf16>, vector<128x512xbf16>, vector<16x512xf32> -> vector<16x512xf32>
    %82 = arith.addf %78, %81 : vector<16x512xf32>
    %83 = vector.extract_strided_slice %82 {offsets = [0, 0], sizes = [16, 128], strides = [1, 1]} : vector<16x512xf32> to vector<16x128xf32>
    %84 = arith.negf %83 : vector<16x128xf32>
    %85 = math.exp %84 : vector<16x128xf32>
    %cst_33 = arith.constant 1.000000e+00 : f32
    %86 = vector.broadcast %cst_33 : f32 to vector<16x128xf32>
    %87 = arith.addf %86, %85 : vector<16x128xf32>
    %88 = arith.divf %86, %87 : vector<16x128xf32>
    %89 = vector.extract_strided_slice %82 {offsets = [0, 128], sizes = [16, 128], strides = [1, 1]} : vector<16x512xf32> to vector<16x128xf32>
    %90 = arith.negf %89 : vector<16x128xf32>
    %91 = math.exp %90 : vector<16x128xf32>
    %cst_34 = arith.constant 1.000000e+00 : f32
    %92 = vector.broadcast %cst_34 : f32 to vector<16x128xf32>
    %93 = arith.addf %92, %91 : vector<16x128xf32>
    %94 = arith.divf %92, %93 : vector<16x128xf32>
    %95 = vector.extract_strided_slice %82 {offsets = [0, 256], sizes = [16, 128], strides = [1, 1]} : vector<16x512xf32> to vector<16x128xf32>
    %96 = math.tanh %95 : vector<16x128xf32>
    %97 = vector.extract_strided_slice %82 {offsets = [0, 384], sizes = [16, 128], strides = [1, 1]} : vector<16x512xf32> to vector<16x128xf32>
    %98 = arith.negf %97 : vector<16x128xf32>
    %99 = math.exp %98 : vector<16x128xf32>
    %cst_35 = arith.constant 1.000000e+00 : f32
    %100 = vector.broadcast %cst_35 : f32 to vector<16x128xf32>
    %101 = arith.addf %100, %99 : vector<16x128xf32>
    %102 = arith.divf %100, %101 : vector<16x128xf32>
    %103 = arith.mulf %94, %72 : vector<16x128xf32>
    %104 = arith.mulf %88, %96 : vector<16x128xf32>
    %105 = arith.addf %103, %104 : vector<16x128xf32>
    %106 = math.tanh %105 : vector<16x128xf32>
    %107 = arith.mulf %102, %106 : vector<16x128xf32>
    %108 = arith.truncf %107 : vector<16x128xf32> to vector<16x128xbf16>
    %c32_36 = arith.constant 32 : index
    %c0_37 = arith.constant 0 : index
    %109 = vector.load %arg11[%c32_36, %c0_37] : memref<128x128xbf16, #tpu.memory_space<vmem>>, vector<16x128xbf16>
    tpu.vector_store %arg11[%c32_36, %c0_37], %108 {strides = array<i32>} : memref<128x128xbf16, #tpu.memory_space<vmem>>, vector<16x128xbf16>,
    %c48 = arith.constant 48 : index
    %c0_38 = arith.constant 0 : index
    %110 = vector.load %arg12[%c48, %c0_38] : memref<128x512xbf16, #tpu.memory_space<vmem>>, vector<16x512xbf16>
    %111 = arith.extf %110 : vector<16x512xbf16> to vector<16x512xf32>
    %112 = arith.truncf %107 : vector<16x128xf32> to vector<16x128xbf16>
    %c0_39 = arith.constant 0 : index
    %c0_40 = arith.constant 0 : index
    %113 = vector.load %arg3[%c0_39, %c0_40] : memref<128x512xbf16, #tpu.memory_space<vmem>>, vector<128x512xbf16>
    %cst_41 = arith.constant dense<0.000000e+00> : vector<16x512xf32>
    %114 = tpu.matmul %112, %113, %cst_41 {dimension_numbers = #tpu.dot_dimension_numbers<[1], [0], [0], [1], [0, 0, 1, 1], [], []>} : vector<16x128xbf16>, vector<128x512xbf16>, vector<16x512xf32> -> vector<16x512xf32>
    %115 = arith.addf %111, %114 : vector<16x512xf32>
    %116 = vector.extract_strided_slice %115 {offsets = [0, 0], sizes = [16, 128], strides = [1, 1]} : vector<16x512xf32> to vector<16x128xf32>
    %117 = arith.negf %116 : vector<16x128xf32>
    %118 = math.exp %117 : vector<16x128xf32>
    %cst_42 = arith.constant 1.000000e+00 : f32
    %119 = vector.broadcast %cst_42 : f32 to vector<16x128xf32>
    %120 = arith.addf %119, %118 : vector<16x128xf32>
    %121 = arith.divf %119, %120 : vector<16x128xf32>
    %122 = vector.extract_strided_slice %115 {offsets = [0, 128], sizes = [16, 128], strides = [1, 1]} : vector<16x512xf32> to vector<16x128xf32>
    %123 = arith.negf %122 : vector<16x128xf32>
    %124 = math.exp %123 : vector<16x128xf32>
    %cst_43 = arith.constant 1.000000e+00 : f32
    %125 = vector.broadcast %cst_43 : f32 to vector<16x128xf32>
    %126 = arith.addf %125, %124 : vector<16x128xf32>
    %127 = arith.divf %125, %126 : vector<16x128xf32>
    %128 = vector.extract_strided_slice %115 {offsets = [0, 256], sizes = [16, 128], strides = [1, 1]} : vector<16x512xf32> to vector<16x128xf32>
    %129 = math.tanh %128 : vector<16x128xf32>
    %130 = vector.extract_strided_slice %115 {offsets = [0, 384], sizes = [16, 128], strides = [1, 1]} : vector<16x512xf32> to vector<16x128xf32>
    %131 = arith.negf %130 : vector<16x128xf32>
    %132 = math.exp %131 : vector<16x128xf32>
    %cst_44 = arith.constant 1.000000e+00 : f32
    %133 = vector.broadcast %cst_44 : f32 to vector<16x128xf32>
    %134 = arith.addf %133, %132 : vector<16x128xf32>
    %135 = arith.divf %133, %134 : vector<16x128xf32>
    %136 = arith.mulf %127, %105 : vector<16x128xf32>
    %137 = arith.mulf %121, %129 : vector<16x128xf32>
    %138 = arith.addf %136, %137 : vector<16x128xf32>
    %139 = math.tanh %138 : vector<16x128xf32>
    %140 = arith.mulf %135, %139 : vector<16x128xf32>
    %141 = arith.truncf %140 : vector<16x128xf32> to vector<16x128xbf16>
    %c48_45 = arith.constant 48 : index
    %c0_46 = arith.constant 0 : index
    %142 = vector.load %arg11[%c48_45, %c0_46] : memref<128x128xbf16, #tpu.memory_space<vmem>>, vector<16x128xbf16>
    tpu.vector_store %arg11[%c48_45, %c0_46], %141 {strides = array<i32>} : memref<128x128xbf16, #tpu.memory_space<vmem>>, vector<16x128xbf16>,
    %c64 = arith.constant 64 : index
    %c0_47 = arith.constant 0 : index
    %143 = vector.load %arg12[%c64, %c0_47] : memref<128x512xbf16, #tpu.memory_space<vmem>>, vector<16x512xbf16>
    %144 = arith.extf %143 : vector<16x512xbf16> to vector<16x512xf32>
    %145 = arith.truncf %140 : vector<16x128xf32> to vector<16x128xbf16>
    %c0_48 = arith.constant 0 : index
    %c0_49 = arith.constant 0 : index
    %146 = vector.load %arg3[%c0_48, %c0_49] : memref<128x512xbf16, #tpu.memory_space<vmem>>, vector<128x512xbf16>
    %cst_50 = arith.constant dense<0.000000e+00> : vector<16x512xf32>
    %147 = tpu.matmul %145, %146, %cst_50 {dimension_numbers = #tpu.dot_dimension_numbers<[1], [0], [0], [1], [0, 0, 1, 1], [], []>} : vector<16x128xbf16>, vector<128x512xbf16>, vector<16x512xf32> -> vector<16x512xf32>
    %148 = arith.addf %144, %147 : vector<16x512xf32>
    %149 = vector.extract_strided_slice %148 {offsets = [0, 0], sizes = [16, 128], strides = [1, 1]} : vector<16x512xf32> to vector<16x128xf32>
    %150 = arith.negf %149 : vector<16x128xf32>
    %151 = math.exp %150 : vector<16x128xf32>
    %cst_51 = arith.constant 1.000000e+00 : f32
    %152 = vector.broadcast %cst_51 : f32 to vector<16x128xf32>
    %153 = arith.addf %152, %151 : vector<16x128xf32>
    %154 = arith.divf %152, %153 : vector<16x128xf32>
    %155 = vector.extract_strided_slice %148 {offsets = [0, 128], sizes = [16, 128], strides = [1, 1]} : vector<16x512xf32> to vector<16x128xf32>
    %156 = arith.negf %155 : vector<16x128xf32>
    %157 = math.exp %156 : vector<16x128xf32>
    %cst_52 = arith.constant 1.000000e+00 : f32
    %158 = vector.broadcast %cst_52 : f32 to vector<16x128xf32>
    %159 = arith.addf %158, %157 : vector<16x128xf32>
    %160 = arith.divf %158, %159 : vector<16x128xf32>
    %161 = vector.extract_strided_slice %148 {offsets = [0, 256], sizes = [16, 128], strides = [1, 1]} : vector<16x512xf32> to vector<16x128xf32>
    %162 = math.tanh %161 : vector<16x128xf32>
    %163 = vector.extract_strided_slice %148 {offsets = [0, 384], sizes = [16, 128], strides = [1, 1]} : vector<16x512xf32> to vector<16x128xf32>
    %164 = arith.negf %163 : vector<16x128xf32>
    %165 = math.exp %164 : vector<16x128xf32>
    %cst_53 = arith.constant 1.000000e+00 : f32
    %166 = vector.broadcast %cst_53 : f32 to vector<16x128xf32>
    %167 = arith.addf %166, %165 : vector<16x128xf32>
    %168 = arith.divf %166, %167 : vector<16x128xf32>
    %169 = arith.mulf %160, %138 : vector<16x128xf32>
    %170 = arith.mulf %154, %162 : vector<16x128xf32>
    %171 = arith.addf %169, %170 : vector<16x128xf32>
    %172 = math.tanh %171 : vector<16x128xf32>
    %173 = arith.mulf %168, %172 : vector<16x128xf32>
    %174 = arith.truncf %173 : vector<16x128xf32> to vector<16x128xbf16>
    %c64_54 = arith.constant 64 : index
    %c0_55 = arith.constant 0 : index
    %175 = vector.load %arg11[%c64_54, %c0_55] : memref<128x128xbf16, #tpu.memory_space<vmem>>, vector<16x128xbf16>
    tpu.vector_store %arg11[%c64_54, %c0_55], %174 {strides = array<i32>} : memref<128x128xbf16, #tpu.memory_space<vmem>>, vector<16x128xbf16>,
    %c80 = arith.constant 80 : index
    %c0_56 = arith.constant 0 : index
    %176 = vector.load %arg12[%c80, %c0_56] : memref<128x512xbf16, #tpu.memory_space<vmem>>, vector<16x512xbf16>
    %177 = arith.extf %176 : vector<16x512xbf16> to vector<16x512xf32>
    %178 = arith.truncf %173 : vector<16x128xf32> to vector<16x128xbf16>
    %c0_57 = arith.constant 0 : index
    %c0_58 = arith.constant 0 : index
    %179 = vector.load %arg3[%c0_57, %c0_58] : memref<128x512xbf16, #tpu.memory_space<vmem>>, vector<128x512xbf16>
    %cst_59 = arith.constant dense<0.000000e+00> : vector<16x512xf32>
    %180 = tpu.matmul %178, %179, %cst_59 {dimension_numbers = #tpu.dot_dimension_numbers<[1], [0], [0], [1], [0, 0, 1, 1], [], []>} : vector<16x128xbf16>, vector<128x512xbf16>, vector<16x512xf32> -> vector<16x512xf32>
    %181 = arith.addf %177, %180 : vector<16x512xf32>
    %182 = vector.extract_strided_slice %181 {offsets = [0, 0], sizes = [16, 128], strides = [1, 1]} : vector<16x512xf32> to vector<16x128xf32>
    %183 = arith.negf %182 : vector<16x128xf32>
    %184 = math.exp %183 : vector<16x128xf32>
    %cst_60 = arith.constant 1.000000e+00 : f32
    %185 = vector.broadcast %cst_60 : f32 to vector<16x128xf32>
    %186 = arith.addf %185, %184 : vector<16x128xf32>
    %187 = arith.divf %185, %186 : vector<16x128xf32>
    %188 = vector.extract_strided_slice %181 {offsets = [0, 128], sizes = [16, 128], strides = [1, 1]} : vector<16x512xf32> to vector<16x128xf32>
    %189 = arith.negf %188 : vector<16x128xf32>
    %190 = math.exp %189 : vector<16x128xf32>
    %cst_61 = arith.constant 1.000000e+00 : f32
    %191 = vector.broadcast %cst_61 : f32 to vector<16x128xf32>
    %192 = arith.addf %191, %190 : vector<16x128xf32>
    %193 = arith.divf %191, %192 : vector<16x128xf32>
    %194 = vector.extract_strided_slice %181 {offsets = [0, 256], sizes = [16, 128], strides = [1, 1]} : vector<16x512xf32> to vector<16x128xf32>
    %195 = math.tanh %194 : vector<16x128xf32>
    %196 = vector.extract_strided_slice %181 {offsets = [0, 384], sizes = [16, 128], strides = [1, 1]} : vector<16x512xf32> to vector<16x128xf32>
    %197 = arith.negf %196 : vector<16x128xf32>
    %198 = math.exp %197 : vector<16x128xf32>
    %cst_62 = arith.constant 1.000000e+00 : f32
    %199 = vector.broadcast %cst_62 : f32 to vector<16x128xf32>
    %200 = arith.addf %199, %198 : vector<16x128xf32>
    %201 = arith.divf %199, %200 : vector<16x128xf32>
    %202 = arith.mulf %193, %171 : vector<16x128xf32>
    %203 = arith.mulf %187, %195 : vector<16x128xf32>
    %204 = arith.addf %202, %203 : vector<16x128xf32>
    %205 = math.tanh %204 : vector<16x128xf32>
    %206 = arith.mulf %201, %205 : vector<16x128xf32>
    %207 = arith.truncf %206 : vector<16x128xf32> to vector<16x128xbf16>
    %c80_63 = arith.constant 80 : index
    %c0_64 = arith.constant 0 : index
    %208 = vector.load %arg11[%c80_63, %c0_64] : memref<128x128xbf16, #tpu.memory_space<vmem>>, vector<16x128xbf16>
    tpu.vector_store %arg11[%c80_63, %c0_64], %207 {strides = array<i32>} : memref<128x128xbf16, #tpu.memory_space<vmem>>, vector<16x128xbf16>,
    %c96 = arith.constant 96 : index
    %c0_65 = arith.constant 0 : index
    %209 = vector.load %arg12[%c96, %c0_65] : memref<128x512xbf16, #tpu.memory_space<vmem>>, vector<16x512xbf16>
    %210 = arith.extf %209 : vector<16x512xbf16> to vector<16x512xf32>
    %211 = arith.truncf %206 : vector<16x128xf32> to vector<16x128xbf16>
    %c0_66 = arith.constant 0 : index
    %c0_67 = arith.constant 0 : index
    %212 = vector.load %arg3[%c0_66, %c0_67] : memref<128x512xbf16, #tpu.memory_space<vmem>>, vector<128x512xbf16>
    %cst_68 = arith.constant dense<0.000000e+00> : vector<16x512xf32>
    %213 = tpu.matmul %211, %212, %cst_68 {dimension_numbers = #tpu.dot_dimension_numbers<[1], [0], [0], [1], [0, 0, 1, 1], [], []>} : vector<16x128xbf16>, vector<128x512xbf16>, vector<16x512xf32> -> vector<16x512xf32>
    %214 = arith.addf %210, %213 : vector<16x512xf32>
    %215 = vector.extract_strided_slice %214 {offsets = [0, 0], sizes = [16, 128], strides = [1, 1]} : vector<16x512xf32> to vector<16x128xf32>
    %216 = arith.negf %215 : vector<16x128xf32>
    %217 = math.exp %216 : vector<16x128xf32>
    %cst_69 = arith.constant 1.000000e+00 : f32
    %218 = vector.broadcast %cst_69 : f32 to vector<16x128xf32>
    %219 = arith.addf %218, %217 : vector<16x128xf32>
    %220 = arith.divf %218, %219 : vector<16x128xf32>
    %221 = vector.extract_strided_slice %214 {offsets = [0, 128], sizes = [16, 128], strides = [1, 1]} : vector<16x512xf32> to vector<16x128xf32>
    %222 = arith.negf %221 : vector<16x128xf32>
    %223 = math.exp %222 : vector<16x128xf32>
    %cst_70 = arith.constant 1.000000e+00 : f32
    %224 = vector.broadcast %cst_70 : f32 to vector<16x128xf32>
    %225 = arith.addf %224, %223 : vector<16x128xf32>
    %226 = arith.divf %224, %225 : vector<16x128xf32>
    %227 = vector.extract_strided_slice %214 {offsets = [0, 256], sizes = [16, 128], strides = [1, 1]} : vector<16x512xf32> to vector<16x128xf32>
    %228 = math.tanh %227 : vector<16x128xf32>
    %229 = vector.extract_strided_slice %214 {offsets = [0, 384], sizes = [16, 128], strides = [1, 1]} : vector<16x512xf32> to vector<16x128xf32>
    %230 = arith.negf %229 : vector<16x128xf32>
    %231 = math.exp %230 : vector<16x128xf32>
    %cst_71 = arith.constant 1.000000e+00 : f32
    %232 = vector.broadcast %cst_71 : f32 to vector<16x128xf32>
    %233 = arith.addf %232, %231 : vector<16x128xf32>
    %234 = arith.divf %232, %233 : vector<16x128xf32>
    %235 = arith.mulf %226, %204 : vector<16x128xf32>
    %236 = arith.mulf %220, %228 : vector<16x128xf32>
    %237 = arith.addf %235, %236 : vector<16x128xf32>
    %238 = math.tanh %237 : vector<16x128xf32>
    %239 = arith.mulf %234, %238 : vector<16x128xf32>
    %240 = arith.truncf %239 : vector<16x128xf32> to vector<16x128xbf16>
    %c96_72 = arith.constant 96 : index
    %c0_73 = arith.constant 0 : index
    %241 = vector.load %arg11[%c96_72, %c0_73] : memref<128x128xbf16, #tpu.memory_space<vmem>>, vector<16x128xbf16>
    tpu.vector_store %arg11[%c96_72, %c0_73], %240 {strides = array<i32>} : memref<128x128xbf16, #tpu.memory_space<vmem>>, vector<16x128xbf16>,
    %c112 = arith.constant 112 : index
    %c0_74 = arith.constant 0 : index
    %242 = vector.load %arg12[%c112, %c0_74] : memref<128x512xbf16, #tpu.memory_space<vmem>>, vector<16x512xbf16>
    %243 = arith.extf %242 : vector<16x512xbf16> to vector<16x512xf32>
    %244 = arith.truncf %239 : vector<16x128xf32> to vector<16x128xbf16>
    %c0_75 = arith.constant 0 : index
    %c0_76 = arith.constant 0 : index
    %245 = vector.load %arg3[%c0_75, %c0_76] : memref<128x512xbf16, #tpu.memory_space<vmem>>, vector<128x512xbf16>
    %cst_77 = arith.constant dense<0.000000e+00> : vector<16x512xf32>
    %246 = tpu.matmul %244, %245, %cst_77 {dimension_numbers = #tpu.dot_dimension_numbers<[1], [0], [0], [1], [0, 0, 1, 1], [], []>} : vector<16x128xbf16>, vector<128x512xbf16>, vector<16x512xf32> -> vector<16x512xf32>
    %247 = arith.addf %243, %246 : vector<16x512xf32>
    %248 = vector.extract_strided_slice %247 {offsets = [0, 0], sizes = [16, 128], strides = [1, 1]} : vector<16x512xf32> to vector<16x128xf32>
    %249 = arith.negf %248 : vector<16x128xf32>
    %250 = math.exp %249 : vector<16x128xf32>
    %cst_78 = arith.constant 1.000000e+00 : f32
    %251 = vector.broadcast %cst_78 : f32 to vector<16x128xf32>
    %252 = arith.addf %251, %250 : vector<16x128xf32>
    %253 = arith.divf %251, %252 : vector<16x128xf32>
    %254 = vector.extract_strided_slice %247 {offsets = [0, 128], sizes = [16, 128], strides = [1, 1]} : vector<16x512xf32> to vector<16x128xf32>
    %255 = arith.negf %254 : vector<16x128xf32>
    %256 = math.exp %255 : vector<16x128xf32>
    %cst_79 = arith.constant 1.000000e+00 : f32
    %257 = vector.broadcast %cst_79 : f32 to vector<16x128xf32>
    %258 = arith.addf %257, %256 : vector<16x128xf32>
    %259 = arith.divf %257, %258 : vector<16x128xf32>
    %260 = vector.extract_strided_slice %247 {offsets = [0, 256], sizes = [16, 128], strides = [1, 1]} : vector<16x512xf32> to vector<16x128xf32>
    %261 = math.tanh %260 : vector<16x128xf32>
    %262 = vector.extract_strided_slice %247 {offsets = [0, 384], sizes = [16, 128], strides = [1, 1]} : vector<16x512xf32> to vector<16x128xf32>
    %263 = arith.negf %262 : vector<16x128xf32>
    %264 = math.exp %263 : vector<16x128xf32>
    %cst_80 = arith.constant 1.000000e+00 : f32
    %265 = vector.broadcast %cst_80 : f32 to vector<16x128xf32>
    %266 = arith.addf %265, %264 : vector<16x128xf32>
    %267 = arith.divf %265, %266 : vector<16x128xf32>
    %268 = arith.mulf %259, %237 : vector<16x128xf32>
    %269 = arith.mulf %253, %261 : vector<16x128xf32>
    %270 = arith.addf %268, %269 : vector<16x128xf32>
    %271 = math.tanh %270 : vector<16x128xf32>
    %272 = arith.mulf %267, %271 : vector<16x128xf32>
    %273 = arith.truncf %272 : vector<16x128xf32> to vector<16x128xbf16>
    %c112_81 = arith.constant 112 : index
    %c0_82 = arith.constant 0 : index
    %274 = vector.load %arg11[%c112_81, %c0_82] : memref<128x128xbf16, #tpu.memory_space<vmem>>, vector<16x128xbf16>
    tpu.vector_store %arg11[%c112_81, %c0_82], %273 {strides = array<i32>} : memref<128x128xbf16, #tpu.memory_space<vmem>>, vector<16x128xbf16>,
    %c0_83 = arith.constant 0 : index
    %c0_84 = arith.constant 0 : index
    %275 = vector.load %arg11[%c0_83, %c0_84] : memref<128x128xbf16, #tpu.memory_space<vmem>>, vector<128x128xbf16>
    %c0_85 = arith.constant 0 : index
    %c0_86 = arith.constant 0 : index
    %276 = vector.load %arg5[%c0_85, %c0_86] : memref<128x512xbf16, #tpu.memory_space<vmem>>, vector<128x512xbf16>
    %cst_87 = arith.constant dense<0.000000e+00> : vector<128x512xf32>
    %277 = tpu.matmul %275, %276, %cst_87 {dimension_numbers = #tpu.dot_dimension_numbers<[1], [0], [0], [1], [0, 0, 1, 1], [], []>} : vector<128x128xbf16>, vector<128x512xbf16>, vector<128x512xf32> -> vector<128x512xf32>
    %c0_88 = arith.constant 0 : index
    %c0_89 = arith.constant 0 : index
    %278 = vector.load %arg7[%c0_88, %c0_89] : memref<1x512xf32, #tpu.memory_space<vmem>>, vector<1x512xf32>
    %279 = vector.broadcast %278 : vector<1x512xf32> to vector<128x512xf32>
    %280 = arith.addf %277, %279 : vector<128x512xf32>
    %281 = arith.truncf %280 : vector<128x512xf32> to vector<128x512xbf16>
    %c0_90 = arith.constant 0 : index
    %c0_91 = arith.constant 0 : index
    %282 = vector.load %arg12[%c0_90, %c0_91] : memref<128x512xbf16, #tpu.memory_space<vmem>>, vector<128x512xbf16>
    tpu.vector_store %arg12[%c0_90, %c0_91], %281 {strides = array<i32>} : memref<128x512xbf16, #tpu.memory_space<vmem>>, vector<128x512xbf16>,
    %cst_92 = arith.constant 0.000000e+00 : f32
    %283 = vector.broadcast %cst_92 : f32 to vector<16x128xf32>
    %cst_93 = arith.constant 0.000000e+00 : f32
    %284 = vector.broadcast %cst_93 : f32 to vector<16x128xf32>
    %c0_94 = arith.constant 0 : index
    %c0_95 = arith.constant 0 : index
    %285 = vector.load %arg12[%c0_94, %c0_95] : memref<128x512xbf16, #tpu.memory_space<vmem>>, vector<16x512xbf16>
    %286 = arith.extf %285 : vector<16x512xbf16> to vector<16x512xf32>
    %287 = arith.truncf %283 : vector<16x128xf32> to vector<16x128xbf16>
    %c0_96 = arith.constant 0 : index
    %c0_97 = arith.constant 0 : index
    %288 = vector.load %arg6[%c0_96, %c0_97] : memref<128x512xbf16, #tpu.memory_space<vmem>>, vector<128x512xbf16>
    %cst_98 = arith.constant dense<0.000000e+00> : vector<16x512xf32>
    %289 = tpu.matmul %287, %288, %cst_98 {dimension_numbers = #tpu.dot_dimension_numbers<[1], [0], [0], [1], [0, 0, 1, 1], [], []>} : vector<16x128xbf16>, vector<128x512xbf16>, vector<16x512xf32> -> vector<16x512xf32>
    %290 = arith.addf %286, %289 : vector<16x512xf32>
    %291 = vector.extract_strided_slice %290 {offsets = [0, 0], sizes = [16, 128], strides = [1, 1]} : vector<16x512xf32> to vector<16x128xf32>
    %292 = arith.negf %291 : vector<16x128xf32>
    %293 = math.exp %292 : vector<16x128xf32>
    %cst_99 = arith.constant 1.000000e+00 : f32
    %294 = vector.broadcast %cst_99 : f32 to vector<16x128xf32>
    %295 = arith.addf %294, %293 : vector<16x128xf32>
    %296 = arith.divf %294, %295 : vector<16x128xf32>
    %297 = vector.extract_strided_slice %290 {offsets = [0, 128], sizes = [16, 128], strides = [1, 1]} : vector<16x512xf32> to vector<16x128xf32>
    %298 = arith.negf %297 : vector<16x128xf32>
    %299 = math.exp %298 : vector<16x128xf32>
    %cst_100 = arith.constant 1.000000e+00 : f32
    %300 = vector.broadcast %cst_100 : f32 to vector<16x128xf32>
    %301 = arith.addf %300, %299 : vector<16x128xf32>
    %302 = arith.divf %300, %301 : vector<16x128xf32>
    %303 = vector.extract_strided_slice %290 {offsets = [0, 256], sizes = [16, 128], strides = [1, 1]} : vector<16x512xf32> to vector<16x128xf32>
    %304 = math.tanh %303 : vector<16x128xf32>
    %305 = vector.extract_strided_slice %290 {offsets = [0, 384], sizes = [16, 128], strides = [1, 1]} : vector<16x512xf32> to vector<16x128xf32>
    %306 = arith.negf %305 : vector<16x128xf32>
    %307 = math.exp %306 : vector<16x128xf32>
    %cst_101 = arith.constant 1.000000e+00 : f32
    %308 = vector.broadcast %cst_101 : f32 to vector<16x128xf32>
    %309 = arith.addf %308, %307 : vector<16x128xf32>
    %310 = arith.divf %308, %309 : vector<16x128xf32>
    %311 = arith.mulf %302, %284 : vector<16x128xf32>
    %312 = arith.mulf %296, %304 : vector<16x128xf32>
    %313 = arith.addf %311, %312 : vector<16x128xf32>
    %314 = math.tanh %313 : vector<16x128xf32>
    %315 = arith.mulf %310, %314 : vector<16x128xf32>
    %316 = arith.truncf %315 : vector<16x128xf32> to vector<16x128xbf16>
    %c0_102 = arith.constant 0 : index
    %c0_103 = arith.constant 0 : index
    %317 = vector.load %arg11[%c0_102, %c0_103] : memref<128x128xbf16, #tpu.memory_space<vmem>>, vector<16x128xbf16>
    tpu.vector_store %arg11[%c0_102, %c0_103], %316 {strides = array<i32>} : memref<128x128xbf16, #tpu.memory_space<vmem>>, vector<16x128xbf16>,
    %c16_104 = arith.constant 16 : index
    %c0_105 = arith.constant 0 : index
    %318 = vector.load %arg12[%c16_104, %c0_105] : memref<128x512xbf16, #tpu.memory_space<vmem>>, vector<16x512xbf16>
    %319 = arith.extf %318 : vector<16x512xbf16> to vector<16x512xf32>
    %320 = arith.truncf %315 : vector<16x128xf32> to vector<16x128xbf16>
    %c0_106 = arith.constant 0 : index
    %c0_107 = arith.constant 0 : index
    %321 = vector.load %arg6[%c0_106, %c0_107] : memref<128x512xbf16, #tpu.memory_space<vmem>>, vector<128x512xbf16>
    %cst_108 = arith.constant dense<0.000000e+00> : vector<16x512xf32>
    %322 = tpu.matmul %320, %321, %cst_108 {dimension_numbers = #tpu.dot_dimension_numbers<[1], [0], [0], [1], [0, 0, 1, 1], [], []>} : vector<16x128xbf16>, vector<128x512xbf16>, vector<16x512xf32> -> vector<16x512xf32>
    %323 = arith.addf %319, %322 : vector<16x512xf32>
    %324 = vector.extract_strided_slice %323 {offsets = [0, 0], sizes = [16, 128], strides = [1, 1]} : vector<16x512xf32> to vector<16x128xf32>
    %325 = arith.negf %324 : vector<16x128xf32>
    %326 = math.exp %325 : vector<16x128xf32>
    %cst_109 = arith.constant 1.000000e+00 : f32
    %327 = vector.broadcast %cst_109 : f32 to vector<16x128xf32>
    %328 = arith.addf %327, %326 : vector<16x128xf32>
    %329 = arith.divf %327, %328 : vector<16x128xf32>
    %330 = vector.extract_strided_slice %323 {offsets = [0, 128], sizes = [16, 128], strides = [1, 1]} : vector<16x512xf32> to vector<16x128xf32>
    %331 = arith.negf %330 : vector<16x128xf32>
    %332 = math.exp %331 : vector<16x128xf32>
    %cst_110 = arith.constant 1.000000e+00 : f32
    %333 = vector.broadcast %cst_110 : f32 to vector<16x128xf32>
    %334 = arith.addf %333, %332 : vector<16x128xf32>
    %335 = arith.divf %333, %334 : vector<16x128xf32>
    %336 = vector.extract_strided_slice %323 {offsets = [0, 256], sizes = [16, 128], strides = [1, 1]} : vector<16x512xf32> to vector<16x128xf32>
    %337 = math.tanh %336 : vector<16x128xf32>
    %338 = vector.extract_strided_slice %323 {offsets = [0, 384], sizes = [16, 128], strides = [1, 1]} : vector<16x512xf32> to vector<16x128xf32>
    %339 = arith.negf %338 : vector<16x128xf32>
    %340 = math.exp %339 : vector<16x128xf32>
    %cst_111 = arith.constant 1.000000e+00 : f32
    %341 = vector.broadcast %cst_111 : f32 to vector<16x128xf32>
    %342 = arith.addf %341, %340 : vector<16x128xf32>
    %343 = arith.divf %341, %342 : vector<16x128xf32>
    %344 = arith.mulf %335, %313 : vector<16x128xf32>
    %345 = arith.mulf %329, %337 : vector<16x128xf32>
    %346 = arith.addf %344, %345 : vector<16x128xf32>
    %347 = math.tanh %346 : vector<16x128xf32>
    %348 = arith.mulf %343, %347 : vector<16x128xf32>
    %349 = arith.truncf %348 : vector<16x128xf32> to vector<16x128xbf16>
    %c16_112 = arith.constant 16 : index
    %c0_113 = arith.constant 0 : index
    %350 = vector.load %arg11[%c16_112, %c0_113] : memref<128x128xbf16, #tpu.memory_space<vmem>>, vector<16x128xbf16>
    tpu.vector_store %arg11[%c16_112, %c0_113], %349 {strides = array<i32>} : memref<128x128xbf16, #tpu.memory_space<vmem>>, vector<16x128xbf16>,
    %c32_114 = arith.constant 32 : index
    %c0_115 = arith.constant 0 : index
    %351 = vector.load %arg12[%c32_114, %c0_115] : memref<128x512xbf16, #tpu.memory_space<vmem>>, vector<16x512xbf16>
    %352 = arith.extf %351 : vector<16x512xbf16> to vector<16x512xf32>
    %353 = arith.truncf %348 : vector<16x128xf32> to vector<16x128xbf16>
    %c0_116 = arith.constant 0 : index
    %c0_117 = arith.constant 0 : index
    %354 = vector.load %arg6[%c0_116, %c0_117] : memref<128x512xbf16, #tpu.memory_space<vmem>>, vector<128x512xbf16>
    %cst_118 = arith.constant dense<0.000000e+00> : vector<16x512xf32>
    %355 = tpu.matmul %353, %354, %cst_118 {dimension_numbers = #tpu.dot_dimension_numbers<[1], [0], [0], [1], [0, 0, 1, 1], [], []>} : vector<16x128xbf16>, vector<128x512xbf16>, vector<16x512xf32> -> vector<16x512xf32>
    %356 = arith.addf %352, %355 : vector<16x512xf32>
    %357 = vector.extract_strided_slice %356 {offsets = [0, 0], sizes = [16, 128], strides = [1, 1]} : vector<16x512xf32> to vector<16x128xf32>
    %358 = arith.negf %357 : vector<16x128xf32>
    %359 = math.exp %358 : vector<16x128xf32>
    %cst_119 = arith.constant 1.000000e+00 : f32
    %360 = vector.broadcast %cst_119 : f32 to vector<16x128xf32>
    %361 = arith.addf %360, %359 : vector<16x128xf32>
    %362 = arith.divf %360, %361 : vector<16x128xf32>
    %363 = vector.extract_strided_slice %356 {offsets = [0, 128], sizes = [16, 128], strides = [1, 1]} : vector<16x512xf32> to vector<16x128xf32>
    %364 = arith.negf %363 : vector<16x128xf32>
    %365 = math.exp %364 : vector<16x128xf32>
    %cst_120 = arith.constant 1.000000e+00 : f32
    %366 = vector.broadcast %cst_120 : f32 to vector<16x128xf32>
    %367 = arith.addf %366, %365 : vector<16x128xf32>
    %368 = arith.divf %366, %367 : vector<16x128xf32>
    %369 = vector.extract_strided_slice %356 {offsets = [0, 256], sizes = [16, 128], strides = [1, 1]} : vector<16x512xf32> to vector<16x128xf32>
    %370 = math.tanh %369 : vector<16x128xf32>
    %371 = vector.extract_strided_slice %356 {offsets = [0, 384], sizes = [16, 128], strides = [1, 1]} : vector<16x512xf32> to vector<16x128xf32>
    %372 = arith.negf %371 : vector<16x128xf32>
    %373 = math.exp %372 : vector<16x128xf32>
    %cst_121 = arith.constant 1.000000e+00 : f32
    %374 = vector.broadcast %cst_121 : f32 to vector<16x128xf32>
    %375 = arith.addf %374, %373 : vector<16x128xf32>
    %376 = arith.divf %374, %375 : vector<16x128xf32>
    %377 = arith.mulf %368, %346 : vector<16x128xf32>
    %378 = arith.mulf %362, %370 : vector<16x128xf32>
    %379 = arith.addf %377, %378 : vector<16x128xf32>
    %380 = math.tanh %379 : vector<16x128xf32>
    %381 = arith.mulf %376, %380 : vector<16x128xf32>
    %382 = arith.truncf %381 : vector<16x128xf32> to vector<16x128xbf16>
    %c32_122 = arith.constant 32 : index
    %c0_123 = arith.constant 0 : index
    %383 = vector.load %arg11[%c32_122, %c0_123] : memref<128x128xbf16, #tpu.memory_space<vmem>>, vector<16x128xbf16>
    tpu.vector_store %arg11[%c32_122, %c0_123], %382 {strides = array<i32>} : memref<128x128xbf16, #tpu.memory_space<vmem>>, vector<16x128xbf16>,
    %c48_124 = arith.constant 48 : index
    %c0_125 = arith.constant 0 : index
    %384 = vector.load %arg12[%c48_124, %c0_125] : memref<128x512xbf16, #tpu.memory_space<vmem>>, vector<16x512xbf16>
    %385 = arith.extf %384 : vector<16x512xbf16> to vector<16x512xf32>
    %386 = arith.truncf %381 : vector<16x128xf32> to vector<16x128xbf16>
    %c0_126 = arith.constant 0 : index
    %c0_127 = arith.constant 0 : index
    %387 = vector.load %arg6[%c0_126, %c0_127] : memref<128x512xbf16, #tpu.memory_space<vmem>>, vector<128x512xbf16>
    %cst_128 = arith.constant dense<0.000000e+00> : vector<16x512xf32>
    %388 = tpu.matmul %386, %387, %cst_128 {dimension_numbers = #tpu.dot_dimension_numbers<[1], [0], [0], [1], [0, 0, 1, 1], [], []>} : vector<16x128xbf16>, vector<128x512xbf16>, vector<16x512xf32> -> vector<16x512xf32>
    %389 = arith.addf %385, %388 : vector<16x512xf32>
    %390 = vector.extract_strided_slice %389 {offsets = [0, 0], sizes = [16, 128], strides = [1, 1]} : vector<16x512xf32> to vector<16x128xf32>
    %391 = arith.negf %390 : vector<16x128xf32>
    %392 = math.exp %391 : vector<16x128xf32>
    %cst_129 = arith.constant 1.000000e+00 : f32
    %393 = vector.broadcast %cst_129 : f32 to vector<16x128xf32>
    %394 = arith.addf %393, %392 : vector<16x128xf32>
    %395 = arith.divf %393, %394 : vector<16x128xf32>
    %396 = vector.extract_strided_slice %389 {offsets = [0, 128], sizes = [16, 128], strides = [1, 1]} : vector<16x512xf32> to vector<16x128xf32>
    %397 = arith.negf %396 : vector<16x128xf32>
    %398 = math.exp %397 : vector<16x128xf32>
    %cst_130 = arith.constant 1.000000e+00 : f32
    %399 = vector.broadcast %cst_130 : f32 to vector<16x128xf32>
    %400 = arith.addf %399, %398 : vector<16x128xf32>
    %401 = arith.divf %399, %400 : vector<16x128xf32>
    %402 = vector.extract_strided_slice %389 {offsets = [0, 256], sizes = [16, 128], strides = [1, 1]} : vector<16x512xf32> to vector<16x128xf32>
    %403 = math.tanh %402 : vector<16x128xf32>
    %404 = vector.extract_strided_slice %389 {offsets = [0, 384], sizes = [16, 128], strides = [1, 1]} : vector<16x512xf32> to vector<16x128xf32>
    %405 = arith.negf %404 : vector<16x128xf32>
    %406 = math.exp %405 : vector<16x128xf32>
    %cst_131 = arith.constant 1.000000e+00 : f32
    %407 = vector.broadcast %cst_131 : f32 to vector<16x128xf32>
    %408 = arith.addf %407, %406 : vector<16x128xf32>
    %409 = arith.divf %407, %408 : vector<16x128xf32>
    %410 = arith.mulf %401, %379 : vector<16x128xf32>
    %411 = arith.mulf %395, %403 : vector<16x128xf32>
    %412 = arith.addf %410, %411 : vector<16x128xf32>
    %413 = math.tanh %412 : vector<16x128xf32>
    %414 = arith.mulf %409, %413 : vector<16x128xf32>
    %415 = arith.truncf %414 : vector<16x128xf32> to vector<16x128xbf16>
    %c48_132 = arith.constant 48 : index
    %c0_133 = arith.constant 0 : index
    %416 = vector.load %arg11[%c48_132, %c0_133] : memref<128x128xbf16, #tpu.memory_space<vmem>>, vector<16x128xbf16>
    tpu.vector_store %arg11[%c48_132, %c0_133], %415 {strides = array<i32>} : memref<128x128xbf16, #tpu.memory_space<vmem>>, vector<16x128xbf16>,
    %c64_134 = arith.constant 64 : index
    %c0_135 = arith.constant 0 : index
    %417 = vector.load %arg12[%c64_134, %c0_135] : memref<128x512xbf16, #tpu.memory_space<vmem>>, vector<16x512xbf16>
    %418 = arith.extf %417 : vector<16x512xbf16> to vector<16x512xf32>
    %419 = arith.truncf %414 : vector<16x128xf32> to vector<16x128xbf16>
    %c0_136 = arith.constant 0 : index
    %c0_137 = arith.constant 0 : index
    %420 = vector.load %arg6[%c0_136, %c0_137] : memref<128x512xbf16, #tpu.memory_space<vmem>>, vector<128x512xbf16>
    %cst_138 = arith.constant dense<0.000000e+00> : vector<16x512xf32>
    %421 = tpu.matmul %419, %420, %cst_138 {dimension_numbers = #tpu.dot_dimension_numbers<[1], [0], [0], [1], [0, 0, 1, 1], [], []>} : vector<16x128xbf16>, vector<128x512xbf16>, vector<16x512xf32> -> vector<16x512xf32>
    %422 = arith.addf %418, %421 : vector<16x512xf32>
    %423 = vector.extract_strided_slice %422 {offsets = [0, 0], sizes = [16, 128], strides = [1, 1]} : vector<16x512xf32> to vector<16x128xf32>
    %424 = arith.negf %423 : vector<16x128xf32>
    %425 = math.exp %424 : vector<16x128xf32>
    %cst_139 = arith.constant 1.000000e+00 : f32
    %426 = vector.broadcast %cst_139 : f32 to vector<16x128xf32>
    %427 = arith.addf %426, %425 : vector<16x128xf32>
    %428 = arith.divf %426, %427 : vector<16x128xf32>
    %429 = vector.extract_strided_slice %422 {offsets = [0, 128], sizes = [16, 128], strides = [1, 1]} : vector<16x512xf32> to vector<16x128xf32>
    %430 = arith.negf %429 : vector<16x128xf32>
    %431 = math.exp %430 : vector<16x128xf32>
    %cst_140 = arith.constant 1.000000e+00 : f32
    %432 = vector.broadcast %cst_140 : f32 to vector<16x128xf32>
    %433 = arith.addf %432, %431 : vector<16x128xf32>
    %434 = arith.divf %432, %433 : vector<16x128xf32>
    %435 = vector.extract_strided_slice %422 {offsets = [0, 256], sizes = [16, 128], strides = [1, 1]} : vector<16x512xf32> to vector<16x128xf32>
    %436 = math.tanh %435 : vector<16x128xf32>
    %437 = vector.extract_strided_slice %422 {offsets = [0, 384], sizes = [16, 128], strides = [1, 1]} : vector<16x512xf32> to vector<16x128xf32>
    %438 = arith.negf %437 : vector<16x128xf32>
    %439 = math.exp %438 : vector<16x128xf32>
    %cst_141 = arith.constant 1.000000e+00 : f32
    %440 = vector.broadcast %cst_141 : f32 to vector<16x128xf32>
    %441 = arith.addf %440, %439 : vector<16x128xf32>
    %442 = arith.divf %440, %441 : vector<16x128xf32>
    %443 = arith.mulf %434, %412 : vector<16x128xf32>
    %444 = arith.mulf %428, %436 : vector<16x128xf32>
    %445 = arith.addf %443, %444 : vector<16x128xf32>
    %446 = math.tanh %445 : vector<16x128xf32>
    %447 = arith.mulf %442, %446 : vector<16x128xf32>
    %448 = arith.truncf %447 : vector<16x128xf32> to vector<16x128xbf16>
    %c64_142 = arith.constant 64 : index
    %c0_143 = arith.constant 0 : index
    %449 = vector.load %arg11[%c64_142, %c0_143] : memref<128x128xbf16, #tpu.memory_space<vmem>>, vector<16x128xbf16>
    tpu.vector_store %arg11[%c64_142, %c0_143], %448 {strides = array<i32>} : memref<128x128xbf16, #tpu.memory_space<vmem>>, vector<16x128xbf16>,
    %c80_144 = arith.constant 80 : index
    %c0_145 = arith.constant 0 : index
    %450 = vector.load %arg12[%c80_144, %c0_145] : memref<128x512xbf16, #tpu.memory_space<vmem>>, vector<16x512xbf16>
    %451 = arith.extf %450 : vector<16x512xbf16> to vector<16x512xf32>
    %452 = arith.truncf %447 : vector<16x128xf32> to vector<16x128xbf16>
    %c0_146 = arith.constant 0 : index
    %c0_147 = arith.constant 0 : index
    %453 = vector.load %arg6[%c0_146, %c0_147] : memref<128x512xbf16, #tpu.memory_space<vmem>>, vector<128x512xbf16>
    %cst_148 = arith.constant dense<0.000000e+00> : vector<16x512xf32>
    %454 = tpu.matmul %452, %453, %cst_148 {dimension_numbers = #tpu.dot_dimension_numbers<[1], [0], [0], [1], [0, 0, 1, 1], [], []>} : vector<16x128xbf16>, vector<128x512xbf16>, vector<16x512xf32> -> vector<16x512xf32>
    %455 = arith.addf %451, %454 : vector<16x512xf32>
    %456 = vector.extract_strided_slice %455 {offsets = [0, 0], sizes = [16, 128], strides = [1, 1]} : vector<16x512xf32> to vector<16x128xf32>
    %457 = arith.negf %456 : vector<16x128xf32>
    %458 = math.exp %457 : vector<16x128xf32>
    %cst_149 = arith.constant 1.000000e+00 : f32
    %459 = vector.broadcast %cst_149 : f32 to vector<16x128xf32>
    %460 = arith.addf %459, %458 : vector<16x128xf32>
    %461 = arith.divf %459, %460 : vector<16x128xf32>
    %462 = vector.extract_strided_slice %455 {offsets = [0, 128], sizes = [16, 128], strides = [1, 1]} : vector<16x512xf32> to vector<16x128xf32>
    %463 = arith.negf %462 : vector<16x128xf32>
    %464 = math.exp %463 : vector<16x128xf32>
    %cst_150 = arith.constant 1.000000e+00 : f32
    %465 = vector.broadcast %cst_150 : f32 to vector<16x128xf32>
    %466 = arith.addf %465, %464 : vector<16x128xf32>
    %467 = arith.divf %465, %466 : vector<16x128xf32>
    %468 = vector.extract_strided_slice %455 {offsets = [0, 256], sizes = [16, 128], strides = [1, 1]} : vector<16x512xf32> to vector<16x128xf32>
    %469 = math.tanh %468 : vector<16x128xf32>
    %470 = vector.extract_strided_slice %455 {offsets = [0, 384], sizes = [16, 128], strides = [1, 1]} : vector<16x512xf32> to vector<16x128xf32>
    %471 = arith.negf %470 : vector<16x128xf32>
    %472 = math.exp %471 : vector<16x128xf32>
    %cst_151 = arith.constant 1.000000e+00 : f32
    %473 = vector.broadcast %cst_151 : f32 to vector<16x128xf32>
    %474 = arith.addf %473, %472 : vector<16x128xf32>
    %475 = arith.divf %473, %474 : vector<16x128xf32>
    %476 = arith.mulf %467, %445 : vector<16x128xf32>
    %477 = arith.mulf %461, %469 : vector<16x128xf32>
    %478 = arith.addf %476, %477 : vector<16x128xf32>
    %479 = math.tanh %478 : vector<16x128xf32>
    %480 = arith.mulf %475, %479 : vector<16x128xf32>
    %481 = arith.truncf %480 : vector<16x128xf32> to vector<16x128xbf16>
    %c80_152 = arith.constant 80 : index
    %c0_153 = arith.constant 0 : index
    %482 = vector.load %arg11[%c80_152, %c0_153] : memref<128x128xbf16, #tpu.memory_space<vmem>>, vector<16x128xbf16>
    tpu.vector_store %arg11[%c80_152, %c0_153], %481 {strides = array<i32>} : memref<128x128xbf16, #tpu.memory_space<vmem>>, vector<16x128xbf16>,
    %c96_154 = arith.constant 96 : index
    %c0_155 = arith.constant 0 : index
    %483 = vector.load %arg12[%c96_154, %c0_155] : memref<128x512xbf16, #tpu.memory_space<vmem>>, vector<16x512xbf16>
    %484 = arith.extf %483 : vector<16x512xbf16> to vector<16x512xf32>
    %485 = arith.truncf %480 : vector<16x128xf32> to vector<16x128xbf16>
    %c0_156 = arith.constant 0 : index
    %c0_157 = arith.constant 0 : index
    %486 = vector.load %arg6[%c0_156, %c0_157] : memref<128x512xbf16, #tpu.memory_space<vmem>>, vector<128x512xbf16>
    %cst_158 = arith.constant dense<0.000000e+00> : vector<16x512xf32>
    %487 = tpu.matmul %485, %486, %cst_158 {dimension_numbers = #tpu.dot_dimension_numbers<[1], [0], [0], [1], [0, 0, 1, 1], [], []>} : vector<16x128xbf16>, vector<128x512xbf16>, vector<16x512xf32> -> vector<16x512xf32>
    %488 = arith.addf %484, %487 : vector<16x512xf32>
    %489 = vector.extract_strided_slice %488 {offsets = [0, 0], sizes = [16, 128], strides = [1, 1]} : vector<16x512xf32> to vector<16x128xf32>
    %490 = arith.negf %489 : vector<16x128xf32>
    %491 = math.exp %490 : vector<16x128xf32>
    %cst_159 = arith.constant 1.000000e+00 : f32
    %492 = vector.broadcast %cst_159 : f32 to vector<16x128xf32>
    %493 = arith.addf %492, %491 : vector<16x128xf32>
    %494 = arith.divf %492, %493 : vector<16x128xf32>
    %495 = vector.extract_strided_slice %488 {offsets = [0, 128], sizes = [16, 128], strides = [1, 1]} : vector<16x512xf32> to vector<16x128xf32>
    %496 = arith.negf %495 : vector<16x128xf32>
    %497 = math.exp %496 : vector<16x128xf32>
    %cst_160 = arith.constant 1.000000e+00 : f32
    %498 = vector.broadcast %cst_160 : f32 to vector<16x128xf32>
    %499 = arith.addf %498, %497 : vector<16x128xf32>
    %500 = arith.divf %498, %499 : vector<16x128xf32>
    %501 = vector.extract_strided_slice %488 {offsets = [0, 256], sizes = [16, 128], strides = [1, 1]} : vector<16x512xf32> to vector<16x128xf32>
    %502 = math.tanh %501 : vector<16x128xf32>
    %503 = vector.extract_strided_slice %488 {offsets = [0, 384], sizes = [16, 128], strides = [1, 1]} : vector<16x512xf32> to vector<16x128xf32>
    %504 = arith.negf %503 : vector<16x128xf32>
    %505 = math.exp %504 : vector<16x128xf32>
    %cst_161 = arith.constant 1.000000e+00 : f32
    %506 = vector.broadcast %cst_161 : f32 to vector<16x128xf32>
    %507 = arith.addf %506, %505 : vector<16x128xf32>
    %508 = arith.divf %506, %507 : vector<16x128xf32>
    %509 = arith.mulf %500, %478 : vector<16x128xf32>
    %510 = arith.mulf %494, %502 : vector<16x128xf32>
    %511 = arith.addf %509, %510 : vector<16x128xf32>
    %512 = math.tanh %511 : vector<16x128xf32>
    %513 = arith.mulf %508, %512 : vector<16x128xf32>
    %514 = arith.truncf %513 : vector<16x128xf32> to vector<16x128xbf16>
    %c96_162 = arith.constant 96 : index
    %c0_163 = arith.constant 0 : index
    %515 = vector.load %arg11[%c96_162, %c0_163] : memref<128x128xbf16, #tpu.memory_space<vmem>>, vector<16x128xbf16>
    tpu.vector_store %arg11[%c96_162, %c0_163], %514 {strides = array<i32>} : memref<128x128xbf16, #tpu.memory_space<vmem>>, vector<16x128xbf16>,
    %c112_164 = arith.constant 112 : index
    %c0_165 = arith.constant 0 : index
    %516 = vector.load %arg12[%c112_164, %c0_165] : memref<128x512xbf16, #tpu.memory_space<vmem>>, vector<16x512xbf16>
    %517 = arith.extf %516 : vector<16x512xbf16> to vector<16x512xf32>
    %518 = arith.truncf %513 : vector<16x128xf32> to vector<16x128xbf16>
    %c0_166 = arith.constant 0 : index
    %c0_167 = arith.constant 0 : index
    %519 = vector.load %arg6[%c0_166, %c0_167] : memref<128x512xbf16, #tpu.memory_space<vmem>>, vector<128x512xbf16>
    %cst_168 = arith.constant dense<0.000000e+00> : vector<16x512xf32>
    %520 = tpu.matmul %518, %519, %cst_168 {dimension_numbers = #tpu.dot_dimension_numbers<[1], [0], [0], [1], [0, 0, 1, 1], [], []>} : vector<16x128xbf16>, vector<128x512xbf16>, vector<16x512xf32> -> vector<16x512xf32>
    %521 = arith.addf %517, %520 : vector<16x512xf32>
    %522 = vector.extract_strided_slice %521 {offsets = [0, 0], sizes = [16, 128], strides = [1, 1]} : vector<16x512xf32> to vector<16x128xf32>
    %523 = arith.negf %522 : vector<16x128xf32>
    %524 = math.exp %523 : vector<16x128xf32>
    %cst_169 = arith.constant 1.000000e+00 : f32
    %525 = vector.broadcast %cst_169 : f32 to vector<16x128xf32>
    %526 = arith.addf %525, %524 : vector<16x128xf32>
    %527 = arith.divf %525, %526 : vector<16x128xf32>
    %528 = vector.extract_strided_slice %521 {offsets = [0, 128], sizes = [16, 128], strides = [1, 1]} : vector<16x512xf32> to vector<16x128xf32>
    %529 = arith.negf %528 : vector<16x128xf32>
    %530 = math.exp %529 : vector<16x128xf32>
    %cst_170 = arith.constant 1.000000e+00 : f32
    %531 = vector.broadcast %cst_170 : f32 to vector<16x128xf32>
    %532 = arith.addf %531, %530 : vector<16x128xf32>
    %533 = arith.divf %531, %532 : vector<16x128xf32>
    %534 = vector.extract_strided_slice %521 {offsets = [0, 256], sizes = [16, 128], strides = [1, 1]} : vector<16x512xf32> to vector<16x128xf32>
    %535 = math.tanh %534 : vector<16x128xf32>
    %536 = vector.extract_strided_slice %521 {offsets = [0, 384], sizes = [16, 128], strides = [1, 1]} : vector<16x512xf32> to vector<16x128xf32>
    %537 = arith.negf %536 : vector<16x128xf32>
    %538 = math.exp %537 : vector<16x128xf32>
    %cst_171 = arith.constant 1.000000e+00 : f32
    %539 = vector.broadcast %cst_171 : f32 to vector<16x128xf32>
    %540 = arith.addf %539, %538 : vector<16x128xf32>
    %541 = arith.divf %539, %540 : vector<16x128xf32>
    %542 = arith.mulf %533, %511 : vector<16x128xf32>
    %543 = arith.mulf %527, %535 : vector<16x128xf32>
    %544 = arith.addf %542, %543 : vector<16x128xf32>
    %545 = math.tanh %544 : vector<16x128xf32>
    %546 = arith.mulf %541, %545 : vector<16x128xf32>
    %547 = arith.truncf %546 : vector<16x128xf32> to vector<16x128xbf16>
    %c112_172 = arith.constant 112 : index
    %c0_173 = arith.constant 0 : index
    %548 = vector.load %arg11[%c112_172, %c0_173] : memref<128x128xbf16, #tpu.memory_space<vmem>>, vector<16x128xbf16>
    tpu.vector_store %arg11[%c112_172, %c0_173], %547 {strides = array<i32>} : memref<128x128xbf16, #tpu.memory_space<vmem>>, vector<16x128xbf16>,
    %c0_174 = arith.constant 0 : index
    %c0_175 = arith.constant 0 : index
    %549 = vector.load %arg11[%c0_174, %c0_175] : memref<128x128xbf16, #tpu.memory_space<vmem>>, vector<128x128xbf16>
    %c0_176 = arith.constant 0 : index
    %c0_177 = arith.constant 0 : index
    %550 = vector.load %arg8[%c0_176, %c0_177] : memref<128x128xbf16, #tpu.memory_space<vmem>>, vector<128x128xbf16>
    %cst_178 = arith.constant dense<0.000000e+00> : vector<128x128xf32>
    %551 = tpu.matmul %549, %550, %cst_178 {dimension_numbers = #tpu.dot_dimension_numbers<[1], [0], [0], [1], [0, 0, 1, 1], [], []>} : vector<128x128xbf16>, vector<128x128xbf16>, vector<128x128xf32> -> vector<128x128xf32>
    %c0_179 = arith.constant 0 : index
    %c0_180 = arith.constant 0 : index
    %552 = vector.load %arg9[%c0_179, %c0_180] : memref<1x128xf32, #tpu.memory_space<vmem>>, vector<1x128xf32>
    %553 = vector.broadcast %552 : vector<1x128xf32> to vector<128x128xf32>
    %554 = arith.addf %551, %553 : vector<128x128xf32>
    %cst_181 = arith.constant dense<0xFF800000> : vector<128xf32>
    %555 = vector.multi_reduction <maximumf>, %554, %cst_181 [1] : vector<128x128xf32> to vector<128xf32>
    %556 = vector.shape_cast %555 : vector<128xf32> to vector<128x1xf32>
    %557 = vector.broadcast %556 : vector<128x1xf32> to vector<128x128xf32>
    %558 = arith.subf %554, %557 : vector<128x128xf32>
    %559 = math.exp %558 : vector<128x128xf32>
    %cst_182 = arith.constant dense<0.000000e+00> : vector<128xf32>
    %560 = vector.multi_reduction <add>, %559, %cst_182 [1] : vector<128x128xf32> to vector<128xf32>
    %561 = vector.shape_cast %560 : vector<128xf32> to vector<128x1xf32>
    %562 = math.log %561 : vector<128x1xf32>
    %563 = vector.broadcast %562 : vector<128x1xf32> to vector<128x128xf32>
    %564 = arith.subf %558, %563 : vector<128x128xf32>
    %c0_183 = arith.constant 0 : index
    %c0_184 = arith.constant 0 : index
    %c0_185 = arith.constant 0 : index
    %565 = vector.load %arg10[%c0_183, %c0_184, %c0_185] : memref<1x128x128xf32, #tpu.memory_space<vmem>>, vector<1x128x128xf32>
    %566 = vector.shape_cast %565 : vector<1x128x128xf32> to vector<128x128xf32>
    %567 = vector.shape_cast %564 : vector<128x128xf32> to vector<1x128x128xf32>
    tpu.vector_store %arg10[%c0_183, %c0_184, %c0_185], %567 {strides = array<i32>} : memref<1x128x128xf32, #tpu.memory_space<vmem>>, vector<1x128x128xf32>,
    return
  }
  func.func @transform_0(%arg0: i32) -> (i32, i32, i32) {
    %c0_i32 = arith.constant 0 : i32
    %c0_i32_0 = arith.constant 0 : i32
    %c0_i32_1 = arith.constant 0 : i32
    return %arg0, %c0_i32, %c0_i32_0 : i32, i32, i32
  }
  func.func @transform_1(%arg0: i32) -> (i32, i32) {
    %c0_i32 = arith.constant 0 : i32
    %c0_i32_0 = arith.constant 0 : i32
    %c0_i32_1 = arith.constant 0 : i32
    return %c0_i32, %c0_i32_0 : i32, i32
  }
  func.func @transform_2(%arg0: i32) -> (i32, i32) {
    %c0_i32 = arith.constant 0 : i32
    %c0_i32_0 = arith.constant 0 : i32
    %c0_i32_1 = arith.constant 0 : i32
    return %c0_i32, %c0_i32_0 : i32, i32
  }
  func.func @transform_3(%arg0: i32) -> (i32, i32) {
    %c0_i32 = arith.constant 0 : i32
    %c0_i32_0 = arith.constant 0 : i32
    %c0_i32_1 = arith.constant 0 : i32
    return %c0_i32, %c0_i32_0 : i32, i32
  }
  func.func @transform_4(%arg0: i32) -> (i32, i32) {
    %c0_i32 = arith.constant 0 : i32
    %c0_i32_0 = arith.constant 0 : i32
    %c0_i32_1 = arith.constant 0 : i32
    return %c0_i32, %c0_i32_0 : i32, i32
  }
  func.func @transform_5(%arg0: i32) -> (i32, i32) {
    %c0_i32 = arith.constant 0 : i32
    %c0_i32_0 = arith.constant 0 : i32
    %c0_i32_1 = arith.constant 0 : i32
    return %c0_i32, %c0_i32_0 : i32, i32
  }
  func.func @transform_6(%arg0: i32) -> (i32, i32) {
    %c0_i32 = arith.constant 0 : i32
    %c0_i32_0 = arith.constant 0 : i32
    %c0_i32_1 = arith.constant 0 : i32
    return %c0_i32, %c0_i32_0 : i32, i32
  }
  func.func @transform_7(%arg0: i32) -> (i32, i32) {
    %c0_i32 = arith.constant 0 : i32
    %c0_i32_0 = arith.constant 0 : i32
    %c0_i32_1 = arith.constant 0 : i32
    return %c0_i32, %c0_i32_0 : i32, i32
  }
  func.func @transform_8(%arg0: i32) -> (i32, i32) {
    %c0_i32 = arith.constant 0 : i32
    %c0_i32_0 = arith.constant 0 : i32
    %c0_i32_1 = arith.constant 0 : i32
    return %c0_i32, %c0_i32_0 : i32, i32
  }
  func.func @transform_9(%arg0: i32) -> (i32, i32, i32) {
    %c0_i32 = arith.constant 0 : i32
    %c0_i32_0 = arith.constant 0 : i32
    %c0_i32_1 = arith.constant 0 : i32
    return %arg0, %c0_i32, %c0_i32_0 : i32, i32, i32
  }
}

</mosaic_0001>

<bundles_post_ra>
// kernel: medium_lstm_forward.1
= control target key start
LH: loop header
LB: loop body
LE: loop exit
PB: predicated region body
PF: predicated region fallthrough
CT: control target
= control target key end

     0   :  { %v10930_v1 = vmov 0   ;;  %vm135_vm0 = vcmask 130048   ;;  %v55_v45 = vlaneseq  ;;  %s10916_s1 = inlined_call_operand.vmem [shape: bf16[16,512], index: 1, kind: input, shape index: {}]   ;;  %s10917_s0 = inlined_call_operand.vmem [shape: bf16[1,128,16], index: 0, kind: input, shape index: {}]   ;;  %s10918_s2 = inlined_call_operand.vmem [shape: bf16[128,512], index: 2, kind: input, shape index: {}]   ;;  %s10919_s3 = inlined_call_operand.vmem [shape: f32[1,512], index: 3, kind: input, shape index: {}]   ;;  %s10920_s4 = inlined_call_operand.vmem [shape: bf16[128,512], index: 4, kind: input, shape index: {}]   ;;  %s10921_s5 = inlined_call_operand.vmem [shape: bf16[128,512], index: 5, kind: input, shape index: {}]   ;;  %s10922_s6 = inlined_call_operand.vmem [shape: f32[1,512], index: 6, kind: input, shape index: {}]   ;;  %s10923_s7 = inlined_call_operand.vmem [shape: bf16[128,128], index: 7, kind: input, shape index: {}]   ;;  %s10924_s8 = inlined_call_operand.vmem [shape: f32[1,128], index: 8, kind: input, shape index: {}]   ;;  %s10925_s9 = inlined_call_operand.vmem [shape: f32[1,128,128], index: 9, kind: output, shape index: {}]  }
   0x1   :  { %v7614_v0 = vld [vmem:[%s10916_s1 + $0x4] ss:$16 sps:$4 sm:$0xff]   ;;  %232 = vmatprep.mubr.bf16.mxu1 %v10930_v1  ;;  %192 = vmatprep.mubr.bf16.mxu0 %v10930_v1  ;;  %v7616_v2 = vld [vmem:[%s10916_s1] ss:$16 sps:$4 sm:$0xff]   ;;  %v7618_v4 = vld [vmem:[%s10916_s1 + $0x8] ss:$16 sps:$4 sm:$0xff]  }
   0x2   :  { %7611 = vmatprep.subr.bf16.mxu1 %v7614_v0  ;;  %v8610_v3 = vld [vmem:[%s10917_s0 + $0x20] sm:$0xff]   ;;  %160 = vmatprep.subr.bf16.mxu0 %v7614_v0  ;;  %v7620_v5 = vld [vmem:[%s10916_s1 + $0xc] ss:$16 sps:$4 sm:$0xff]   ;;  %v8682_v17 = vld [vmem:[%s10917_s0 + $0x30] sm:$0xff]   ;;  %v8878_v46 = vshrl.u32 %v55_v45, 7 }
   0x3   :  { %7612 = vmatpush1.bf16.msra.mxu1 %v7616_v2  ;;  %161 = vmatpush1.bf16.msra.mxu0 %v7616_v2  ;;  %v7623_v6 = vld [vmem:[%s10917_s0] sm:$0xff]   ;;  %v8635_v9 = vld [vmem:[%s10917_s0 + $0x28] sm:$0xff]   ;;  %v7641_v20 = vld [vmem:[%s10917_s0 + $0x10] sm:$0xff]  }
   0x4   :  { %273 = vmatprep.subr.bf16.mxu1 %v7620_v5  ;;  %v8627_v7 = vld [vmem:[%s10918_s2] ss:$16 sps:$4 sm:$0xff]   ;;  %v7626_v8 = vld [vmem:[%s10918_s2 + $0x4] ss:$16 sps:$4 sm:$0xff]   ;;  %v7631_v12 = vld [vmem:[%s10917_s0 + $0x8] sm:$0xff]   ;;  %10976 = vst [vmem:[#allocation4_spill] sm:$0xff] %v8878_v46 }
   0x5   :  { %654 = vmatprep.subr.bf16.mxu0 %v7626_v8  ;;  %v8641_v10 = vld [vmem:[%s10918_s2 + $0x20] ss:$16 sps:$4 sm:$0xff]   ;;  %v7630_v11 = vld [vmem:[%s10918_s2 + $0x24] ss:$16 sps:$4 sm:$0xff]   ;;  %v8659_v14 = vld [vmem:[%s10918_s2 + $0xc] ss:$16 sps:$4 sm:$0xff]  }
   0x6   :  { %6902 = vmatmul.mubr.msk.bf16.vlgmr.msra.gmra.mrb[0].mxu1 %vm135_vm0, %v8610_v3  ;;  %6898 = vmatmul.mubr.msk.bf16.vlgmr.msra.gmra.mrb[0].mxu0 %vm135_vm0, %v7623_v6  ;;  %v8654_v13 = vld [vmem:[%s10918_s2 + $0x44] ss:$16 sps:$4 sm:$0xff]   ;;  %v8667_v15 = vld [vmem:[%s10918_s2 + $0x40] ss:$16 sps:$4 sm:$0xff]   ;;  %v8712_v23 = vld [vmem:[%s10917_s0 + $0x38] sm:$0xff]   ;;  %v10929_v47 = vsub.s32 0, %v8878_v46 }
   0x7   :  { %274 = vmatpush1.bf16.msra.mxu1 %v7618_v4  ;;  %242 = vmatprep.mubr.bf16.mxu1 %v10930_v1  ;;  %v8674_v16 = vld [vmem:[%s10918_s2 + $0x64] ss:$16 sps:$4 sm:$0xff]   ;;  %v7638_v18 = vld [vmem:[%s10918_s2 + $0x60] ss:$16 sps:$4 sm:$0xff]   ;;  %v7651_v26 = vld [vmem:[%s10917_s0 + $0x18] sm:$0xff]   ;;  %v10927_v49 = vsub.s32 1, %v8878_v46 }
   0x8   :  { %202 = vmatprep.mubr.bf16.mxu0 %v10930_v1  ;;  %655 = vmatpush1.bf16.msra.mxu0 %v8627_v7  ;;  %v8692_v19 = vld [vmem:[%s10918_s2 + $0x84] ss:$16 sps:$4 sm:$0xff]   ;;  %v7642_v21 = vld [vmem:[%s10918_s2 + $0x80] ss:$16 sps:$4 sm:$0xff]   ;;  %v8742_v30 = vld [vmem:[%s10918_s2 + $0x8] ss:$16 sps:$4 sm:$0xff]  }
   0x9   :  { %656 = vmatprep.subr.bf16.mxu0 %v7630_v11  ;;  %697 = vmatprep.subr.bf16.mxu1 %v8659_v14  ;;  %v7650_v22 = vld [vmem:[%s10918_s2 + $0xa4] ss:$16 sps:$4 sm:$0xff]   ;;  %v7648_v24 = vld [vmem:[%s10918_s2 + $0xa0] ss:$16 sps:$4 sm:$0xff]   ;;  %v8748_v31 = vld [vmem:[%s10918_s2 + $0x2c] ss:$16 sps:$4 sm:$0xff]  }
   0xa   :  { %v8720_v25 = vld [vmem:[%s10918_s2 + $0xc4] ss:$16 sps:$4 sm:$0xff]   ;;  %v7652_v27 = vld [vmem:[%s10918_s2 + $0xc0] ss:$16 sps:$4 sm:$0xff]   ;;  %v8753_v32 = vld [vmem:[%s10918_s2 + $0x28] ss:$16 sps:$4 sm:$0xff]  }
   0xb   :  { %v7660_v28 = vld [vmem:[%s10918_s2 + $0xe4] ss:$16 sps:$4 sm:$0xff]   ;;  %v7658_v29 = vld [vmem:[%s10918_s2 + $0xe0] ss:$16 sps:$4 sm:$0xff]   ;;  %v8759_v33 = vld [vmem:[%s10918_s2 + $0x4c] ss:$16 sps:$4 sm:$0xff]  }
   0xc   :  { %657 = vmatpush1.bf16.msra.mxu0 %v8641_v10  ;;  %v8767_v34 = vld [vmem:[%s10918_s2 + $0x48] ss:$16 sps:$4 sm:$0xff]   ;;  %v8773_v35 = vld [vmem:[%s10918_s2 + $0x6c] ss:$16 sps:$4 sm:$0xff]   ;;  %v8884_v48 = vld [vmem:[%s10919_s3] sm:$0xf] }
   0xd   :  { %658 = vmatprep.subr.bf16.mxu0 %v8654_v13  ;;  %v8782_v36 = vld [vmem:[%s10918_s2 + $0x68] ss:$16 sps:$4 sm:$0xff]   ;;  %v8788_v37 = vld [vmem:[%s10918_s2 + $0x8c] ss:$16 sps:$4 sm:$0xff]   ;;  %v8890_v50 = vrot.slane %v8884_v48, %v10929_v47  ;;  %v8895_v51 = vrot.slane %v8884_v48, %v10927_v49 }
   0xe   :  { %6903 = vmatmul.mubr.msk.bf16.gmra.mrb[4].mxu1 %vm135_vm0, %v8635_v9  ;;  %6899 = vmatmul.mubr.msk.bf16.gmra.mrb[4].mxu0 %vm135_vm0, %v7631_v12  ;;  %v8798_v38 = vld [vmem:[%s10918_s2 + $0x88] ss:$16 sps:$4 sm:$0xff]   ;;  %v8803_v39 = vld [vmem:[%s10918_s2 + $0xac] ss:$16 sps:$4 sm:$0xff]  }
   0xf   :  { %252 = vmatprep.mubr.bf16.mxu1 %v10930_v1  ;;  %212 = vmatprep.mubr.bf16.mxu0 %v10930_v1  ;;  %v8815_v40 = vld [vmem:[%s10918_s2 + $0xa8] ss:$16 sps:$4 sm:$0xff]   ;;  %v8821_v41 = vld [vmem:[%s10918_s2 + $0xcc] ss:$16 sps:$4 sm:$0xff]  }
  0x10   :  { %659 = vmatpush1.bf16.msra.mxu0 %v8667_v15  ;;  %v8828_v42 = vld [vmem:[%s10918_s2 + $0xc8] ss:$16 sps:$4 sm:$0xff]   ;;  %v8834_v43 = vld [vmem:[%s10918_s2 + $0xec] ss:$16 sps:$4 sm:$0xff]  }
  0x11   :  { %660 = vmatprep.subr.bf16.mxu0 %v8674_v16  ;;  %v8842_v44 = vld [vmem:[%s10918_s2 + $0xe8] ss:$16 sps:$4 sm:$0xff]  }
  0x14   :  { %661 = vmatpush1.bf16.msra.mxu0 %v7638_v18 }
  0x15   :  { %662 = vmatprep.subr.bf16.mxu0 %v8692_v19 }
  0x16   :  { %6904 = vmatmul.mubr.msk.bf16.gmra.mrb[8].mxu1 %vm135_vm0, %v8682_v17  ;;  %6900 = vmatmul.mubr.msk.bf16.gmra.mrb[8].mxu0 %vm135_vm0, %v7641_v20 }
  0x17   :  { %262 = vmatprep.mubr.bf16.mxu1 %v10930_v1  ;;  %222 = vmatprep.mubr.bf16.mxu0 %v10930_v1 }
  0x18   :  { %663 = vmatpush1.bf16.msra.mxu0 %v7642_v21 }
  0x19   :  { %664 = vmatprep.subr.bf16.mxu0 %v7650_v22 }
  0x1c   :  { %665 = vmatpush1.bf16.msra.mxu0 %v7648_v24 }
  0x1d   :  { %666 = vmatprep.subr.bf16.mxu0 %v8720_v25 }
  0x1e   :  { %6905 = vmatmul.mubr.msk.bf16.gmra.mrb[12].mxu1 %vm135_vm0, %v8712_v23  ;;  %6901 = vmatmul.mubr.msk.bf16.gmra.mrb[12].mxu0 %vm135_vm0, %v7651_v26 }
  0x1f   :  { %305 = vmatprep.mubr.bf16.mxu1 %v10930_v1  ;;  %686 = vmatprep.mubr.bf16.mxu0 %v10930_v1 }
  0x20   :  { %667 = vmatpush1.bf16.msra.mxu0 %v7652_v27 }
  0x21   :  { %668 = vmatprep.subr.bf16.mxu0 %v7660_v28 }
  0x24   :  { %669 = vmatpush1.bf16.msra.mxu0 %v7658_v29 }
  0x25   :  { %1002 = vmatprep.subr.bf16.mxu0 %v7626_v8 }
  0x26   :  { %6906 = vmatmul.mubr.msk.bf16.vlgmr.msra.gmra.mrb[16].mxu1 %vm135_vm0, %v7623_v6 }
  0x27   :  { %698 = vmatpush1.bf16.msra.mxu1 %v8742_v30  ;;  %315 = vmatprep.mubr.bf16.mxu1 %v10930_v1 }
  0x28   :  { %699 = vmatprep.subr.bf16.mxu1 %v8748_v31  ;;  %687 = vmatmul.mubr.bf16.vlgmr.msra.gmra.mrb[16].mxu0 %v10930_v1 }
  0x29   :  { %1003 = vmatpush1.bf16.msra.mxu0 %v8627_v7  ;;  %1034 = vmatprep.mubr.bf16.mxu0 %v10930_v1 }
  0x2a   :  { %1004 = vmatprep.subr.bf16.mxu0 %v7630_v11 }
  0x2b   :  { %700 = vmatpush1.bf16.msra.mxu1 %v8753_v32 }
  0x2c   :  { %701 = vmatprep.subr.bf16.mxu1 %v8759_v33 }
  0x2d   :  { %1005 = vmatpush1.bf16.msra.mxu0 %v8641_v10 }
  0x2e   :  { %6907 = vmatmul.mubr.msk.bf16.gmra.mrb[20].mxu1 %vm135_vm0, %v7631_v12  ;;  %1006 = vmatprep.subr.bf16.mxu0 %v8654_v13 }
  0x2f   :  { %325 = vmatprep.mubr.bf16.mxu1 %v10930_v1  ;;  %702 = vmatpush1.bf16.msra.mxu1 %v8767_v34 }
  0x30   :  { %703 = vmatprep.subr.bf16.mxu1 %v8773_v35 }
  0x31   :  { %1007 = vmatpush1.bf16.msra.mxu0 %v8667_v15 }
  0x32   :  { %1008 = vmatprep.subr.bf16.mxu0 %v8674_v16 }
  0x33   :  { %704 = vmatpush1.bf16.msra.mxu1 %v8782_v36 }
  0x34   :  { %705 = vmatprep.subr.bf16.mxu1 %v8788_v37 }
  0x35   :  { %1009 = vmatpush1.bf16.msra.mxu0 %v7638_v18 }
  0x36   :  { %6908 = vmatmul.mubr.msk.bf16.gmra.mrb[24].mxu1 %vm135_vm0, %v7641_v20  ;;  %1010 = vmatprep.subr.bf16.mxu0 %v8692_v19 }
  0x37   :  { %335 = vmatprep.mubr.bf16.mxu1 %v10930_v1  ;;  %706 = vmatpush1.bf16.msra.mxu1 %v8798_v38 }
  0x38   :  { %707 = vmatprep.subr.bf16.mxu1 %v8803_v39 }
  0x39   :  { %1011 = vmatpush1.bf16.msra.mxu0 %v7642_v21 }
  0x3a   :  { %1012 = vmatprep.subr.bf16.mxu0 %v7650_v22 }
  0x3b   :  { %708 = vmatpush1.bf16.msra.mxu1 %v8815_v40 }
  0x3c   :  { %709 = vmatprep.subr.bf16.mxu1 %v8821_v41 }
  0x3d   :  { %1013 = vmatpush1.bf16.msra.mxu0 %v7648_v24 }
  0x3e   :  { %6909 = vmatmul.mubr.msk.bf16.gmra.mrb[28].mxu1 %vm135_vm0, %v7651_v26  ;;  %1014 = vmatprep.subr.bf16.mxu0 %v8720_v25 }
  0x3f   :  { %345 = vmatprep.mubr.bf16.mxu1 %v10930_v1  ;;  %710 = vmatpush1.bf16.msra.mxu1 %v8828_v42 }
  0x40   :  { %711 = vmatprep.subr.bf16.mxu1 %v8834_v43 }
  0x41   :  { %1015 = vmatpush1.bf16.msra.mxu0 %v7652_v27 }
  0x42   :  { %1016 = vmatprep.subr.bf16.mxu0 %v7660_v28 }
  0x43   :  { %712 = vmatpush1.bf16.msra.mxu1 %v8842_v44 }
  0x44   :  { %1045 = vmatprep.subr.bf16.mxu1 %v8659_v14 }
  0x45   :  { %1017 = vmatpush1.bf16.msra.mxu0 %v7658_v29 }
  0x46   :  { %6910 = vmatmul.mubr.msk.bf16.gmra.mrb[32].mxu1 %vm135_vm0, %v8610_v3 }
  0x47   :  { %355 = vmatprep.mubr.bf16.mxu1 %v10930_v1 }
  0x4e   :  { %6911 = vmatmul.mubr.msk.bf16.gmra.mrb[36].mxu1 %vm135_vm0, %v8635_v9 }
  0x4f   :  { %365 = vmatprep.mubr.bf16.mxu1 %v10930_v1 }
  0x56   :  { %6912 = vmatmul.mubr.msk.bf16.gmra.mrb[40].mxu1 %vm135_vm0, %v8682_v17 }
  0x57   :  { %375 = vmatprep.mubr.bf16.mxu1 %v10930_v1 }
  0x5e   :  { %6913 = vmatmul.mubr.msk.bf16.gmra.mrb[44].mxu1 %vm135_vm0, %v8712_v23 }
  0x5f   :  { %729 = vmatprep.mubr.bf16.mxu1 %v10930_v1 }
  0x66   :  { %730 = vmatmul.mubr.bf16.vlgmr.msra.gmra.mrb[48].mxu1 %v10930_v1 }
  0x67   :  { %1046 = vmatpush1.bf16.msra.mxu1 %v8742_v30  ;;  %1077 = vmatprep.mubr.bf16.mxu1 %v10930_v1 }
  0x68   :  { %1047 = vmatprep.subr.bf16.mxu1 %v8748_v31 }
  0x6b   :  { %1048 = vmatpush1.bf16.msra.mxu1 %v8753_v32 }
  0x6c   :  { %1049 = vmatprep.subr.bf16.mxu1 %v8759_v33 }
  0x6f   :  { %1050 = vmatpush1.bf16.msra.mxu1 %v8767_v34 }
  0x70   :  { %1051 = vmatprep.subr.bf16.mxu1 %v8773_v35 }
  0x73   :  { %1052 = vmatpush1.bf16.msra.mxu1 %v8782_v36 }
  0x74   :  { %1053 = vmatprep.subr.bf16.mxu1 %v8788_v37 }
  0x77   :  { %1054 = vmatpush1.bf16.msra.mxu1 %v8798_v38 }
  0x78   :  { %1055 = vmatprep.subr.bf16.mxu1 %v8803_v39 }
  0x7b   :  { %1056 = vmatpush1.bf16.msra.mxu1 %v8815_v40 }
  0x7c   :  { %1057 = vmatprep.subr.bf16.mxu1 %v8821_v41 }
  0x7f   :  { %1058 = vmatpush1.bf16.msra.mxu1 %v8828_v42 }
  0x80   :  { %1059 = vmatprep.subr.bf16.mxu1 %v8834_v43 }
  0x83   :  { %1060 = vmatpush1.bf16.msra.mxu1 %v8842_v44 }
  0x84   :  { %1393 = vmatprep.subr.bf16.mxu1 %v8659_v14 }
  0xd9   :  { %v234_v52 = vpop.f32.mrb[0].mxu1  ;;  %v194_v57 = vpop.f32.mrb[0].mxu0 }
  0xda   :  { %v235_v53 = vadd.f32 %v234_v52, %v8890_v50  ;;  %v236_v54 = vpop.f32.mrb[1].mxu1  ;;  %v195_v60 = vadd.f32 %v194_v57, %v8890_v50  ;;  %v196_v61 = vpop.f32.mrb[1].mxu0 }
  0xdb   :  { %v237_v55 = vadd.f32 %v236_v54, %v8895_v51  ;;  %v238_v56 = vpop.f32.mrb[2].mxu1  ;;  %v197_v63 = vadd.f32 %v196_v61, %v8895_v51  ;;  %v198_v0 = vpop.f32.mrb[2].mxu0 }
  0xdc   :  { %v239_v58 = vadd.f32 %v238_v56, %v8890_v50  ;;  %v240_v59 = vpop.f32.mrb[3].mxu1  ;;  %v199_v3 = vadd.f32 %v198_v0, %v8890_v50  ;;  %v200_v4 = vpop.f32.mrb[3].mxu0 }
  0xdd   :  { %v241_v62 = vadd.f32 %v240_v59, %v8895_v51  ;;  %v201_v6 = vadd.f32 %v200_v4, %v8895_v51 }
  0xde   :  { %v8903_v2 = vpack.c.bf16 %v239_v58, %v235_v53  ;;  %v8909_v7 = vpack.c.bf16 %v199_v3, %v195_v60 }
  0xdf   :  { %v8906_v5 = vpack.c.bf16 %v241_v62, %v237_v55  ;;  %v8911_v9 = vpack.c.bf16 %v201_v6, %v197_v63 }
  0xe0   :  { %10977 = vst [vmem:[#allocation5_spill] sm:$0xff] %v8903_v2 }
  0xe1   :  { %10978 = vst [vmem:[#allocation6_spill] sm:$0xff] %v8906_v5  ;;  %v244_v8 = vpop.f32.mrb[4].mxu1  ;;  %v204_v14 = vpop.f32.mrb[4].mxu0 }
  0xe2   :  { %v245_v10 = vadd.f32 %v244_v8, %v8890_v50  ;;  %v246_v11 = vpop.f32.mrb[5].mxu1  ;;  %v205_v17 = vadd.f32 %v204_v14, %v8890_v50  ;;  %v206_v18 = vpop.f32.mrb[5].mxu0 }
  0xe3   :  { %v247_v12 = vadd.f32 %v246_v11, %v8895_v51  ;;  %v248_v13 = vpop.f32.mrb[6].mxu1  ;;  %v207_v20 = vadd.f32 %v206_v18, %v8895_v51  ;;  %v208_v21 = vpop.f32.mrb[6].mxu0 }
  0xe4   :  { %v249_v15 = vadd.f32 %v248_v13, %v8890_v50  ;;  %v250_v16 = vpop.f32.mrb[7].mxu1  ;;  %v209_v23 = vadd.f32 %v208_v21, %v8890_v50  ;;  %v210_v24 = vpop.f32.mrb[7].mxu0 }
  0xe5   :  { %v251_v19 = vadd.f32 %v250_v16, %v8895_v51  ;;  %v211_v26 = vadd.f32 %v210_v24, %v8895_v51  ;;  %v10926_v24 = vsub.s32 3, %v8878_v46 }
  0xe6   :  { %v8919_v22 = vpack.c.bf16 %v249_v15, %v245_v10  ;;  %v8925_v27 = vpack.c.bf16 %v209_v23, %v205_v17 }
  0xe7   :  { %v8922_v25 = vpack.c.bf16 %v251_v19, %v247_v12  ;;  %v8927_v29 = vpack.c.bf16 %v211_v26, %v207_v20  ;;  %v10928_v19 = vsub.s32 2, %v8878_v46 }
  0xe8   :  { %10979 = vst [vmem:[#allocation7_spill] sm:$0xff] %v8919_v22 }
  0xe9   :  { %10980 = vst [vmem:[#allocation8_spill] sm:$0xff] %v8922_v25  ;;  %v254_v28 = vpop.f32.mrb[8].mxu1  ;;  %v214_v55 = vpop.f32.mrb[8].mxu0 }
  0xea   :  { %v255_v45 = vadd.f32 %v254_v28, %v8890_v50  ;;  %v256_v52 = vpop.f32.mrb[9].mxu1  ;;  %v215_v58 = vadd.f32 %v214_v55, %v8890_v50  ;;  %v216_v59 = vpop.f32.mrb[9].mxu0 }
  0xeb   :  { %v257_v53 = vadd.f32 %v256_v52, %v8895_v51  ;;  %v258_v54 = vpop.f32.mrb[10].mxu1  ;;  %v217_v61 = vadd.f32 %v216_v59, %v8895_v51  ;;  %v218_v62 = vpop.f32.mrb[10].mxu0  ;;  %v8969_v59 = vrot.slane %v8884_v48, %v10926_v24 }
  0xec   :  { %v259_v56 = vadd.f32 %v258_v54, %v8890_v50  ;;  %v260_v57 = vpop.f32.mrb[11].mxu1  ;;  %v219_v0 = vadd.f32 %v218_v62, %v8890_v50  ;;  %v220_v3 = vpop.f32.mrb[11].mxu0 }
  0xed   :  { %v261_v60 = vadd.f32 %v260_v57, %v8895_v51  ;;  %v221_v6 = vadd.f32 %v220_v3, %v8895_v51 }
  0xee   :  { %v8935_v63 = vpack.c.bf16 %v259_v56, %v255_v45  ;;  %v8941_v8 = vpack.c.bf16 %v219_v0, %v215_v58  ;;  %v8962_v56 = vrot.slane %v8884_v48, %v10928_v19  ;;  %v458_v0 = vunpack.c.h.bf16 %v8909_v7 }
  0xef   :  { %v8938_v4 = vpack.c.bf16 %v261_v60, %v257_v53  ;;  %v8943_v11 = vpack.c.bf16 %v221_v6, %v217_v61 }
  0xf0   :  { %10981 = vst [vmem:[#allocation9_spill] sm:$0xff] %v8935_v63 }
  0xf1   :  { %10982 = vst [vmem:[#allocation10_spill] sm:$0xff] %v8938_v4  ;;  %v264_v10 = vpop.f32.mrb[12].mxu1  ;;  %v224_v16 = vpop.f32.mrb[12].mxu0  ;;  %v1154_v4 = vunpack.c.h.bf16 %v8941_v8  ;;  %v1155_v22 = vunpack.c.h.bf16 %v8943_v11 }
  0xf2   :  { %v265_v12 = vadd.f32 %v264_v10, %v8890_v50  ;;  %v266_v13 = vpop.f32.mrb[13].mxu1  ;;  %v225_v20 = vadd.f32 %v224_v16, %v8890_v50  ;;  %v226_v21 = vpop.f32.mrb[13].mxu0 }
  0xf3   :  { %v267_v14 = vadd.f32 %v266_v13, %v8895_v51  ;;  %v268_v15 = vpop.f32.mrb[14].mxu1  ;;  %v227_v26 = vadd.f32 %v226_v21, %v8895_v51  ;;  %v228_v28 = vpop.f32.mrb[14].mxu0  ;;  %v459_v13 = vunpack.c.h.bf16 %v8911_v9 }
  0xf4   :  { %v269_v17 = vadd.f32 %v268_v15, %v8890_v50  ;;  %v270_v18 = vpop.f32.mrb[15].mxu1  ;;  %v229_v52 = vadd.f32 %v228_v28, %v8890_v50  ;;  %v230_v53 = vpop.f32.mrb[15].mxu0  ;;  %v454_v50 = vunpack.c.l.bf16 %v8909_v7 }
  0xf5   :  { %v271_v23 = vadd.f32 %v270_v18, %v8895_v51  ;;  %v231_v55 = vadd.f32 %v230_v53, %v8895_v51  ;;  %v455_v51 = vunpack.c.l.bf16 %v8911_v9 }
  0xf6   :  { %v8953_v45 = vpack.c.bf16 %v269_v17, %v265_v12  ;;  %v8964_v57 = vpack.c.bf16 %v229_v52, %v225_v20 }
  0xf7   :  { %v8956_v54 = vpack.c.bf16 %v271_v23, %v267_v14  ;;  %v8971_v60 = vpack.c.bf16 %v231_v55, %v227_v26 }
  0xf8   :  { %10983 = vst [vmem:[#allocation11_spill] sm:$0xff] %v8953_v45 }
  0xf9   :  { %10984 = vst [vmem:[#allocation12_spill] sm:$0xff] %v8956_v54  ;;  %v307_v58 = vpop.f32.mrb[16].mxu1 }
  0xfa   :  { %v309_v61 = vpop.f32.mrb[17].mxu1  ;;  %v308_v3 = vadd.f32 %v307_v58, %v8962_v56 }
  0xfb   :  { %v311_v62 = vpop.f32.mrb[18].mxu1  ;;  %v688_v12 = vpop.f32.mrb[16].mxu0  ;;  %v310_v48 = vadd.f32 %v309_v61, %v8969_v59 }
  0xfc   :  { %v312_v6 = vadd.f32 %v311_v62, %v8962_v56  ;;  %v313_v10 = vpop.f32.mrb[19].mxu1  ;;  %v740_v15 = vadd.f32 %v688_v12, %v454_v50  ;;  %v690_v16 = vpop.f32.mrb[17].mxu0 }
  0xfd   :  { %v314_v14 = vadd.f32 %v313_v10, %v8969_v59  ;;  %v741_v18 = vadd.f32 %v690_v16, %v455_v51  ;;  %v692_v20 = vpop.f32.mrb[18].mxu0 }
  0xfe   :  { %v8981_v17 = vpack.c.bf16 %v312_v6, %v308_v3  ;;  %v744_v7 = vadd.f32 %v692_v20, %v458_v0  ;;  %v694_v23 = vpop.f32.mrb[19].mxu0 }
  0xff   :  { %v8983_v21 = vpack.c.bf16 %v314_v14, %v310_v48  ;;  %v745_v26 = vadd.f32 %v694_v23, %v459_v13  ;;  %v6948_v49 = vmul.f32 -1.442695, %v741_v18 }
 0x101   :  { %v317_v28 = vpop.f32.mrb[20].mxu1  ;;  %v6949_v19 = vmul.f32 -1.442695, %v745_v26  ;;  %v457_v46 = vunpack.c.l.bf16 %v8983_v21 }
 0x102   :  { %v318_v52 = vadd.f32 %v317_v28, %v8962_v56  ;;  %v319_v53 = vpop.f32.mrb[21].mxu1 }
 0x103   :  { %v320_v9 = vadd.f32 %v319_v53, %v8969_v59  ;;  %v321_v55 = vpop.f32.mrb[22].mxu1 }
 0x104   :  { %v322_v58 = vadd.f32 %v321_v55, %v8962_v56  ;;  %v323_v50 = vpop.f32.mrb[23].mxu1 }
 0x105   :  { %v324_v61 = vadd.f32 %v323_v50, %v8969_v59 }
 0x106   :  { %v8989_v62 = vpack.c.bf16 %v322_v58, %v318_v52 }
 0x107   :  { %v8991_v51 = vpack.c.bf16 %v324_v61, %v320_v9 }
 0x109   :  { %v327_v3 = vpop.f32.mrb[24].mxu1  ;;  %v809_v54 = vunpack.c.h.bf16 %v8991_v51 }
 0x10a   :  { %v328_v0 = vadd.f32 %v327_v3, %v8962_v56  ;;  %v329_v6 = vpop.f32.mrb[25].mxu1 }
 0x10b   :  { %v330_v10 = vadd.f32 %v329_v6, %v8969_v59  ;;  %v331_v12 = vpop.f32.mrb[26].mxu1 }
 0x10c   :  { %v332_v13 = vadd.f32 %v331_v12, %v8962_v56  ;;  %v333_v48 = vpop.f32.mrb[27].mxu1 }
 0x10d   :  { %v334_v14 = vadd.f32 %v333_v48, %v8969_v59 }
 0x10e   :  { %v8997_v16 = vpack.c.bf16 %v332_v13, %v328_v0 }
 0x10f   :  { %v8999_v20 = vpack.c.bf16 %v334_v14, %v330_v10 }
 0x111   :  { %v337_v23 = vpop.f32.mrb[28].mxu1 }
 0x112   :  { %v338_v28 = vadd.f32 %v337_v23, %v8962_v56  ;;  %v339_v52 = vpop.f32.mrb[29].mxu1 }
 0x113   :  { %v340_v53 = vadd.f32 %v339_v52, %v8969_v59  ;;  %v341_v9 = vpop.f32.mrb[30].mxu1 }
 0x114   :  { %v342_v55 = vadd.f32 %v341_v9, %v8962_v56  ;;  %v343_v58 = vpop.f32.mrb[31].mxu1 }
 0x115   :  { %v344_v50 = vadd.f32 %v343_v58, %v8969_v59 }
 0x116   :  { %v9005_v61 = vpack.c.bf16 %v342_v55, %v338_v28 }
 0x117   :  { %v9007_v3 = vpack.c.bf16 %v344_v50, %v340_v53 }
 0x119   :  { %10985 = vst [vmem:[#allocation13_spill] sm:$0xff] %v9007_v3  ;;  %v347_v0 = vpop.f32.mrb[32].mxu1 }
 0x11a   :  { %v348_v6 = vadd.f32 %v347_v0, %v8962_v56  ;;  %v349_v10 = vpop.f32.mrb[33].mxu1  ;;  %v6946_v0 = vmul.f32 -1.442695, %v740_v15 }
 0x11b   :  { %v350_v12 = vadd.f32 %v349_v10, %v8969_v59  ;;  %v351_v13 = vpop.f32.mrb[34].mxu1 }
 0x11c   :  { %v352_v48 = vadd.f32 %v351_v13, %v8962_v56  ;;  %v353_v14 = vpop.f32.mrb[35].mxu1  ;;  %7972 = vpow2.f32 %v6946_v0 }
 0x11d   :  { %v354_v23 = vadd.f32 %v353_v14, %v8969_v59  ;;  %7974 = vpow2.f32 %v6948_v49 }
 0x11e   :  { %v9013_v52 = vpack.c.bf16 %v352_v48, %v348_v6  ;;  %7976 = vpow2.f32 %v6949_v19 }
 0x11f   :  { %v9015_v9 = vpack.c.bf16 %v354_v23, %v350_v12  ;;  %v6947_v12 = vmul.f32 -1.442695, %v744_v7 }
 0x120   :  { %10986 = vst [vmem:[#allocation14_spill] sm:$0xff] %v9013_v52 }
 0x121   :  { %10987 = vst [vmem:[#allocation15_spill] sm:$0xff] %v9015_v9  ;;  %v357_v28 = vpop.f32.mrb[36].mxu1  ;;  %7978 = vpow2.f32 %v6947_v12  ;;  %v1157_v9 = vunpack.c.h.bf16 %v8999_v20 }
 0x122   :  { %v358_v53 = vadd.f32 %v357_v28, %v8962_v56  ;;  %v359_v55 = vpop.f32.mrb[37].mxu1 }
 0x123   :  { %v360_v58 = vadd.f32 %v359_v55, %v8969_v59  ;;  %v361_v50 = vpop.f32.mrb[38].mxu1 }
 0x124   :  { %v362_v10 = vadd.f32 %v361_v50, %v8962_v56  ;;  %v363_v24 = vpop.f32.mrb[39].mxu1 }
 0x125   :  { %v364_v13 = vadd.f32 %v363_v24, %v8969_v59 }
 0x126   :  { %v9021_v14 = vpack.c.bf16 %v362_v10, %v358_v53  ;;  %v7973_v49 = vpop.eup %7972 }
 0x127   :  { %v9023_v6 = vpack.c.bf16 %v364_v13, %v360_v58  ;;  %v7975_v0 = vpop.eup %7974 }
 0x128   :  { %10988 = vst [vmem:[#allocation16_spill] sm:$0xff] %v9021_v14 }
 0x129   :  { %10989 = vst [vmem:[#allocation17_spill] sm:$0xff] %v9023_v6  ;;  %v367_v48 = vpop.f32.mrb[40].mxu1 }
 0x12a   :  { %v368_v23 = vadd.f32 %v367_v48, %v8962_v56  ;;  %v369_v28 = vpop.f32.mrb[41].mxu1  ;;  %v7977_v48 = vpop.eup %7976 }
 0x12b   :  { %v370_v15 = vadd.f32 %v369_v28, %v8969_v59  ;;  %v371_v55 = vpop.f32.mrb[42].mxu1 }
 0x12c   :  { %v372_v18 = vadd.f32 %v371_v55, %v8962_v56  ;;  %v373_v24 = vpop.f32.mrb[43].mxu1  ;;  %v754_v55 = vadd.f32 1.0, %v7973_v49  ;;  %v460_v49 = vunpack.c.h.bf16 %v8981_v17 }
 0x12d   :  { %v374_v26 = vadd.f32 %v373_v24, %v8969_v59 }
 0x12e   :  { %v9029_v53 = vpack.c.bf16 %v372_v18, %v368_v23  ;;  %v7979_v23 = vpop.eup %7978  ;;  %v766_v18 = vadd.f32 1.0, %v7975_v0  ;;  %7980 = vrcp.f32 %v754_v55 }
 0x12f   :  { %v9031_v58 = vpack.c.bf16 %v374_v26, %v370_v15  ;;  %v767_v26 = vadd.f32 1.0, %v7977_v48  ;;  %v755_v1 = vadd.f32 1.0, %v7979_v23 }
 0x130   :  { %10990 = vst [vmem:[#allocation18_spill] sm:$0xff] %v9029_v53  ;;  %7982 = vrcp.f32 %v766_v18  ;;  %v1156_v53 = vunpack.c.h.bf16 %v8997_v16 }
 0x131   :  { %10991 = vst [vmem:[#allocation19_spill] sm:$0xff] %v9031_v58  ;;  %v377_v7 = vpop.f32.mrb[44].mxu1  ;;  %7984 = vrcp.f32 %v767_v26 }
 0x132   :  { %v378_v19 = vadd.f32 %v377_v7, %v8962_v56  ;;  %v379_v50 = vpop.f32.mrb[45].mxu1  ;;  %v456_v7 = vunpack.c.l.bf16 %v8981_v17 }
 0x133   :  { %v380_v10 = vadd.f32 %v379_v50, %v8969_v59  ;;  %v381_v13 = vpop.f32.mrb[46].mxu1 }
 0x134   :  { %v382_v12 = vadd.f32 %v381_v13, %v8962_v56  ;;  %v383_v28 = vpop.f32.mrb[47].mxu1 }
 0x135   :  { %v384_v24 = vadd.f32 %v383_v28, %v8969_v59 }
 0x136   :  { %v9037_v15 = vpack.c.bf16 %v382_v12, %v378_v19  ;;  %v461_v19 = vunpack.c.h.bf16 %v8983_v21 }
 0x137   :  { %v9039_v47 = vpack.c.bf16 %v384_v24, %v380_v10 }
 0x138   :  { %10992 = vst [vmem:[#allocation20_spill] sm:$0xff] %v9037_v15  ;;  %v7981_v24 = vpop.eup %7980 }
 0x139   :  { %10993 = vst [vmem:[#allocation21_spill] sm:$0xff] %v9039_v47  ;;  %v731_v50 = vpop.f32.mrb[48].mxu1  ;;  %v807_v47 = vunpack.c.h.bf16 %v8927_v29 }
 0x13a   :  { %v742_v56 = vadd.f32 %v731_v50, %v456_v7  ;;  %v733_v13 = vpop.f32.mrb[49].mxu1  ;;  %v7983_v23 = vpop.eup %7982 }
 0x13b   :  { %v743_v59 = vadd.f32 %v733_v13, %v457_v46  ;;  %v735_v0 = vpop.f32.mrb[50].mxu1  ;;  %v7985_v18 = vpop.eup %7984  ;;  %v786_v26 = vmul.f32 0.0, %v7983_v23 }
 0x13c   :  { %7986 = vtanh.f32 %v742_v56  ;;  %v746_v10 = vadd.f32 %v735_v0, %v460_v49  ;;  %v737_v48 = vpop.f32.mrb[51].mxu1  ;;  %v787_v21 = vmul.f32 0.0, %v7985_v18  ;;  %v10995_v18 = vmov 0  }
 0x13d   :  { %7988 = vrcp.f32 %v755_v1  ;;  %v6950_v12 = vmul.f32 -1.442695, %v743_v59  ;;  %v747_v28 = vadd.f32 %v737_v48, %v461_v19 }
 0x13e   :  { %7990 = vtanh.f32 %v746_v10 }
 0x13f   :  { %7992 = vpow2.f32 %v6950_v12  ;;  %v6951_v55 = vmul.f32 -1.442695, %v747_v28 }
 0x141   :  { %7994 = vpow2.f32 %v6951_v55 }
 0x146   :  { %v7987_v7 = vpop.eup %7986 }
 0x147   :  { %v7989_v17 = vpop.eup %7988  ;;  %v788_v46 = vmul.f32 %v7987_v7, %v7981_v24  ;;  %v9164_v7 = vld [vmem:[%s10918_s2 + $0xe0] ss:$16 sps:$4 sm:$0xff]  }
 0x148   :  { %v7991_v50 = vpop.eup %7990 }
 0x149   :  { %v7993_v13 = vpop.eup %7992  ;;  %v9045_v56 = vadd.f32 %v788_v46, %v786_v26  ;;  %v789_v49 = vmul.f32 %v7991_v50, %v7989_v17  ;;  %v802_v17 = vunpack.c.l.bf16 %v8925_v27  ;;  %v804_v26 = vunpack.c.l.bf16 %v8989_v62 }
 0x14a   :  { %v780_v1 = vadd.f32 1.0, %v7993_v13  ;;  %v803_v13 = vunpack.c.l.bf16 %v8927_v29 }
 0x14b   :  { %v7995_v59 = vpop.eup %7994  ;;  %7996 = vtanh.f32 %v9045_v56  ;;  %v9048_v0 = vadd.f32 %v789_v49, %v787_v21  ;;  %v805_v21 = vunpack.c.l.bf16 %v8991_v51 }
 0x14c   :  { %7998 = vrcp.f32 %v780_v1  ;;  %v781_v19 = vadd.f32 1.0, %v7995_v59 }
 0x14d   :  { %8000 = vtanh.f32 %v9048_v0 }
 0x14e   :  { %8002 = vrcp.f32 %v781_v19 }
 0x155   :  { %v7997_v10 = vpop.eup %7996 }
 0x156   :  { %v7999_v48 = vpop.eup %7998 }
 0x157   :  { %v8001_v12 = vpop.eup %8000  ;;  %v794_v55 = vmul.f32 %v7999_v48, %v7997_v10  ;;  %v806_v10 = vunpack.c.h.bf16 %v8925_v27  ;;  %v808_v48 = vunpack.c.h.bf16 %v8989_v62 }
 0x158   :  { %v8003_v28 = vpop.eup %8002 }
 0x159   :  { %v795_v24 = vmul.f32 %v8003_v28, %v8001_v12 }
 0x15b   :  { %v9051_v23 = vpack.c.bf16 %v795_v24, %v794_v55 }
 0x15d   :  { %10994 = vst [vmem:[#allocation22_spill] sm:$0xff] %v9051_v23  ;;  %1035 = vmatmul.mubr.bf16.vlgmr.msra.gmra.mrb[20].mxu0 %v9051_v23  ;;  %1078 = vmatmul.mubr.bf16.vlgmr.msra.gmra.mrb[52].mxu1 %v9051_v23 }
 0x15e   :  { %1394 = vmatpush1.bf16.msra.mxu1 %v8742_v30  ;;  %1382 = vmatprep.mubr.bf16.mxu0 %v10995_v18  ;;  %v9075_v30 = vld [vmem:[%s10918_s2 + $0x4] ss:$16 sps:$4 sm:$0xff]  }
 0x15f   :  { %1395 = vmatprep.subr.bf16.mxu1 %v8748_v31  ;;  %1425 = vmatprep.mubr.bf16.mxu1 %v10995_v18  ;;  %v9080_v31 = vld [vmem:[%s10918_s2] ss:$16 sps:$4 sm:$0xff]  }
 0x160   :  { %1350 = vmatprep.subr.bf16.mxu0 %v9075_v30 }
 0x161   :  { %1351 = vmatpush1.bf16.msra.mxu0 %v9080_v31 }
 0x162   :  { %1396 = vmatpush1.bf16.msra.mxu1 %v8753_v32  ;;  %v9087_v32 = vld [vmem:[%s10918_s2 + $0x24] ss:$16 sps:$4 sm:$0xff]  }
 0x163   :  { %1397 = vmatprep.subr.bf16.mxu1 %v8759_v33  ;;  %v9092_v33 = vld [vmem:[%s10918_s2 + $0x20] ss:$16 sps:$4 sm:$0xff]   ;;  %1352 = vmatprep.subr.bf16.mxu0 %v9087_v32 }
 0x165   :  { %1353 = vmatpush1.bf16.msra.mxu0 %v9092_v33 }
 0x166   :  { %1398 = vmatpush1.bf16.msra.mxu1 %v8767_v34  ;;  %v9099_v34 = vld [vmem:[%s10918_s2 + $0x44] ss:$16 sps:$4 sm:$0xff]  }
 0x167   :  { %1399 = vmatprep.subr.bf16.mxu1 %v8773_v35  ;;  %v9104_v35 = vld [vmem:[%s10918_s2 + $0x40] ss:$16 sps:$4 sm:$0xff]   ;;  %1354 = vmatprep.subr.bf16.mxu0 %v9099_v34 }
 0x169   :  { %1355 = vmatpush1.bf16.msra.mxu0 %v9104_v35 }
 0x16a   :  { %1400 = vmatpush1.bf16.msra.mxu1 %v8782_v36  ;;  %v9111_v36 = vld [vmem:[%s10918_s2 + $0x64] ss:$16 sps:$4 sm:$0xff]  }
 0x16b   :  { %1401 = vmatprep.subr.bf16.mxu1 %v8788_v37  ;;  %v9116_v37 = vld [vmem:[%s10918_s2 + $0x60] ss:$16 sps:$4 sm:$0xff]   ;;  %1356 = vmatprep.subr.bf16.mxu0 %v9111_v36 }
 0x16d   :  { %1357 = vmatpush1.bf16.msra.mxu0 %v9116_v37 }
 0x16e   :  { %1402 = vmatpush1.bf16.msra.mxu1 %v8798_v38  ;;  %v9123_v38 = vld [vmem:[%s10918_s2 + $0x84] ss:$16 sps:$4 sm:$0xff]  }
 0x16f   :  { %1403 = vmatprep.subr.bf16.mxu1 %v8803_v39  ;;  %v9128_v39 = vld [vmem:[%s10918_s2 + $0x80] ss:$16 sps:$4 sm:$0xff]   ;;  %1358 = vmatprep.subr.bf16.mxu0 %v9123_v38 }
 0x171   :  { %1359 = vmatpush1.bf16.msra.mxu0 %v9128_v39 }
 0x172   :  { %1404 = vmatpush1.bf16.msra.mxu1 %v8815_v40  ;;  %v9133_v40 = vld [vmem:[%s10918_s2 + $0xa4] ss:$16 sps:$4 sm:$0xff]  }
 0x173   :  { %1405 = vmatprep.subr.bf16.mxu1 %v8821_v41  ;;  %v9140_v41 = vld [vmem:[%s10918_s2 + $0xa0] ss:$16 sps:$4 sm:$0xff]   ;;  %1360 = vmatprep.subr.bf16.mxu0 %v9133_v40 }
 0x175   :  { %1361 = vmatpush1.bf16.msra.mxu0 %v9140_v41 }
 0x176   :  { %1406 = vmatpush1.bf16.msra.mxu1 %v8828_v42  ;;  %v9146_v42 = vld [vmem:[%s10918_s2 + $0xc4] ss:$16 sps:$4 sm:$0xff]  }
 0x177   :  { %1407 = vmatprep.subr.bf16.mxu1 %v8834_v43  ;;  %v9152_v43 = vld [vmem:[%s10918_s2 + $0xc0] ss:$16 sps:$4 sm:$0xff]   ;;  %1362 = vmatprep.subr.bf16.mxu0 %v9146_v42 }
 0x179   :  { %1363 = vmatpush1.bf16.msra.mxu0 %v9152_v43 }
 0x17a   :  { %1408 = vmatpush1.bf16.msra.mxu1 %v8842_v44  ;;  %v9158_v44 = vld [vmem:[%s10918_s2 + $0xe4] ss:$16 sps:$4 sm:$0xff]  }
 0x17b   :  { %1364 = vmatprep.subr.bf16.mxu0 %v9158_v44 }
 0x17d   :  { %1365 = vmatpush1.bf16.msra.mxu0 %v9164_v7 }
 0x17e   :  { %1698 = vmatprep.subr.bf16.mxu0 %v9075_v30 }
 0x230   :  { %v1036_v46 = vpop.f32.mrb[20].mxu0  ;;  %v1079_v50 = vpop.f32.mrb[52].mxu1 }
 0x231   :  { %v1088_v49 = vadd.f32 %v1036_v46, %v802_v17  ;;  %v1090_v1 = vadd.f32 %v1079_v50, %v804_v26  ;;  %v1038_v59 = vpop.f32.mrb[21].mxu0  ;;  %v1081_v19 = vpop.f32.mrb[53].mxu1 }
 0x232   :  { %v1089_v12 = vadd.f32 %v1038_v59, %v803_v13  ;;  %v1091_v28 = vadd.f32 %v1081_v19, %v805_v21  ;;  %v1040_v55 = vpop.f32.mrb[22].mxu0  ;;  %v1083_v24 = vpop.f32.mrb[54].mxu1 }
 0x233   :  { %v6984_v15 = vmul.f32 -1.442695, %v1088_v49  ;;  %v1092_v45 = vadd.f32 %v1040_v55, %v806_v10  ;;  %v1094_v23 = vadd.f32 %v1083_v24, %v808_v48  ;;  %v1042_v58 = vpop.f32.mrb[23].mxu0  ;;  %v1085_v17 = vpop.f32.mrb[55].mxu1 }
 0x234   :  { %v6986_v26 = vmul.f32 -1.442695, %v1089_v12  ;;  %v1093_v46 = vadd.f32 %v1042_v58, %v807_v47  ;;  %v1095_v50 = vadd.f32 %v1085_v17, %v809_v54  ;;  %v6988_v13 = vmul.f32 -1.442695, %v1091_v28 }
 0x235   :  { %8004 = vpow2.f32 %v6984_v15  ;;  %v6985_v27 = vmul.f32 -1.442695, %v1092_v45 }
 0x236   :  { %8006 = vpow2.f32 %v6986_v26  ;;  %v6987_v62 = vmul.f32 -1.442695, %v1093_v46  ;;  %v6989_v51 = vmul.f32 -1.442695, %v1095_v50 }
 0x237   :  { %8008 = vpow2.f32 %v6985_v27 }
 0x238   :  { %8010 = vpow2.f32 %v6987_v62 }
 0x239   :  { %8012 = vtanh.f32 %v1090_v1 }
 0x23a   :  { %8014 = vpow2.f32 %v6988_v13 }
 0x23b   :  { %8016 = vtanh.f32 %v1094_v23 }
 0x23f   :  { %v8005_v21 = vpop.eup %8004 }
 0x240   :  { %v8007_v29 = vpop.eup %8006  ;;  %v1102_v59 = vadd.f32 1.0, %v8005_v21 }
 0x241   :  { %v1114_v49 = vadd.f32 1.0, %v8007_v29  ;;  %v8009_v19 = vpop.eup %8008 }
 0x242   :  { %8018 = vrcp.f32 %v1102_v59  ;;  %v1103_v47 = vadd.f32 1.0, %v8009_v19  ;;  %v8011_v54 = vpop.eup %8010  ;;  %v9215_v19 = vld [vmem:[%s10918_s2 + $0x8] ss:$16 sps:$4 sm:$0xff]  }
 0x243   :  { %8020 = vrcp.f32 %v1114_v49  ;;  %v1115_v45 = vadd.f32 1.0, %v8011_v54  ;;  %v8013_v58 = vpop.eup %8012  ;;  %v9227_v54 = vld [vmem:[%s10918_s2 + $0x28] ss:$16 sps:$4 sm:$0xff]  }
 0x244   :  { %8022 = vpow2.f32 %v6989_v51  ;;  %v8015_v15 = vpop.eup %8014 }
 0x245   :  { %8024 = vrcp.f32 %v1103_v47  ;;  %v8017_v10 = vpop.eup %8016  ;;  %v1128_v23 = vadd.f32 1.0, %v8015_v15  ;;  %v9222_v47 = vld [vmem:[%s10918_s2 + $0x2c] ss:$16 sps:$4 sm:$0xff]  }
 0x246   :  { %8026 = vrcp.f32 %v1115_v45  ;;  %v9234_v45 = vld [vmem:[%s10918_s2 + $0x4c] ss:$16 sps:$4 sm:$0xff]  }
 0x247   :  { %8028 = vrcp.f32 %v1128_v23  ;;  %v9246_v15 = vld [vmem:[%s10918_s2 + $0x6c] ss:$16 sps:$4 sm:$0xff]  }
 0x248   :  { %v9293_v23 = vld [vmem:[%s10918_s2 + $0xec] ss:$16 sps:$4 sm:$0xff]  }
 0x24c   :  { %v8019_v48 = vpop.eup %8018 }
 0x24d   :  { %v8021_v1 = vpop.eup %8020  ;;  %v1136_v12 = vmul.f32 %v8019_v48, %v8013_v58  ;;  %v9239_v58 = vld [vmem:[%s10918_s2 + $0x48] ss:$16 sps:$4 sm:$0xff]   ;;  %v9258_v48 = vld [vmem:[%s10918_s2 + $0x8c] ss:$16 sps:$4 sm:$0xff]  }
 0x24e   :  { %v8023_v28 = vpop.eup %8022  ;;  %v1134_v55 = vmul.f32 %v8021_v1, %v9045_v56  ;;  %v9263_v1 = vld [vmem:[%s10918_s2 + $0x88] ss:$16 sps:$4 sm:$0xff]  }
 0x24f   :  { %v8025_v24 = vpop.eup %8024  ;;  %v1129_v50 = vadd.f32 1.0, %v8023_v28  ;;  %v9275_v28 = vld [vmem:[%s10918_s2 + $0xa8] ss:$16 sps:$4 sm:$0xff]  }
 0x250   :  { %v9178_v17 = vadd.f32 %v1136_v12, %v1134_v55  ;;  %v1137_v26 = vmul.f32 %v8025_v24, %v8017_v10  ;;  %v8027_v46 = vpop.eup %8026  ;;  %v9251_v10 = vld [vmem:[%s10918_s2 + $0x68] ss:$16 sps:$4 sm:$0xff]   ;;  %v9268_v12 = vld [vmem:[%s10918_s2 + $0xac] ss:$16 sps:$4 sm:$0xff]  }
 0x251   :  { %v1135_v27 = vmul.f32 %v8027_v46, %v9048_v0  ;;  %v8029_v13 = vpop.eup %8028  ;;  %v9210_v0 = vld [vmem:[%s10918_s2 + $0xc] ss:$16 sps:$4 sm:$0xff]   ;;  %v9287_v24 = vld [vmem:[%s10918_s2 + $0xc8] ss:$16 sps:$4 sm:$0xff]   ;;  %v1150_v46 = vunpack.c.l.bf16 %v8941_v8 }
 0x252   :  { %8030 = vtanh.f32 %v9178_v17  ;;  %1741 = vmatprep.subr.bf16.mxu1 %v9210_v0  ;;  %v9281_v55 = vld [vmem:[%s10918_s2 + $0xcc] ss:$16 sps:$4 sm:$0xff]  }
 0x253   :  { %v9182_v62 = vadd.f32 %v1137_v26, %v1135_v27  ;;  %8032 = vrcp.f32 %v1129_v50  ;;  %v9299_v26 = vld [vmem:[%s10918_s2 + $0xe8] ss:$16 sps:$4 sm:$0xff]   ;;  %v1152_v50 = vunpack.c.l.bf16 %v8997_v16 }
 0x255   :  { %8034 = vtanh.f32 %v9182_v62 }
 0x25c   :  { %v8031_v21 = vpop.eup %8030 }
 0x25d   :  { %v8033_v56 = vpop.eup %8032  ;;  %v1142_v59 = vmul.f32 %v8031_v21, %v8029_v13  ;;  %v1151_v21 = vunpack.c.l.bf16 %v8943_v11 }
 0x25f   :  { %v8035_v29 = vpop.eup %8034 }
 0x260   :  { %v1143_v51 = vmul.f32 %v8035_v29, %v8033_v56  ;;  %v1153_v56 = vunpack.c.l.bf16 %v8999_v20 }
 0x262   :  { %v9185_v49 = vpack.c.bf16 %v1143_v51, %v1142_v59 }
 0x264   :  { %10996 = vst [vmem:[#allocation23_spill] sm:$0xff] %v9185_v49  ;;  %1383 = vmatmul.mubr.bf16.vlgmr.msra.gmra.mrb[24].mxu0 %v9185_v49  ;;  %1426 = vmatmul.mubr.bf16.vlgmr.msra.gmra.mrb[56].mxu1 %v9185_v49 }
 0x265   :  { %1699 = vmatpush1.bf16.msra.mxu0 %v9080_v31  ;;  %1730 = vmatprep.mubr.bf16.mxu0 %v10995_v18 }
 0x266   :  { %1700 = vmatprep.subr.bf16.mxu0 %v9087_v32  ;;  %1773 = vmatprep.mubr.bf16.mxu1 %v10995_v18 }
 0x267   :  { %1742 = vmatpush1.bf16.msra.mxu1 %v9215_v19 }
 0x268   :  { %1743 = vmatprep.subr.bf16.mxu1 %v9222_v47 }
 0x269   :  { %1701 = vmatpush1.bf16.msra.mxu0 %v9092_v33 }
 0x26a   :  { %1702 = vmatprep.subr.bf16.mxu0 %v9099_v34 }
 0x26b   :  { %1744 = vmatpush1.bf16.msra.mxu1 %v9227_v54 }
 0x26c   :  { %1745 = vmatprep.subr.bf16.mxu1 %v9234_v45 }
 0x26d   :  { %1703 = vmatpush1.bf16.msra.mxu0 %v9104_v35 }
 0x26e   :  { %1704 = vmatprep.subr.bf16.mxu0 %v9111_v36 }
 0x26f   :  { %1746 = vmatpush1.bf16.msra.mxu1 %v9239_v58 }
 0x270   :  { %1747 = vmatprep.subr.bf16.mxu1 %v9246_v15 }
 0x271   :  { %1705 = vmatpush1.bf16.msra.mxu0 %v9116_v37 }
 0x272   :  { %1706 = vmatprep.subr.bf16.mxu0 %v9123_v38 }
 0x273   :  { %1748 = vmatpush1.bf16.msra.mxu1 %v9251_v10 }
 0x274   :  { %1749 = vmatprep.subr.bf16.mxu1 %v9258_v48 }
 0x275   :  { %1707 = vmatpush1.bf16.msra.mxu0 %v9128_v39 }
 0x276   :  { %1708 = vmatprep.subr.bf16.mxu0 %v9133_v40 }
 0x277   :  { %1750 = vmatpush1.bf16.msra.mxu1 %v9263_v1 }
 0x278   :  { %1751 = vmatprep.subr.bf16.mxu1 %v9268_v12 }
 0x279   :  { %1709 = vmatpush1.bf16.msra.mxu0 %v9140_v41 }
 0x27a   :  { %1710 = vmatprep.subr.bf16.mxu0 %v9146_v42 }
 0x27b   :  { %1752 = vmatpush1.bf16.msra.mxu1 %v9275_v28 }
 0x27c   :  { %1753 = vmatprep.subr.bf16.mxu1 %v9281_v55 }
 0x27d   :  { %1711 = vmatpush1.bf16.msra.mxu0 %v9152_v43 }
 0x27e   :  { %1712 = vmatprep.subr.bf16.mxu0 %v9158_v44 }
 0x27f   :  { %1754 = vmatpush1.bf16.msra.mxu1 %v9287_v24 }
 0x280   :  { %1755 = vmatprep.subr.bf16.mxu1 %v9293_v23 }
 0x281   :  { %1713 = vmatpush1.bf16.msra.mxu0 %v9164_v7 }
 0x282   :  { %2046 = vmatprep.subr.bf16.mxu0 %v9075_v30 }
 0x283   :  { %1756 = vmatpush1.bf16.msra.mxu1 %v9299_v26 }
 0x284   :  { %2089 = vmatprep.subr.bf16.mxu1 %v9210_v0 }
 0x337   :  { %v1384_v27 = vpop.f32.mrb[24].mxu0  ;;  %v1427_v13 = vpop.f32.mrb[56].mxu1 }
 0x338   :  { %v1436_v29 = vadd.f32 %v1384_v27, %v1150_v46  ;;  %v1438_v59 = vadd.f32 %v1427_v13, %v1152_v50  ;;  %v1386_v51 = vpop.f32.mrb[25].mxu0  ;;  %v1429_v49 = vpop.f32.mrb[57].mxu1 }
 0x339   :  { %v1437_v63 = vadd.f32 %v1386_v51, %v1151_v21  ;;  %v1439_v6 = vadd.f32 %v1429_v49, %v1153_v56  ;;  %v1388_v25 = vpop.f32.mrb[26].mxu0  ;;  %v1431_v14 = vpop.f32.mrb[58].mxu1 }
 0x33a   :  { %v7022_v5 = vmul.f32 -1.442695, %v1436_v29  ;;  %v1440_v52 = vadd.f32 %v1388_v25, %v1154_v4  ;;  %v1442_v2 = vadd.f32 %v1431_v14, %v1156_v53  ;;  %v1390_v3 = vpop.f32.mrb[27].mxu0  ;;  %v1433_v46 = vpop.f32.mrb[59].mxu1 }
 0x33b   :  { %v7024_v50 = vmul.f32 -1.442695, %v1437_v63  ;;  %v1441_v27 = vadd.f32 %v1390_v3, %v1155_v22  ;;  %v1443_v13 = vadd.f32 %v1433_v46, %v1157_v9  ;;  %v7026_v49 = vmul.f32 -1.442695, %v1439_v6 }
 0x33c   :  { %8036 = vpow2.f32 %v7022_v5  ;;  %v7023_v8 = vmul.f32 -1.442695, %v1440_v52 }
 0x33d   :  { %8038 = vpow2.f32 %v7024_v50  ;;  %v7025_v16 = vmul.f32 -1.442695, %v1441_v27  ;;  %v7027_v20 = vmul.f32 -1.442695, %v1443_v13 }
 0x33e   :  { %8040 = vpow2.f32 %v7023_v8 }
 0x33f   :  { %8042 = vpow2.f32 %v7025_v16 }
 0x340   :  { %8044 = vtanh.f32 %v1438_v59 }
 0x341   :  { %8046 = vpow2.f32 %v7026_v49 }
 0x342   :  { %8048 = vtanh.f32 %v1442_v2 }
 0x346   :  { %v8037_v21 = vpop.eup %8036 }
 0x347   :  { %v8039_v11 = vpop.eup %8038  ;;  %v1450_v56 = vadd.f32 1.0, %v8037_v21 }
 0x348   :  { %v1462_v25 = vadd.f32 1.0, %v8039_v11  ;;  %v8041_v4 = vpop.eup %8040 }
 0x349   :  { %8050 = vrcp.f32 %v1450_v56  ;;  %v1451_v22 = vadd.f32 1.0, %v8041_v4  ;;  %v8043_v63 = vpop.eup %8042  ;;  %v1500_v4 = vunpack.c.l.bf16 %v9005_v61 }
 0x34a   :  { %8052 = vrcp.f32 %v1462_v25  ;;  %v1463_v5 = vadd.f32 1.0, %v8043_v63  ;;  %v8045_v3 = vpop.eup %8044 }
 0x34b   :  { %8054 = vpow2.f32 %v7027_v20  ;;  %v8047_v52 = vpop.eup %8046 }
 0x34c   :  { %8056 = vrcp.f32 %v1451_v22  ;;  %v8049_v9 = vpop.eup %8048  ;;  %v1476_v2 = vadd.f32 1.0, %v8047_v52 }
 0x34d   :  { %8058 = vrcp.f32 %v1463_v5  ;;  %v1499_v5 = vunpack.c.l.bf16 %v8971_v60 }
 0x34e   :  { %8060 = vrcp.f32 %v1476_v2 }
 0x353   :  { %v8051_v14 = vpop.eup %8050 }
 0x354   :  { %v8053_v6 = vpop.eup %8052  ;;  %v1484_v53 = vmul.f32 %v8051_v14, %v8045_v3  ;;  %v10997_v3 = vld [vmem:[#allocation13_spill] sm:$0xff] }
 0x355   :  { %v8055_v29 = vpop.eup %8054  ;;  %v1482_v59 = vmul.f32 %v8053_v6, %v9178_v17  ;;  %v1501_v52 = vunpack.c.l.bf16 %v10997_v3 }
 0x356   :  { %v8057_v51 = vpop.eup %8056  ;;  %v1477_v13 = vadd.f32 1.0, %v8055_v29  ;;  %v1502_v29 = vunpack.c.h.bf16 %v8964_v57 }
 0x357   :  { %v9313_v46 = vadd.f32 %v1484_v53, %v1482_v59  ;;  %v1485_v50 = vmul.f32 %v8057_v51, %v8049_v9  ;;  %v8059_v27 = vpop.eup %8058 }
 0x358   :  { %v1483_v8 = vmul.f32 %v8059_v27, %v9182_v62  ;;  %v8061_v49 = vpop.eup %8060  ;;  %v1498_v62 = vunpack.c.l.bf16 %v8964_v57  ;;  %v1503_v27 = vunpack.c.h.bf16 %v8971_v60 }
 0x359   :  { %8062 = vtanh.f32 %v9313_v46 }
 0x35a   :  { %v9317_v16 = vadd.f32 %v1485_v50, %v1483_v8  ;;  %8064 = vrcp.f32 %v1477_v13  ;;  %v1505_v13 = vunpack.c.h.bf16 %v10997_v3 }
 0x35c   :  { %8066 = vtanh.f32 %v9317_v16 }
 0x363   :  { %v8063_v21 = vpop.eup %8062 }
 0x364   :  { %v8065_v17 = vpop.eup %8064  ;;  %v1490_v56 = vmul.f32 %v8063_v21, %v8061_v49 }
 0x366   :  { %v8067_v11 = vpop.eup %8066 }
 0x367   :  { %v1491_v20 = vmul.f32 %v8067_v11, %v8065_v17 }
 0x369   :  { %v9320_v25 = vpack.c.bf16 %v1491_v20, %v1490_v56 }
 0x36b   :  { %1731 = vmatmul.mubr.bf16.vlgmr.msra.gmra.mrb[28].mxu0 %v9320_v25  ;;  %1774 = vmatmul.mubr.bf16.vlgmr.msra.gmra.mrb[60].mxu1 %v9320_v25 }
 0x36c   :  { %2047 = vmatpush1.bf16.msra.mxu0 %v9080_v31  ;;  %2090 = vmatpush1.bf16.msra.mxu1 %v9215_v19 }
 0x36d   :  { %2048 = vmatprep.subr.bf16.mxu0 %v9087_v32  ;;  %2091 = vmatprep.subr.bf16.mxu1 %v9222_v47 }
 0x36e   :  { %2078 = vmatprep.mubr.bf16.mxu0 %v10995_v18  ;;  %2121 = vmatprep.mubr.bf16.mxu1 %v10995_v18 }
 0x370   :  { %2049 = vmatpush1.bf16.msra.mxu0 %v9092_v33  ;;  %2092 = vmatpush1.bf16.msra.mxu1 %v9227_v54 }
 0x371   :  { %2050 = vmatprep.subr.bf16.mxu0 %v9099_v34  ;;  %2093 = vmatprep.subr.bf16.mxu1 %v9234_v45 }
 0x374   :  { %2051 = vmatpush1.bf16.msra.mxu0 %v9104_v35  ;;  %2094 = vmatpush1.bf16.msra.mxu1 %v9239_v58 }
 0x375   :  { %2052 = vmatprep.subr.bf16.mxu0 %v9111_v36  ;;  %2095 = vmatprep.subr.bf16.mxu1 %v9246_v15 }
 0x378   :  { %2053 = vmatpush1.bf16.msra.mxu0 %v9116_v37  ;;  %2096 = vmatpush1.bf16.msra.mxu1 %v9251_v10 }
 0x379   :  { %2054 = vmatprep.subr.bf16.mxu0 %v9123_v38  ;;  %2097 = vmatprep.subr.bf16.mxu1 %v9258_v48 }
 0x37c   :  { %2055 = vmatpush1.bf16.msra.mxu0 %v9128_v39  ;;  %2098 = vmatpush1.bf16.msra.mxu1 %v9263_v1 }
 0x37d   :  { %2056 = vmatprep.subr.bf16.mxu0 %v9133_v40  ;;  %2099 = vmatprep.subr.bf16.mxu1 %v9268_v12 }
 0x380   :  { %2057 = vmatpush1.bf16.msra.mxu0 %v9140_v41  ;;  %2100 = vmatpush1.bf16.msra.mxu1 %v9275_v28 }
 0x381   :  { %2058 = vmatprep.subr.bf16.mxu0 %v9146_v42  ;;  %2101 = vmatprep.subr.bf16.mxu1 %v9281_v55 }
 0x384   :  { %2059 = vmatpush1.bf16.msra.mxu0 %v9152_v43  ;;  %2102 = vmatpush1.bf16.msra.mxu1 %v9287_v24 }
 0x385   :  { %2060 = vmatprep.subr.bf16.mxu0 %v9158_v44  ;;  %2103 = vmatprep.subr.bf16.mxu1 %v9293_v23 }
 0x388   :  { %2061 = vmatpush1.bf16.msra.mxu0 %v9164_v7  ;;  %2104 = vmatpush1.bf16.msra.mxu1 %v9299_v26 }
 0x389   :  { %2394 = vmatprep.subr.bf16.mxu0 %v9075_v30  ;;  %2437 = vmatprep.subr.bf16.mxu1 %v9210_v0  ;;  %v1504_v30 = vunpack.c.h.bf16 %v9005_v61 }
 0x43e   :  { %v1732_v22 = vpop.f32.mrb[28].mxu0  ;;  %v1775_v63 = vpop.f32.mrb[60].mxu1 }
 0x43f   :  { %v1784_v9 = vadd.f32 %v1732_v22, %v1498_v62  ;;  %v1786_v14 = vadd.f32 %v1775_v63, %v1500_v4  ;;  %v1734_v6 = vpop.f32.mrb[29].mxu0  ;;  %v1777_v53 = vpop.f32.mrb[61].mxu1 }
 0x440   :  { %v1785_v59 = vadd.f32 %v1734_v6, %v1499_v5  ;;  %v1787_v51 = vadd.f32 %v1777_v53, %v1501_v52  ;;  %v1736_v2 = vpop.f32.mrb[30].mxu0  ;;  %v1779_v50 = vpop.f32.mrb[62].mxu1 }
 0x441   :  { %v7060_v8 = vmul.f32 -1.442695, %v1784_v9  ;;  %v1788_v49 = vadd.f32 %v1736_v2, %v1502_v29  ;;  %v1790_v21 = vadd.f32 %v1779_v50, %v1504_v30  ;;  %v1738_v17 = vpop.f32.mrb[31].mxu0  ;;  %v1781_v11 = vpop.f32.mrb[63].mxu1 }
 0x442   :  { %v7062_v56 = vmul.f32 -1.442695, %v1785_v59  ;;  %v1789_v20 = vadd.f32 %v1738_v17, %v1503_v27  ;;  %v1791_v62 = vadd.f32 %v1781_v11, %v1505_v13  ;;  %v7064_v4 = vmul.f32 -1.442695, %v1787_v51 }
 0x443   :  { %8068 = vpow2.f32 %v7060_v8  ;;  %v7061_v57 = vmul.f32 -1.442695, %v1788_v49 }
 0x444   :  { %8070 = vpow2.f32 %v7062_v56  ;;  %v7063_v61 = vmul.f32 -1.442695, %v1789_v20  ;;  %v7065_v5 = vmul.f32 -1.442695, %v1791_v62 }
 0x445   :  { %8072 = vpow2.f32 %v7061_v57 }
 0x446   :  { %8074 = vpow2.f32 %v7063_v61 }
 0x447   :  { %8076 = vtanh.f32 %v1786_v14 }
 0x448   :  { %8078 = vpow2.f32 %v7064_v4 }
 0x449   :  { %8080 = vtanh.f32 %v1790_v21 }
 0x44d   :  { %v8069_v22 = vpop.eup %8068 }
 0x44e   :  { %v8071_v60 = vpop.eup %8070  ;;  %v1798_v63 = vadd.f32 1.0, %v8069_v22 }
 0x44f   :  { %v1810_v3 = vadd.f32 1.0, %v8071_v60  ;;  %v8073_v52 = vpop.eup %8072 }
 0x450   :  { %8082 = vrcp.f32 %v1798_v63  ;;  %v1799_v9 = vadd.f32 1.0, %v8073_v52  ;;  %v8075_v6 = vpop.eup %8074 }
 0x451   :  { %8084 = vrcp.f32 %v1810_v3  ;;  %v1811_v53 = vadd.f32 1.0, %v8075_v6  ;;  %v8077_v29 = vpop.eup %8076 }
 0x452   :  { %8086 = vpow2.f32 %v7065_v5  ;;  %v8079_v30 = vpop.eup %8078 }
 0x453   :  { %8088 = vrcp.f32 %v1799_v9  ;;  %v8081_v59 = vpop.eup %8080  ;;  %v1824_v8 = vadd.f32 1.0, %v8079_v30 }
 0x454   :  { %8090 = vrcp.f32 %v1811_v53 }
 0x455   :  { %8092 = vrcp.f32 %v1824_v8 }
 0x45a   :  { %v8083_v51 = vpop.eup %8082 }
 0x45b   :  { %v8085_v14 = vpop.eup %8084  ;;  %v1832_v2 = vmul.f32 %v8083_v51, %v8077_v29 }
 0x45c   :  { %v8087_v50 = vpop.eup %8086  ;;  %v1830_v27 = vmul.f32 %v8085_v14, %v9313_v46 }
 0x45d   :  { %v8089_v13 = vpop.eup %8088  ;;  %v1825_v11 = vadd.f32 1.0, %v8087_v50 }
 0x45e   :  { %v9367_v49 = vadd.f32 %v1832_v2, %v1830_v27  ;;  %v1833_v21 = vmul.f32 %v8089_v13, %v8081_v59  ;;  %v8091_v17 = vpop.eup %8090 }
 0x45f   :  { %v1831_v56 = vmul.f32 %v8091_v17, %v9317_v16  ;;  %v8093_v62 = vpop.eup %8092 }
 0x460   :  { %8094 = vtanh.f32 %v9367_v49 }
 0x461   :  { %v9371_v20 = vadd.f32 %v1833_v21, %v1831_v56  ;;  %8096 = vrcp.f32 %v1825_v11 }
 0x463   :  { %8098 = vtanh.f32 %v9371_v20 }
 0x46a   :  { %v8095_v57 = vpop.eup %8094 }
 0x46b   :  { %v8097_v46 = vpop.eup %8096  ;;  %v1838_v4 = vmul.f32 %v8095_v57, %v8093_v62 }
 0x46d   :  { %v8099_v61 = vpop.eup %8098 }
 0x46e   :  { %v1839_v22 = vmul.f32 %v8099_v61, %v8097_v46 }
 0x470   :  { %v9374_v60 = vpack.c.bf16 %v1839_v22, %v1838_v4 }
 0x472   :  { %2079 = vmatmul.mubr.bf16.vlgmr.msra.gmra.mrb[32].mxu0 %v9374_v60  ;;  %2122 = vmatmul.mubr.bf16.vlgmr.msra.gmra.mrb[64].mxu1 %v9374_v60 }
 0x473   :  { %2395 = vmatpush1.bf16.msra.mxu0 %v9080_v31  ;;  %2438 = vmatpush1.bf16.msra.mxu1 %v9215_v19  ;;  %v10998_v31 = vld [vmem:[#allocation5_spill] sm:$0xff] }
 0x474   :  { %2396 = vmatprep.subr.bf16.mxu0 %v9087_v32  ;;  %2439 = vmatprep.subr.bf16.mxu1 %v9222_v47  ;;  %v1846_v32 = vunpack.c.l.bf16 %v10998_v31 }
 0x475   :  { %2426 = vmatprep.mubr.bf16.mxu0 %v10995_v18  ;;  %2469 = vmatprep.mubr.bf16.mxu1 %v10995_v18 }
 0x477   :  { %2397 = vmatpush1.bf16.msra.mxu0 %v9092_v33  ;;  %2440 = vmatpush1.bf16.msra.mxu1 %v9227_v54  ;;  %v10999_v33 = vld [vmem:[#allocation14_spill] sm:$0xff] }
 0x478   :  { %2398 = vmatprep.subr.bf16.mxu0 %v9099_v34  ;;  %2441 = vmatprep.subr.bf16.mxu1 %v9234_v45  ;;  %v1848_v34 = vunpack.c.l.bf16 %v10999_v33  ;;  %v1852_v16 = vunpack.c.h.bf16 %v10999_v33 }
 0x47b   :  { %2399 = vmatpush1.bf16.msra.mxu0 %v9104_v35  ;;  %2442 = vmatpush1.bf16.msra.mxu1 %v9239_v58 }
 0x47c   :  { %2400 = vmatprep.subr.bf16.mxu0 %v9111_v36  ;;  %2443 = vmatprep.subr.bf16.mxu1 %v9246_v15 }
 0x47f   :  { %2401 = vmatpush1.bf16.msra.mxu0 %v9116_v37  ;;  %2444 = vmatpush1.bf16.msra.mxu1 %v9251_v10  ;;  %v11000_v37 = vld [vmem:[#allocation6_spill] sm:$0xff] }
 0x480   :  { %2402 = vmatprep.subr.bf16.mxu0 %v9123_v38  ;;  %2445 = vmatprep.subr.bf16.mxu1 %v9258_v48  ;;  %v1847_v38 = vunpack.c.l.bf16 %v11000_v37  ;;  %v1851_v52 = vunpack.c.h.bf16 %v11000_v37 }
 0x483   :  { %2403 = vmatpush1.bf16.msra.mxu0 %v9128_v39  ;;  %2446 = vmatpush1.bf16.msra.mxu1 %v9263_v1  ;;  %v11001_v39 = vld [vmem:[#allocation15_spill] sm:$0xff] }
 0x484   :  { %2404 = vmatprep.subr.bf16.mxu0 %v9133_v40  ;;  %2447 = vmatprep.subr.bf16.mxu1 %v9268_v12  ;;  %v1849_v40 = vunpack.c.l.bf16 %v11001_v39  ;;  %v1853_v9 = vunpack.c.h.bf16 %v11001_v39 }
 0x487   :  { %2405 = vmatpush1.bf16.msra.mxu0 %v9140_v41  ;;  %2448 = vmatpush1.bf16.msra.mxu1 %v9275_v28 }
 0x488   :  { %2406 = vmatprep.subr.bf16.mxu0 %v9146_v42  ;;  %2449 = vmatprep.subr.bf16.mxu1 %v9281_v55 }
 0x48b   :  { %2407 = vmatpush1.bf16.msra.mxu0 %v9152_v43  ;;  %2450 = vmatpush1.bf16.msra.mxu1 %v9287_v24 }
 0x48c   :  { %2408 = vmatprep.subr.bf16.mxu0 %v9158_v44  ;;  %2451 = vmatprep.subr.bf16.mxu1 %v9293_v23 }
 0x48f   :  { %2409 = vmatpush1.bf16.msra.mxu0 %v9164_v7  ;;  %2452 = vmatpush1.bf16.msra.mxu1 %v9299_v26  ;;  %v1850_v7 = vunpack.c.h.bf16 %v10998_v31 }
 0x490   :  { %2785 = vmatprep.subr.bf16.mxu1 %v9210_v0 }
 0x545   :  { %v2080_v35 = vpop.f32.mrb[32].mxu0  ;;  %v2123_v36 = vpop.f32.mrb[64].mxu1 }
 0x546   :  { %v2132_v41 = vadd.f32 %v2080_v35, %v1846_v32  ;;  %v2134_v42 = vadd.f32 %v2123_v36, %v1848_v34  ;;  %v2082_v43 = vpop.f32.mrb[33].mxu0  ;;  %v2125_v44 = vpop.f32.mrb[65].mxu1 }
 0x547   :  { %v2133_v63 = vadd.f32 %v2082_v43, %v1847_v38  ;;  %v2135_v0 = vadd.f32 %v2125_v44, %v1849_v40  ;;  %v2084_v5 = vpop.f32.mrb[34].mxu0  ;;  %v2127_v3 = vpop.f32.mrb[66].mxu1 }
 0x548   :  { %v7098_v6 = vmul.f32 -1.442695, %v2132_v41  ;;  %v2136_v53 = vadd.f32 %v2084_v5, %v1850_v7  ;;  %v2138_v29 = vadd.f32 %v2127_v3, %v1852_v16  ;;  %v2086_v30 = vpop.f32.mrb[35].mxu0  ;;  %v2129_v59 = vpop.f32.mrb[67].mxu1 }
 0x549   :  { %v7100_v51 = vmul.f32 -1.442695, %v2133_v63  ;;  %v2137_v14 = vadd.f32 %v2086_v30, %v1851_v52  ;;  %v2139_v2 = vadd.f32 %v2129_v59, %v1853_v9  ;;  %v7102_v13 = vmul.f32 -1.442695, %v2135_v0  ;;  %v11002_v52 = vld [vmem:[#allocation7_spill] sm:$0xff]  ;;  %v11004_v59 = vld [vmem:[#allocation8_spill] sm:$0xff] }
 0x54a   :  { %8100 = vpow2.f32 %v7098_v6  ;;  %v7099_v50 = vmul.f32 -1.442695, %v2136_v53  ;;  %v2194_v9 = vunpack.c.l.bf16 %v11002_v52  ;;  %v11003_v6 = vld [vmem:[#allocation16_spill] sm:$0xff] }
 0x54b   :  { %8102 = vpow2.f32 %v7100_v51  ;;  %v7101_v27 = vmul.f32 -1.442695, %v2137_v14  ;;  %v7103_v11 = vmul.f32 -1.442695, %v2139_v2  ;;  %v2196_v53 = vunpack.c.l.bf16 %v11003_v6  ;;  %v11005_v14 = vld [vmem:[#allocation17_spill] sm:$0xff] }
 0x54c   :  { %8104 = vpow2.f32 %v7099_v50  ;;  %v2195_v51 = vunpack.c.l.bf16 %v11004_v59  ;;  %v2197_v2 = vunpack.c.l.bf16 %v11005_v14 }
 0x54d   :  { %8106 = vpow2.f32 %v7101_v27 }
 0x54e   :  { %8108 = vtanh.f32 %v2134_v42 }
 0x54f   :  { %8110 = vpow2.f32 %v7102_v13 }
 0x550   :  { %8112 = vtanh.f32 %v2138_v29 }
 0x554   :  { %v8101_v8 = vpop.eup %8100 }
 0x555   :  { %v8103_v21 = vpop.eup %8102  ;;  %v2146_v17 = vadd.f32 1.0, %v8101_v8 }
 0x556   :  { %v2158_v56 = vadd.f32 1.0, %v8103_v21  ;;  %v8105_v62 = vpop.eup %8104  ;;  %v2198_v21 = vunpack.c.h.bf16 %v11002_v52 }
 0x557   :  { %8114 = vrcp.f32 %v2146_v17  ;;  %v2147_v57 = vadd.f32 1.0, %v8105_v62  ;;  %v8107_v46 = vpop.eup %8106  ;;  %v2200_v17 = vunpack.c.h.bf16 %v11003_v6 }
 0x558   :  { %8116 = vrcp.f32 %v2158_v56  ;;  %v2159_v61 = vadd.f32 1.0, %v8107_v46  ;;  %v8109_v4 = vpop.eup %8108  ;;  %v2199_v46 = vunpack.c.h.bf16 %v11004_v59 }
 0x559   :  { %8118 = vpow2.f32 %v7103_v11  ;;  %v8111_v22 = vpop.eup %8110 }
 0x55a   :  { %8120 = vrcp.f32 %v2147_v57  ;;  %v8113_v31 = vpop.eup %8112  ;;  %v2172_v38 = vadd.f32 1.0, %v8111_v22 }
 0x55b   :  { %8122 = vrcp.f32 %v2159_v61  ;;  %v2201_v61 = vunpack.c.h.bf16 %v11005_v14 }
 0x55c   :  { %8124 = vrcp.f32 %v2172_v38 }
 0x561   :  { %v8115_v32 = vpop.eup %8114 }
 0x562   :  { %v8117_v33 = vpop.eup %8116  ;;  %v2180_v34 = vmul.f32 %v8115_v32, %v8109_v4 }
 0x563   :  { %v8119_v35 = vpop.eup %8118  ;;  %v2178_v36 = vmul.f32 %v8117_v33, %v9367_v49 }
 0x564   :  { %v8121_v37 = vpop.eup %8120  ;;  %v2173_v42 = vadd.f32 1.0, %v8119_v35 }
 0x565   :  { %v9420_v39 = vadd.f32 %v2180_v34, %v2178_v36  ;;  %v2181_v40 = vmul.f32 %v8121_v37, %v8113_v31  ;;  %v8123_v41 = vpop.eup %8122 }
 0x566   :  { %v2179_v43 = vmul.f32 %v8123_v41, %v9371_v20  ;;  %v8125_v7 = vpop.eup %8124  ;;  %v9537_v20 = vld [vmem:[%s10918_s2 + $0xe0] ss:$16 sps:$4 sm:$0xff]  }
 0x567   :  { %8126 = vtanh.f32 %v9420_v39 }
 0x568   :  { %v9424_v44 = vadd.f32 %v2181_v40, %v2179_v43  ;;  %8128 = vrcp.f32 %v2173_v42 }
 0x56a   :  { %8130 = vtanh.f32 %v9424_v44 }
 0x571   :  { %v8127_v16 = vpop.eup %8126 }
 0x572   :  { %v8129_v49 = vpop.eup %8128  ;;  %v2186_v0 = vmul.f32 %v8127_v16, %v8125_v7 }
 0x574   :  { %v8131_v63 = vpop.eup %8130 }
 0x575   :  { %v2187_v5 = vmul.f32 %v8131_v63, %v8129_v49 }
 0x577   :  { %v9427_v3 = vpack.c.bf16 %v2187_v5, %v2186_v0 }
 0x579   :  { %2427 = vmatmul.mubr.bf16.vlgmr.msra.gmra.mrb[36].mxu0 %v9427_v3  ;;  %2470 = vmatmul.mubr.bf16.vlgmr.msra.gmra.mrb[68].mxu1 %v9427_v3 }
 0x57a   :  { %2786 = vmatpush1.bf16.msra.mxu1 %v9215_v19  ;;  %2774 = vmatprep.mubr.bf16.mxu0 %v10995_v18  ;;  %v7726_v19 = vld [vmem:[%s10918_s2 + $0x4] ss:$16 sps:$4 sm:$0xff]  }
 0x57b   :  { %2787 = vmatprep.subr.bf16.mxu1 %v9222_v47  ;;  %2817 = vmatprep.mubr.bf16.mxu1 %v10995_v18  ;;  %v9454_v47 = vld [vmem:[%s10918_s2] ss:$16 sps:$4 sm:$0xff]  }
 0x57c   :  { %2742 = vmatprep.subr.bf16.mxu0 %v7726_v19 }
 0x57d   :  { %2743 = vmatpush1.bf16.msra.mxu0 %v9454_v47 }
 0x57e   :  { %2788 = vmatpush1.bf16.msra.mxu1 %v9227_v54  ;;  %v9460_v54 = vld [vmem:[%s10918_s2 + $0x24] ss:$16 sps:$4 sm:$0xff]  }
 0x57f   :  { %2789 = vmatprep.subr.bf16.mxu1 %v9234_v45  ;;  %v9465_v45 = vld [vmem:[%s10918_s2 + $0x20] ss:$16 sps:$4 sm:$0xff]   ;;  %2744 = vmatprep.subr.bf16.mxu0 %v9460_v54 }
 0x581   :  { %2745 = vmatpush1.bf16.msra.mxu0 %v9465_v45 }
 0x582   :  { %2790 = vmatpush1.bf16.msra.mxu1 %v9239_v58  ;;  %v9472_v58 = vld [vmem:[%s10918_s2 + $0x44] ss:$16 sps:$4 sm:$0xff]  }
 0x583   :  { %2791 = vmatprep.subr.bf16.mxu1 %v9246_v15  ;;  %v9477_v15 = vld [vmem:[%s10918_s2 + $0x40] ss:$16 sps:$4 sm:$0xff]   ;;  %2746 = vmatprep.subr.bf16.mxu0 %v9472_v58 }
 0x585   :  { %2747 = vmatpush1.bf16.msra.mxu0 %v9477_v15 }
 0x586   :  { %2792 = vmatpush1.bf16.msra.mxu1 %v9251_v10  ;;  %v9484_v10 = vld [vmem:[%s10918_s2 + $0x64] ss:$16 sps:$4 sm:$0xff]  }
 0x587   :  { %2793 = vmatprep.subr.bf16.mxu1 %v9258_v48  ;;  %v9489_v48 = vld [vmem:[%s10918_s2 + $0x60] ss:$16 sps:$4 sm:$0xff]   ;;  %2748 = vmatprep.subr.bf16.mxu0 %v9484_v10 }
 0x589   :  { %2749 = vmatpush1.bf16.msra.mxu0 %v9489_v48 }
 0x58a   :  { %2794 = vmatpush1.bf16.msra.mxu1 %v9263_v1  ;;  %v9496_v1 = vld [vmem:[%s10918_s2 + $0x84] ss:$16 sps:$4 sm:$0xff]  }
 0x58b   :  { %2795 = vmatprep.subr.bf16.mxu1 %v9268_v12  ;;  %v9501_v12 = vld [vmem:[%s10918_s2 + $0x80] ss:$16 sps:$4 sm:$0xff]   ;;  %2750 = vmatprep.subr.bf16.mxu0 %v9496_v1 }
 0x58d   :  { %2751 = vmatpush1.bf16.msra.mxu0 %v9501_v12 }
 0x58e   :  { %2796 = vmatpush1.bf16.msra.mxu1 %v9275_v28  ;;  %v9506_v28 = vld [vmem:[%s10918_s2 + $0xa4] ss:$16 sps:$4 sm:$0xff]  }
 0x58f   :  { %2797 = vmatprep.subr.bf16.mxu1 %v9281_v55  ;;  %v9513_v55 = vld [vmem:[%s10918_s2 + $0xa0] ss:$16 sps:$4 sm:$0xff]   ;;  %2752 = vmatprep.subr.bf16.mxu0 %v9506_v28 }
 0x591   :  { %2753 = vmatpush1.bf16.msra.mxu0 %v9513_v55 }
 0x592   :  { %2798 = vmatpush1.bf16.msra.mxu1 %v9287_v24  ;;  %v9519_v24 = vld [vmem:[%s10918_s2 + $0xc4] ss:$16 sps:$4 sm:$0xff]  }
 0x593   :  { %2799 = vmatprep.subr.bf16.mxu1 %v9293_v23  ;;  %v9525_v23 = vld [vmem:[%s10918_s2 + $0xc0] ss:$16 sps:$4 sm:$0xff]   ;;  %2754 = vmatprep.subr.bf16.mxu0 %v9519_v24 }
 0x595   :  { %2755 = vmatpush1.bf16.msra.mxu0 %v9525_v23 }
 0x596   :  { %2800 = vmatpush1.bf16.msra.mxu1 %v9299_v26  ;;  %v9531_v26 = vld [vmem:[%s10918_s2 + $0xe4] ss:$16 sps:$4 sm:$0xff]  }
 0x597   :  { %2756 = vmatprep.subr.bf16.mxu0 %v9531_v26 }
 0x599   :  { %2757 = vmatpush1.bf16.msra.mxu0 %v9537_v20 }
 0x59a   :  { %3090 = vmatprep.subr.bf16.mxu0 %v7726_v19 }
 0x64c   :  { %v2428_v29 = vpop.f32.mrb[36].mxu0  ;;  %v2471_v30 = vpop.f32.mrb[68].mxu1 }
 0x64d   :  { %v2480_v50 = vadd.f32 %v2428_v29, %v2194_v9  ;;  %v2482_v27 = vadd.f32 %v2471_v30, %v2196_v53  ;;  %v2430_v13 = vpop.f32.mrb[37].mxu0  ;;  %v2473_v8 = vpop.f32.mrb[69].mxu1 }
 0x64e   :  { %v2481_v11 = vadd.f32 %v2430_v13, %v2195_v51  ;;  %v2483_v56 = vadd.f32 %v2473_v8, %v2197_v2  ;;  %v2432_v62 = vpop.f32.mrb[38].mxu0  ;;  %v2475_v57 = vpop.f32.mrb[70].mxu1 }
 0x64f   :  { %v7136_v4 = vmul.f32 -1.442695, %v2480_v50  ;;  %v2484_v22 = vadd.f32 %v2432_v62, %v2198_v21  ;;  %v2486_v31 = vadd.f32 %v2475_v57, %v2200_v17  ;;  %v2434_v32 = vpop.f32.mrb[39].mxu0  ;;  %v2477_v33 = vpop.f32.mrb[71].mxu1 }
 0x650   :  { %v7138_v34 = vmul.f32 -1.442695, %v2481_v11  ;;  %v2485_v35 = vadd.f32 %v2434_v32, %v2199_v46  ;;  %v2487_v36 = vadd.f32 %v2477_v33, %v2201_v61  ;;  %v7140_v40 = vmul.f32 -1.442695, %v2483_v56  ;;  %v7769_v61 = vld [vmem:[%s10918_s2 + $0xe8] ss:$16 sps:$4 sm:$0xff]  }
 0x651   :  { %8132 = vpow2.f32 %v7136_v4  ;;  %v7137_v37 = vmul.f32 -1.442695, %v2484_v22  ;;  %v7777_v4 = vld [vmem:[%s10920_s4 + $0xc] ss:$16 sps:$4 sm:$0xff]   ;;  %v11007_v32 = vld [vmem:[#allocation18_spill] sm:$0xff] }
 0x652   :  { %8134 = vpow2.f32 %v7138_v34  ;;  %v7139_v38 = vmul.f32 -1.442695, %v2485_v35  ;;  %v7141_v7 = vmul.f32 -1.442695, %v2487_v36  ;;  %v11006_v22 = vld [vmem:[#allocation9_spill] sm:$0xff]  ;;  %v2544_v33 = vunpack.c.l.bf16 %v11007_v32  ;;  %v11008_v36 = vld [vmem:[#allocation10_spill] sm:$0xff] }
 0x653   :  { %8136 = vpow2.f32 %v7137_v37  ;;  %v2543_v37 = vunpack.c.l.bf16 %v11008_v36 }
 0x654   :  { %8138 = vpow2.f32 %v7139_v38  ;;  %v11009_v38 = vld [vmem:[#allocation19_spill] sm:$0xff] }
 0x655   :  { %8140 = vtanh.f32 %v2482_v27 }
 0x656   :  { %8142 = vpow2.f32 %v7140_v40  ;;  %v2545_v40 = vunpack.c.l.bf16 %v11009_v38 }
 0x657   :  { %8144 = vtanh.f32 %v2486_v31  ;;  %v2542_v31 = vunpack.c.l.bf16 %v11006_v22 }
 0x65b   :  { %v8133_v41 = vpop.eup %8132 }
 0x65c   :  { %v8135_v42 = vpop.eup %8134  ;;  %v2494_v43 = vadd.f32 1.0, %v8133_v41 }
 0x65d   :  { %v2506_v16 = vadd.f32 1.0, %v8135_v42  ;;  %v8137_v49 = vpop.eup %8136 }
 0x65e   :  { %8146 = vrcp.f32 %v2494_v43  ;;  %v2495_v63 = vadd.f32 1.0, %v8137_v49  ;;  %v8139_v0 = vpop.eup %8138  ;;  %v2548_v49 = vunpack.c.h.bf16 %v11007_v32 }
 0x65f   :  { %8148 = vrcp.f32 %v2506_v16  ;;  %v2507_v5 = vadd.f32 1.0, %v8139_v0  ;;  %v8141_v19 = vpop.eup %8140  ;;  %v2546_v16 = vunpack.c.h.bf16 %v11006_v22 }
 0x660   :  { %8150 = vpow2.f32 %v7141_v7  ;;  %v8143_v52 = vpop.eup %8142 }
 0x661   :  { %8152 = vrcp.f32 %v2495_v63  ;;  %v8145_v9 = vpop.eup %8144  ;;  %v2520_v14 = vadd.f32 1.0, %v8143_v52  ;;  %v2547_v52 = vunpack.c.h.bf16 %v11008_v36  ;;  %v7772_v36 = vld [vmem:[%s10920_s4] ss:$16 sps:$4 sm:$0xff]  }
 0x662   :  { %8154 = vrcp.f32 %v2507_v5 }
 0x663   :  { %8156 = vrcp.f32 %v2520_v14 }
 0x668   :  { %v8147_v6 = vpop.eup %8146 }
 0x669   :  { %v8149_v53 = vpop.eup %8148  ;;  %v2528_v29 = vmul.f32 %v8147_v6, %v8141_v19 }
 0x66a   :  { %v8151_v30 = vpop.eup %8150  ;;  %v2526_v59 = vmul.f32 %v8149_v53, %v9420_v39 }
 0x66b   :  { %v8153_v51 = vpop.eup %8152  ;;  %v2521_v13 = vadd.f32 1.0, %v8151_v30 }
 0x66c   :  { %v9550_v2 = vadd.f32 %v2528_v29, %v2526_v59  ;;  %v2529_v50 = vmul.f32 %v8153_v51, %v8145_v9  ;;  %v8155_v27 = vpop.eup %8154  ;;  %v2549_v9 = vunpack.c.h.bf16 %v11009_v38  ;;  %v7780_v38 = vld [vmem:[%s10920_s4 + $0x24] ss:$16 sps:$4 sm:$0xff]  }
 0x66d   :  { %v2527_v8 = vmul.f32 %v8155_v27, %v9424_v44  ;;  %v8157_v17 = vpop.eup %8156  ;;  %v7750_v44 = vld [vmem:[%s10918_s2 + $0xc] ss:$16 sps:$4 sm:$0xff]  }
 0x66e   :  { %8158 = vtanh.f32 %v9550_v2  ;;  %3133 = vmatprep.subr.bf16.mxu1 %v7750_v44 }
 0x66f   :  { %v9554_v21 = vadd.f32 %v2529_v50, %v2527_v8  ;;  %8160 = vrcp.f32 %v2521_v13 }
 0x671   :  { %8162 = vtanh.f32 %v9554_v21 }
 0x678   :  { %v8159_v11 = vpop.eup %8158 }
 0x679   :  { %v8161_v39 = vpop.eup %8160  ;;  %v2534_v62 = vmul.f32 %v8159_v11, %v8157_v17 }
 0x67b   :  { %v8163_v56 = vpop.eup %8162 }
 0x67c   :  { %v2535_v57 = vmul.f32 %v8163_v56, %v8161_v39 }
 0x67e   :  { %v9557_v46 = vpack.c.bf16 %v2535_v57, %v2534_v62 }
 0x680   :  { %2775 = vmatmul.mubr.bf16.vlgmr.msra.gmra.mrb[40].mxu0 %v9557_v46  ;;  %2818 = vmatmul.mubr.bf16.vlgmr.msra.gmra.mrb[72].mxu1 %v9557_v46 }
 0x681   :  { %3091 = vmatpush1.bf16.msra.mxu0 %v9454_v47  ;;  %3122 = vmatprep.mubr.bf16.mxu0 %v10995_v18  ;;  %v7748_v47 = vld [vmem:[%s10918_s2 + $0x8] ss:$16 sps:$4 sm:$0xff]  }
 0x682   :  { %3092 = vmatprep.subr.bf16.mxu0 %v9460_v54  ;;  %3165 = vmatprep.mubr.bf16.mxu1 %v10995_v18  ;;  %v7753_v54 = vld [vmem:[%s10918_s2 + $0x2c] ss:$16 sps:$4 sm:$0xff]  }
 0x683   :  { %3134 = vmatpush1.bf16.msra.mxu1 %v7748_v47 }
 0x684   :  { %3135 = vmatprep.subr.bf16.mxu1 %v7753_v54 }
 0x685   :  { %3093 = vmatpush1.bf16.msra.mxu0 %v9465_v45  ;;  %v7751_v45 = vld [vmem:[%s10918_s2 + $0x28] ss:$16 sps:$4 sm:$0xff]  }
 0x686   :  { %3094 = vmatprep.subr.bf16.mxu0 %v9472_v58  ;;  %v7756_v58 = vld [vmem:[%s10918_s2 + $0x4c] ss:$16 sps:$4 sm:$0xff]  }
 0x687   :  { %3136 = vmatpush1.bf16.msra.mxu1 %v7751_v45 }
 0x688   :  { %3137 = vmatprep.subr.bf16.mxu1 %v7756_v58 }
 0x689   :  { %3095 = vmatpush1.bf16.msra.mxu0 %v9477_v15  ;;  %v7754_v15 = vld [vmem:[%s10918_s2 + $0x48] ss:$16 sps:$4 sm:$0xff]  }
 0x68a   :  { %3096 = vmatprep.subr.bf16.mxu0 %v9484_v10  ;;  %v7759_v10 = vld [vmem:[%s10918_s2 + $0x6c] ss:$16 sps:$4 sm:$0xff]  }
 0x68b   :  { %3138 = vmatpush1.bf16.msra.mxu1 %v7754_v15 }
 0x68c   :  { %3139 = vmatprep.subr.bf16.mxu1 %v7759_v10 }
 0x68d   :  { %3097 = vmatpush1.bf16.msra.mxu0 %v9489_v48  ;;  %v7757_v48 = vld [vmem:[%s10918_s2 + $0x68] ss:$16 sps:$4 sm:$0xff]  }
 0x68e   :  { %3098 = vmatprep.subr.bf16.mxu0 %v9496_v1  ;;  %v7762_v1 = vld [vmem:[%s10918_s2 + $0x8c] ss:$16 sps:$4 sm:$0xff]  }
 0x68f   :  { %3140 = vmatpush1.bf16.msra.mxu1 %v7757_v48 }
 0x690   :  { %3141 = vmatprep.subr.bf16.mxu1 %v7762_v1 }
 0x691   :  { %3099 = vmatpush1.bf16.msra.mxu0 %v9501_v12  ;;  %v7760_v12 = vld [vmem:[%s10918_s2 + $0x88] ss:$16 sps:$4 sm:$0xff]  }
 0x692   :  { %3100 = vmatprep.subr.bf16.mxu0 %v9506_v28  ;;  %v7765_v28 = vld [vmem:[%s10918_s2 + $0xac] ss:$16 sps:$4 sm:$0xff]  }
 0x693   :  { %3142 = vmatpush1.bf16.msra.mxu1 %v7760_v12 }
 0x694   :  { %3143 = vmatprep.subr.bf16.mxu1 %v7765_v28 }
 0x695   :  { %3101 = vmatpush1.bf16.msra.mxu0 %v9513_v55  ;;  %v7763_v55 = vld [vmem:[%s10918_s2 + $0xa8] ss:$16 sps:$4 sm:$0xff]  }
 0x696   :  { %3102 = vmatprep.subr.bf16.mxu0 %v9519_v24  ;;  %v7768_v24 = vld [vmem:[%s10918_s2 + $0xcc] ss:$16 sps:$4 sm:$0xff]  }
 0x697   :  { %3144 = vmatpush1.bf16.msra.mxu1 %v7763_v55 }
 0x698   :  { %3145 = vmatprep.subr.bf16.mxu1 %v7768_v24 }
 0x699   :  { %3103 = vmatpush1.bf16.msra.mxu0 %v9525_v23  ;;  %v7774_v23 = vld [vmem:[%s10920_s4 + $0x4] ss:$16 sps:$4 sm:$0xff]  }
 0x69a   :  { %3104 = vmatprep.subr.bf16.mxu0 %v9531_v26  ;;  %v7766_v26 = vld [vmem:[%s10918_s2 + $0xc8] ss:$16 sps:$4 sm:$0xff]  }
 0x69b   :  { %3146 = vmatpush1.bf16.msra.mxu1 %v7766_v26 }
 0x69d   :  { %3105 = vmatpush1.bf16.msra.mxu0 %v9537_v20  ;;  %v7771_v20 = vld [vmem:[%s10918_s2 + $0xec] ss:$16 sps:$4 sm:$0xff]  }
 0x69e   :  { %3456 = vmatprep.subr.bf16.mxu0 %v7774_v23  ;;  %3147 = vmatprep.subr.bf16.mxu1 %v7771_v20 }
 0x69f   :  { %3148 = vmatpush1.bf16.msra.mxu1 %v7769_v61 }
 0x6a0   :  { %3569 = vmatprep.subr.bf16.mxu1 %v7777_v4 }
 0x753   :  { %v2776_v34 = vpop.f32.mrb[40].mxu0  ;;  %v2819_v35 = vpop.f32.mrb[72].mxu1 }
 0x754   :  { %v2828_v41 = vadd.f32 %v2776_v34, %v2542_v31  ;;  %v2830_v42 = vadd.f32 %v2819_v35, %v2544_v33  ;;  %v2778_v43 = vpop.f32.mrb[41].mxu0  ;;  %v2821_v7 = vpop.f32.mrb[73].mxu1 }
 0x755   :  { %v2829_v63 = vadd.f32 %v2778_v43, %v2543_v37  ;;  %v2831_v0 = vadd.f32 %v2821_v7, %v2545_v40  ;;  %v2780_v5 = vpop.f32.mrb[42].mxu0  ;;  %v2823_v19 = vpop.f32.mrb[74].mxu1  ;;  %v7783_v40 = vld [vmem:[%s10920_s4 + $0x2c] ss:$16 sps:$4 sm:$0xff]   ;;  %v7786_v43 = vld [vmem:[%s10920_s4 + $0x44] ss:$16 sps:$4 sm:$0xff]  }
 0x756   :  { %v7174_v6 = vmul.f32 -1.442695, %v2828_v41  ;;  %v2832_v53 = vadd.f32 %v2780_v5, %v2546_v16  ;;  %v2834_v29 = vadd.f32 %v2823_v19, %v2548_v49  ;;  %v2782_v30 = vpop.f32.mrb[43].mxu0  ;;  %v2825_v59 = vpop.f32.mrb[75].mxu1  ;;  %v7778_v41 = vld [vmem:[%s10920_s4 + $0x20] ss:$16 sps:$4 sm:$0xff]  }
 0x757   :  { %v7176_v51 = vmul.f32 -1.442695, %v2829_v63  ;;  %v2833_v14 = vadd.f32 %v2782_v30, %v2547_v52  ;;  %v2835_v50 = vadd.f32 %v2825_v59, %v2549_v9  ;;  %v7178_v8 = vmul.f32 -1.442695, %v2831_v0  ;;  %v7789_v7 = vld [vmem:[%s10920_s4 + $0x4c] ss:$16 sps:$4 sm:$0xff]  }
 0x758   :  { %8164 = vpow2.f32 %v7174_v6  ;;  %v7175_v27 = vmul.f32 -1.442695, %v2832_v53  ;;  %v7784_v16 = vld [vmem:[%s10920_s4 + $0x40] ss:$16 sps:$4 sm:$0xff]   ;;  %v7787_v49 = vld [vmem:[%s10920_s4 + $0x48] ss:$16 sps:$4 sm:$0xff]  }
 0x759   :  { %8166 = vpow2.f32 %v7176_v51  ;;  %v7177_v13 = vmul.f32 -1.442695, %v2833_v14  ;;  %v7179_v56 = vmul.f32 -1.442695, %v2835_v50  ;;  %v7792_v63 = vld [vmem:[%s10920_s4 + $0x64] ss:$16 sps:$4 sm:$0xff]  }
 0x75a   :  { %8168 = vpow2.f32 %v7175_v27  ;;  %v7795_v0 = vld [vmem:[%s10920_s4 + $0x6c] ss:$16 sps:$4 sm:$0xff]   ;;  %v7790_v5 = vld [vmem:[%s10920_s4 + $0x60] ss:$16 sps:$4 sm:$0xff]   ;;  %v7793_v19 = vld [vmem:[%s10920_s4 + $0x68] ss:$16 sps:$4 sm:$0xff]  }
 0x75b   :  { %8170 = vpow2.f32 %v7177_v13  ;;  %v7798_v52 = vld [vmem:[%s10920_s4 + $0x84] ss:$16 sps:$4 sm:$0xff]   ;;  %v7801_v9 = vld [vmem:[%s10920_s4 + $0x8c] ss:$16 sps:$4 sm:$0xff]   ;;  %v7796_v6 = vld [vmem:[%s10920_s4 + $0x80] ss:$16 sps:$4 sm:$0xff]  }
 0x75c   :  { %8172 = vtanh.f32 %v2830_v42  ;;  %v7781_v42 = vld [vmem:[%s10920_s4 + $0x28] ss:$16 sps:$4 sm:$0xff]   ;;  %v7807_v30 = vld [vmem:[%s10920_s4 + $0xac] ss:$16 sps:$4 sm:$0xff]   ;;  %v7802_v59 = vld [vmem:[%s10920_s4 + $0xa0] ss:$16 sps:$4 sm:$0xff]  }
 0x75d   :  { %8174 = vpow2.f32 %v7178_v8  ;;  %v7799_v53 = vld [vmem:[%s10920_s4 + $0x88] ss:$16 sps:$4 sm:$0xff]   ;;  %v7810_v14 = vld [vmem:[%s10920_s4 + $0xc4] ss:$16 sps:$4 sm:$0xff]   ;;  %v7813_v50 = vld [vmem:[%s10920_s4 + $0xcc] ss:$16 sps:$4 sm:$0xff]  }
 0x75e   :  { %8176 = vtanh.f32 %v2834_v29  ;;  %v7804_v29 = vld [vmem:[%s10920_s4 + $0xa4] ss:$16 sps:$4 sm:$0xff]   ;;  %v7805_v51 = vld [vmem:[%s10920_s4 + $0xa8] ss:$16 sps:$4 sm:$0xff]   ;;  %v7808_v27 = vld [vmem:[%s10920_s4 + $0xc0] ss:$16 sps:$4 sm:$0xff]  }
 0x75f   :  { %v7811_v13 = vld [vmem:[%s10920_s4 + $0xc8] ss:$16 sps:$4 sm:$0xff]   ;;  %v7816_v8 = vld [vmem:[%s10920_s4 + $0xe4] ss:$16 sps:$4 sm:$0xff]  }
 0x762   :  { %v8165_v17 = vpop.eup %8164 }
 0x763   :  { %v8167_v11 = vpop.eup %8166  ;;  %v2842_v39 = vadd.f32 1.0, %v8165_v17  ;;  %v7819_v17 = vld [vmem:[%s10920_s4 + $0xec] ss:$16 sps:$4 sm:$0xff]  }
 0x764   :  { %v2854_v62 = vadd.f32 1.0, %v8167_v11  ;;  %v8169_v57 = vpop.eup %8168  ;;  %v7814_v11 = vld [vmem:[%s10920_s4 + $0xe0] ss:$16 sps:$4 sm:$0xff]  }
 0x765   :  { %8178 = vrcp.f32 %v2842_v39  ;;  %v2843_v44 = vadd.f32 1.0, %v8169_v57  ;;  %v8171_v47 = vpop.eup %8170  ;;  %v7817_v39 = vld [vmem:[%s10920_s4 + $0xe8] ss:$16 sps:$4 sm:$0xff]   ;;  %v11010_v57 = vld [vmem:[#allocation22_spill] sm:$0xff] }
 0x766   :  { %8180 = vrcp.f32 %v2854_v62  ;;  %v2855_v54 = vadd.f32 1.0, %v8171_v47  ;;  %v8173_v45 = vpop.eup %8172  ;;  %v9752_v62 = vld [vmem:[%s10921_s5] ss:$16 sps:$4 sm:$0xff]  }
 0x767   :  { %8182 = vpow2.f32 %v7179_v56  ;;  %v8175_v58 = vpop.eup %8174  ;;  %v9747_v56 = vld [vmem:[%s10921_s5 + $0x4] ss:$16 sps:$4 sm:$0xff]   ;;  %v9809_v47 = vld [vmem:[%s10921_s5 + $0x20] ss:$16 sps:$4 sm:$0xff]  }
 0x768   :  { %8184 = vrcp.f32 %v2843_v44  ;;  %v8177_v15 = vpop.eup %8176  ;;  %v2868_v24 = vadd.f32 1.0, %v8175_v58  ;;  %v11011_v44 = vld [vmem:[#allocation23_spill] sm:$0xff]  ;;  %v9827_v58 = vld [vmem:[%s10921_s5 + $0x40] ss:$16 sps:$4 sm:$0xff]  }
 0x769   :  { %8186 = vrcp.f32 %v2855_v54  ;;  %v9814_v54 = vld [vmem:[%s10921_s5 + $0x44] ss:$16 sps:$4 sm:$0xff]  }
 0x76a   :  { %8188 = vrcp.f32 %v2868_v24  ;;  %v9875_v24 = vld [vmem:[%s10921_s5 + $0x80] ss:$16 sps:$4 sm:$0xff]  }
 0x76f   :  { %v8179_v10 = vpop.eup %8178 }
 0x770   :  { %v8181_v48 = vpop.eup %8180  ;;  %v2876_v1 = vmul.f32 %v8179_v10, %v8173_v45  ;;  %v9820_v45 = vld [vmem:[%s10921_s5 + $0x28] ss:$16 sps:$4 sm:$0xff]   ;;  %v9838_v10 = vld [vmem:[%s10921_s5 + $0x64] ss:$16 sps:$4 sm:$0xff]  }
 0x771   :  { %v8183_v12 = vpop.eup %8182  ;;  %v2874_v28 = vmul.f32 %v8181_v48, %v9550_v2  ;;  %v9844_v48 = vld [vmem:[%s10921_s5 + $0x48] ss:$16 sps:$4 sm:$0xff]  }
 0x772   :  { %v8185_v55 = vpop.eup %8184  ;;  %v2869_v61 = vadd.f32 1.0, %v8183_v12  ;;  %v9856_v12 = vld [vmem:[%s10921_s5 + $0x60] ss:$16 sps:$4 sm:$0xff]  }
 0x773   :  { %v9641_v23 = vadd.f32 %v2876_v1, %v2874_v28  ;;  %v2877_v26 = vmul.f32 %v8185_v55, %v8177_v15  ;;  %v8187_v20 = vpop.eup %8186  ;;  %v9832_v15 = vld [vmem:[%s10921_s5 + $0x4c] ss:$16 sps:$4 sm:$0xff]   ;;  %v9862_v28 = vld [vmem:[%s10921_s5 + $0x84] ss:$16 sps:$4 sm:$0xff]   ;;  %v9868_v55 = vld [vmem:[%s10921_s5 + $0x68] ss:$16 sps:$4 sm:$0xff]  }
 0x774   :  { %v2875_v4 = vmul.f32 %v8187_v20, %v9554_v21  ;;  %v8189_v31 = vpop.eup %8188  ;;  %v7775_v21 = vld [vmem:[%s10920_s4 + $0x8] ss:$16 sps:$4 sm:$0xff]   ;;  %v9850_v1 = vld [vmem:[%s10921_s5 + $0x6c] ss:$16 sps:$4 sm:$0xff]  }
 0x775   :  { %8190 = vtanh.f32 %v9641_v23  ;;  %v9887_v20 = vld [vmem:[%s10921_s5 + $0x8c] ss:$16 sps:$4 sm:$0xff]  }
 0x776   :  { %v9645_v22 = vadd.f32 %v2877_v26, %v2875_v4  ;;  %8192 = vrcp.f32 %v2869_v61  ;;  %v9881_v26 = vld [vmem:[%s10921_s5 + $0xa4] ss:$16 sps:$4 sm:$0xff]   ;;  %v9892_v61 = vld [vmem:[%s10921_s5 + $0x88] ss:$16 sps:$4 sm:$0xff]   ;;  %v9899_v4 = vld [vmem:[%s10921_s5 + $0xa0] ss:$16 sps:$4 sm:$0xff]  }
 0x778   :  { %8194 = vtanh.f32 %v9645_v22 }
 0x77f   :  { %v8191_v32 = vpop.eup %8190 }
 0x780   :  { %v8193_v2 = vpop.eup %8192  ;;  %v2882_v34 = vmul.f32 %v8191_v32, %v8189_v31  ;;  %v9905_v31 = vld [vmem:[%s10921_s5 + $0xc4] ss:$16 sps:$4 sm:$0xff]   ;;  %v9911_v32 = vld [vmem:[%s10921_s5 + $0xa8] ss:$16 sps:$4 sm:$0xff]  }
 0x782   :  { %v8195_v33 = vpop.eup %8194 }
 0x783   :  { %v2883_v35 = vmul.f32 %v8195_v33, %v8193_v2  ;;  %v9916_v2 = vld [vmem:[%s10921_s5 + $0xac] ss:$16 sps:$4 sm:$0xff]   ;;  %v9923_v33 = vld [vmem:[%s10921_s5 + $0xc0] ss:$16 sps:$4 sm:$0xff]  }
 0x785   :  { %v9654_v37 = vpack.c.bf16 %v2883_v35, %v2882_v34  ;;  %v9930_v34 = vld [vmem:[%s10921_s5 + $0xcc] ss:$16 sps:$4 sm:$0xff]   ;;  %v9935_v35 = vld [vmem:[%s10921_s5 + $0xe4] ss:$16 sps:$4 sm:$0xff]  }
 0x787   :  { %3123 = vmatmul.mubr.bf16.vlgmr.msra.gmra.mrb[44].mxu0 %v9654_v37  ;;  %3166 = vmatmul.mubr.bf16.vlgmr.msra.gmra.mrb[76].mxu1 %v9654_v37 }
 0x788   :  { %3457 = vmatpush1.bf16.msra.mxu0 %v7772_v36  ;;  %3570 = vmatpush1.bf16.msra.mxu1 %v7775_v21  ;;  %v9940_v36 = vld [vmem:[%s10921_s5 + $0xc8] ss:$16 sps:$4 sm:$0xff]   ;;  %v9947_v21 = vld [vmem:[%s10921_s5 + $0xe0] ss:$16 sps:$4 sm:$0xff]  }
 0x789   :  { %3458 = vmatprep.subr.bf16.mxu0 %v7780_v38  ;;  %3571 = vmatprep.subr.bf16.mxu1 %v7783_v40  ;;  %v9959_v38 = vld [vmem:[%s10921_s5 + $0xec] ss:$16 sps:$4 sm:$0xff]  }
 0x78a   :  { %3488 = vmatprep.mubr.bf16.mxu0 %v10995_v18  ;;  %3601 = vmatprep.mubr.bf16.mxu1 %v10995_v18  ;;  %v11012_v40 = vld [vmem:[#allocation11_spill] sm:$0xff] }
 0x78c   :  { %3459 = vmatpush1.bf16.msra.mxu0 %v7778_v41  ;;  %3572 = vmatpush1.bf16.msra.mxu1 %v7781_v42  ;;  %v2890_v41 = vunpack.c.l.bf16 %v11012_v40  ;;  %v11013_v42 = vld [vmem:[#allocation20_spill] sm:$0xff] }
 0x78d   :  { %3460 = vmatprep.subr.bf16.mxu0 %v7786_v43  ;;  %3573 = vmatprep.subr.bf16.mxu1 %v7789_v7  ;;  %v2892_v43 = vunpack.c.l.bf16 %v11013_v42 }
 0x790   :  { %3461 = vmatpush1.bf16.msra.mxu0 %v7784_v16  ;;  %3574 = vmatpush1.bf16.msra.mxu1 %v7787_v49  ;;  %v11014_v49 = vld [vmem:[#allocation12_spill] sm:$0xff] }
 0x791   :  { %3462 = vmatprep.subr.bf16.mxu0 %v7792_v63  ;;  %3575 = vmatprep.subr.bf16.mxu1 %v7795_v0  ;;  %v2891_v63 = vunpack.c.l.bf16 %v11014_v49  ;;  %v11015_v0 = vld [vmem:[#allocation21_spill] sm:$0xff] }
 0x794   :  { %3463 = vmatpush1.bf16.msra.mxu0 %v7790_v5  ;;  %3576 = vmatpush1.bf16.msra.mxu1 %v7793_v19  ;;  %v2893_v5 = vunpack.c.l.bf16 %v11015_v0 }
 0x795   :  { %3464 = vmatprep.subr.bf16.mxu0 %v7798_v52  ;;  %3577 = vmatprep.subr.bf16.mxu1 %v7801_v9 }
 0x798   :  { %3465 = vmatpush1.bf16.msra.mxu0 %v7796_v6  ;;  %3578 = vmatpush1.bf16.msra.mxu1 %v7799_v53  ;;  %v2894_v53 = vunpack.c.h.bf16 %v11012_v40 }
 0x799   :  { %3466 = vmatprep.subr.bf16.mxu0 %v7804_v29  ;;  %3579 = vmatprep.subr.bf16.mxu1 %v7807_v30  ;;  %v2896_v29 = vunpack.c.h.bf16 %v11013_v42 }
 0x79c   :  { %3467 = vmatpush1.bf16.msra.mxu0 %v7802_v59  ;;  %3580 = vmatpush1.bf16.msra.mxu1 %v7805_v51 }
 0x79d   :  { %3468 = vmatprep.subr.bf16.mxu0 %v7810_v14  ;;  %3581 = vmatprep.subr.bf16.mxu1 %v7813_v50  ;;  %v2895_v50 = vunpack.c.h.bf16 %v11014_v49 }
 0x7a0   :  { %3469 = vmatpush1.bf16.msra.mxu0 %v7808_v27  ;;  %3582 = vmatpush1.bf16.msra.mxu1 %v7811_v13  ;;  %v2897_v27 = vunpack.c.h.bf16 %v11015_v0 }
 0x7a1   :  { %3470 = vmatprep.subr.bf16.mxu0 %v7816_v8  ;;  %3583 = vmatprep.subr.bf16.mxu1 %v7819_v17 }
 0x7a4   :  { %3471 = vmatpush1.bf16.msra.mxu0 %v7814_v11  ;;  %3584 = vmatpush1.bf16.msra.mxu1 %v7817_v39 }
 0x7a5   :  { %3950 = vmatprep.subr.bf16.mxu0 %v9747_v56 }
 0x7a7   :  { %3489 = vmatmul.mubr.bf16.vlgmr.msra.gmra.mrb[48].mxu0 %v11010_v57  ;;  %3602 = vmatmul.mubr.bf16.vlgmr.msra.gmra.mrb[80].mxu1 %v11010_v57 }
 0x7a8   :  { %3498 = vmatprep.mubr.bf16.mxu0 %v10995_v18  ;;  %3611 = vmatprep.mubr.bf16.mxu1 %v10995_v18 }
 0x7a9   :  { %3951 = vmatpush1.bf16.msra.mxu0 %v9752_v62 }
 0x7af   :  { %3499 = vmatmul.mubr.bf16.gmra.mrb[52].mxu0 %v11011_v44  ;;  %3612 = vmatmul.mubr.bf16.gmra.mrb[84].mxu1 %v11011_v44 }
 0x7b0   :  { %3508 = vmatprep.mubr.bf16.mxu0 %v10995_v18  ;;  %3621 = vmatprep.mubr.bf16.mxu1 %v10995_v18 }
 0x7b7   :  { %3509 = vmatmul.mubr.bf16.gmra.mrb[56].mxu0 %v9320_v25  ;;  %3622 = vmatmul.mubr.bf16.gmra.mrb[88].mxu1 %v9320_v25  ;;  %v9787_v25 = vld [vmem:[%s10921_s5 + $0xc] ss:$16 sps:$4 sm:$0xff]  }
 0x7b8   :  { %3518 = vmatprep.mubr.bf16.mxu0 %v10995_v18  ;;  %3631 = vmatprep.mubr.bf16.mxu1 %v10995_v18 }
 0x7b9   :  { %3993 = vmatprep.subr.bf16.mxu1 %v9787_v25 }
 0x7bf   :  { %3519 = vmatmul.mubr.bf16.gmra.mrb[60].mxu0 %v9374_v60  ;;  %3632 = vmatmul.mubr.bf16.gmra.mrb[92].mxu1 %v9374_v60  ;;  %v9792_v60 = vld [vmem:[%s10921_s5 + $0x8] ss:$16 sps:$4 sm:$0xff]  }
 0x7c0   :  { %3528 = vmatprep.mubr.bf16.mxu0 %v10995_v18  ;;  %3641 = vmatprep.mubr.bf16.mxu1 %v10995_v18 }
 0x7c1   :  { %3994 = vmatpush1.bf16.msra.mxu1 %v9792_v60 }
 0x7c7   :  { %3529 = vmatmul.mubr.bf16.gmra.mrb[64].mxu0 %v9427_v3  ;;  %3642 = vmatmul.mubr.bf16.gmra.mrb[96].mxu1 %v9427_v3  ;;  %v9799_v3 = vld [vmem:[%s10921_s5 + $0x24] ss:$16 sps:$4 sm:$0xff]  }
 0x7c8   :  { %3538 = vmatprep.mubr.bf16.mxu0 %v10995_v18  ;;  %3651 = vmatprep.mubr.bf16.mxu1 %v10995_v18 }
 0x7c9   :  { %3952 = vmatprep.subr.bf16.mxu0 %v9799_v3 }
 0x7ca   :  { %3953 = vmatpush1.bf16.msra.mxu0 %v9809_v47 }
 0x7cb   :  { %3954 = vmatprep.subr.bf16.mxu0 %v9814_v54 }
 0x7ce   :  { %3955 = vmatpush1.bf16.msra.mxu0 %v9827_v58 }
 0x7cf   :  { %3539 = vmatmul.mubr.bf16.gmra.mrb[68].mxu0 %v9557_v46  ;;  %3652 = vmatmul.mubr.bf16.gmra.mrb[100].mxu1 %v9557_v46  ;;  %v9804_v46 = vld [vmem:[%s10921_s5 + $0x2c] ss:$16 sps:$4 sm:$0xff]  }
 0x7d0   :  { %3548 = vmatprep.mubr.bf16.mxu0 %v10995_v18  ;;  %3661 = vmatprep.mubr.bf16.mxu1 %v10995_v18 }
 0x7d1   :  { %3995 = vmatprep.subr.bf16.mxu1 %v9804_v46  ;;  %3956 = vmatprep.subr.bf16.mxu0 %v9838_v10 }
 0x7d2   :  { %3996 = vmatpush1.bf16.msra.mxu1 %v9820_v45  ;;  %3957 = vmatpush1.bf16.msra.mxu0 %v9856_v12 }
 0x7d3   :  { %3997 = vmatprep.subr.bf16.mxu1 %v9832_v15  ;;  %3958 = vmatprep.subr.bf16.mxu0 %v9862_v28 }
 0x7d6   :  { %3998 = vmatpush1.bf16.msra.mxu1 %v9844_v48  ;;  %3959 = vmatpush1.bf16.msra.mxu0 %v9875_v24 }
 0x7d7   :  { %3549 = vmatmul.mubr.bf16.gmra.mrb[72].mxu0 %v9654_v37  ;;  %3662 = vmatmul.mubr.bf16.gmra.mrb[104].mxu1 %v9654_v37  ;;  %v9954_v37 = vld [vmem:[%s10921_s5 + $0xe8] ss:$16 sps:$4 sm:$0xff]  }
 0x7d8   :  { %3558 = vmatprep.mubr.bf16.mxu0 %v10995_v18  ;;  %3671 = vmatprep.mubr.bf16.mxu1 %v10995_v18 }
 0x7d9   :  { %3999 = vmatprep.subr.bf16.mxu1 %v9850_v1  ;;  %3960 = vmatprep.subr.bf16.mxu0 %v9881_v26 }
 0x7da   :  { %4000 = vmatpush1.bf16.msra.mxu1 %v9868_v55  ;;  %3961 = vmatpush1.bf16.msra.mxu0 %v9899_v4 }
 0x7db   :  { %4001 = vmatprep.subr.bf16.mxu1 %v9887_v20  ;;  %3962 = vmatprep.subr.bf16.mxu0 %v9905_v31 }
 0x7de   :  { %4002 = vmatpush1.bf16.msra.mxu1 %v9892_v61  ;;  %3963 = vmatpush1.bf16.msra.mxu0 %v9923_v33 }
 0x7df   :  { %4003 = vmatprep.subr.bf16.mxu1 %v9916_v2  ;;  %3964 = vmatprep.subr.bf16.mxu0 %v9935_v35 }
 0x7e2   :  { %4004 = vmatpush1.bf16.msra.mxu1 %v9911_v32  ;;  %3965 = vmatpush1.bf16.msra.mxu0 %v9947_v21 }
 0x7e3   :  { %4005 = vmatprep.subr.bf16.mxu1 %v9930_v34  ;;  %4298 = vmatprep.subr.bf16.mxu0 %v9747_v56 }
 0x7e6   :  { %4006 = vmatpush1.bf16.msra.mxu1 %v9940_v36 }
 0x7e7   :  { %4007 = vmatprep.subr.bf16.mxu1 %v9959_v38 }
 0x7ea   :  { %4008 = vmatpush1.bf16.msra.mxu1 %v9954_v37 }
 0x7eb   :  { %4341 = vmatprep.subr.bf16.mxu1 %v9787_v25 }
 0x85a   :  { %v3124_v7 = vpop.f32.mrb[44].mxu0  ;;  %v3167_v16 = vpop.f32.mrb[76].mxu1 }
 0x85b   :  { %v3176_v19 = vadd.f32 %v3124_v7, %v2890_v41  ;;  %v3178_v52 = vadd.f32 %v3167_v16, %v2892_v43  ;;  %v3126_v9 = vpop.f32.mrb[45].mxu0  ;;  %v3169_v6 = vpop.f32.mrb[77].mxu1 }
 0x85c   :  { %v3177_v30 = vadd.f32 %v3126_v9, %v2891_v63  ;;  %v3179_v59 = vadd.f32 %v3169_v6, %v2893_v5  ;;  %v3128_v51 = vpop.f32.mrb[46].mxu0  ;;  %v3171_v14 = vpop.f32.mrb[78].mxu1 }
 0x85d   :  { %v7212_v13 = vmul.f32 -1.442695, %v3176_v19  ;;  %v3180_v8 = vadd.f32 %v3128_v51, %v2894_v53  ;;  %v3182_v17 = vadd.f32 %v3171_v14, %v2896_v29  ;;  %v3130_v11 = vpop.f32.mrb[47].mxu0  ;;  %v3173_v39 = vpop.f32.mrb[79].mxu1 }
 0x85e   :  { %v7214_v56 = vmul.f32 -1.442695, %v3177_v30  ;;  %v3181_v57 = vadd.f32 %v3130_v11, %v2895_v50  ;;  %v3183_v44 = vadd.f32 %v3173_v39, %v2897_v27  ;;  %v7216_v42 = vmul.f32 -1.442695, %v3179_v59 }
 0x85f   :  { %8196 = vpow2.f32 %v7212_v13  ;;  %v7213_v40 = vmul.f32 -1.442695, %v3180_v8  ;;  %v11016_v13 = vld [vmem:[#allocation4_spill] sm:$0xff] }
 0x860   :  { %8198 = vpow2.f32 %v7214_v56  ;;  %v7215_v41 = vmul.f32 -1.442695, %v3181_v57  ;;  %v7217_v49 = vmul.f32 -1.442695, %v3183_v44  ;;  %v11017_v8 = vsub.s32 0, %v11016_v13 }
 0x861   :  { %8200 = vpow2.f32 %v7213_v40  ;;  %v11018_v39 = vsub.s32 2, %v11016_v13  ;;  %v11019_v57 = vsub.s32 1, %v11016_v13 }
 0x862   :  { %8202 = vpow2.f32 %v7215_v41 }
 0x863   :  { %8204 = vtanh.f32 %v3178_v52  ;;  %v3274_v52 = vld [vmem:[%s10922_s6] sm:$0xf] }
 0x864   :  { %8206 = vpow2.f32 %v7216_v42  ;;  %v9984_v56 = vrot.slane %v3274_v52, %v11018_v39  ;;  %v9988_v44 = vrot.slane %v3274_v52, %v11019_v57 }
 0x865   :  { %8208 = vtanh.f32 %v3182_v17  ;;  %v9980_v17 = vrot.slane %v3274_v52, %v11017_v8 }
 0x869   :  { %v8197_v43 = vpop.eup %8196 }
 0x86a   :  { %v8199_v7 = vpop.eup %8198  ;;  %v3190_v16 = vadd.f32 1.0, %v8197_v43  ;;  %v11020_v43 = vsub.s32 3, %v11016_v13 }
 0x86b   :  { %v3202_v63 = vadd.f32 1.0, %v8199_v7  ;;  %v8201_v0 = vpop.eup %8200 }
 0x86c   :  { %8210 = vrcp.f32 %v3190_v16  ;;  %v3191_v5 = vadd.f32 1.0, %v8201_v0  ;;  %v8203_v19 = vpop.eup %8202  ;;  %v9992_v7 = vrot.slane %v3274_v52, %v11020_v43 }
 0x86d   :  { %8212 = vrcp.f32 %v3202_v63  ;;  %v3203_v9 = vadd.f32 1.0, %v8203_v19  ;;  %v8205_v6 = vpop.eup %8204 }
 0x86e   :  { %8214 = vpow2.f32 %v7217_v49  ;;  %v8207_v53 = vpop.eup %8206 }
 0x86f   :  { %8216 = vrcp.f32 %v3191_v5  ;;  %v8209_v29 = vpop.eup %8208  ;;  %v3216_v14 = vadd.f32 1.0, %v8207_v53 }
 0x870   :  { %8218 = vrcp.f32 %v3203_v9 }
 0x871   :  { %8220 = vrcp.f32 %v3216_v14 }
 0x876   :  { %v8211_v30 = vpop.eup %8210 }
 0x877   :  { %v8213_v59 = vpop.eup %8212  ;;  %v3224_v51 = vmul.f32 %v8211_v30, %v8205_v6 }
 0x878   :  { %v8215_v50 = vpop.eup %8214  ;;  %v3222_v27 = vmul.f32 %v8213_v59, %v9641_v23 }
 0x879   :  { %v8217_v11 = vpop.eup %8216  ;;  %v3217_v49 = vadd.f32 1.0, %v8215_v50 }
 0x87a   :  { %v3225_v40 = vmul.f32 %v8217_v11, %v8209_v29  ;;  %v3490_v41 = vpop.f32.mrb[48].mxu0  ;;  %v3603_v42 = vpop.f32.mrb[80].mxu1  ;;  %v3226_v23 = vadd.f32 %v3224_v51, %v3222_v27 }
 0x87b   :  { %v8219_v16 = vpop.eup %8218  ;;  %v3492_v63 = vpop.f32.mrb[49].mxu0  ;;  %v3491_v19 = vadd.f32 %v3490_v41, %v9980_v17  ;;  %v3604_v53 = vadd.f32 %v3603_v42, %v9984_v56 }
 0x87c   :  { %v3605_v0 = vpop.f32.mrb[81].mxu1  ;;  %v3223_v5 = vmul.f32 %v8219_v16, %v9645_v22  ;;  %v3494_v9 = vpop.f32.mrb[50].mxu0  ;;  %8222 = vtanh.f32 %v3226_v23  ;;  %v3493_v29 = vadd.f32 %v3492_v63, %v9988_v44 }
 0x87d   :  { %v3607_v6 = vpop.f32.mrb[82].mxu1  ;;  %v3495_v52 = vadd.f32 %v3494_v9, %v9980_v17  ;;  %v3496_v59 = vpop.f32.mrb[51].mxu0  ;;  %v3606_v14 = vadd.f32 %v3605_v0, %v9992_v7  ;;  %8224 = vrcp.f32 %v3217_v49 }
 0x87e   :  { %v3608_v30 = vadd.f32 %v3607_v6, %v9984_v56  ;;  %v3609_v51 = vpop.f32.mrb[83].mxu1  ;;  %v3497_v50 = vadd.f32 %v3496_v59, %v9988_v44  ;;  %v3227_v27 = vadd.f32 %v3225_v40, %v3223_v5  ;;  %v8221_v63 = vpop.eup %8220 }
 0x87f   :  { %v3610_v22 = vadd.f32 %v3609_v51, %v9992_v7  ;;  %v10003_v13 = vpack.c.bf16 %v3495_v52, %v3491_v19 }
 0x880   :  { %v10005_v8 = vpack.c.bf16 %v3608_v30, %v3604_v53  ;;  %v10007_v11 = vpack.c.bf16 %v3497_v50, %v3493_v29  ;;  %8226 = vtanh.f32 %v3227_v27 }
 0x881   :  { %v10009_v39 = vpack.c.bf16 %v3610_v22, %v3606_v14 }
 0x882   :  { %v3500_v57 = vpop.f32.mrb[52].mxu0  ;;  %v3613_v41 = vpop.f32.mrb[84].mxu1 }
 0x883   :  { %11021 = vst [vmem:[#allocation13_spill] sm:$0xff] %v10009_v39  ;;  %v3502_v42 = vpop.f32.mrb[53].mxu0  ;;  %v3615_v43 = vpop.f32.mrb[85].mxu1  ;;  %v3501_v0 = vadd.f32 %v3500_v57, %v9980_v17  ;;  %v3614_v40 = vadd.f32 %v3613_v41, %v9984_v56 }
 0x884   :  { %v3504_v23 = vpop.f32.mrb[54].mxu0  ;;  %v3617_v16 = vpop.f32.mrb[86].mxu1  ;;  %v3503_v53 = vadd.f32 %v3502_v42, %v9988_v44  ;;  %v3616_v29 = vadd.f32 %v3615_v43, %v9992_v7 }
 0x885   :  { %v3505_v49 = vadd.f32 %v3504_v23, %v9980_v17  ;;  %v3618_v5 = vadd.f32 %v3617_v16, %v9984_v56  ;;  %v3506_v19 = vpop.f32.mrb[55].mxu0  ;;  %v3619_v9 = vpop.f32.mrb[87].mxu1 }
 0x886   :  { %v8223_v6 = vpop.eup %8222  ;;  %v3507_v52 = vadd.f32 %v3506_v19, %v9988_v44  ;;  %v3620_v30 = vadd.f32 %v3619_v9, %v9992_v7 }
 0x887   :  { %v10019_v59 = vpack.c.bf16 %v3505_v49, %v3501_v0  ;;  %v10021_v51 = vpack.c.bf16 %v3618_v5, %v3614_v40  ;;  %v3230_v14 = vmul.f32 %v8223_v6, %v8221_v63  ;;  %v8225_v27 = vpop.eup %8224 }
 0x888   :  { %v10023_v50 = vpack.c.bf16 %v3507_v52, %v3503_v53  ;;  %v10025_v22 = vpack.c.bf16 %v3620_v30, %v3616_v29 }
 0x88a   :  { %v8227_v57 = vpop.eup %8226  ;;  %v3510_v41 = vpop.f32.mrb[56].mxu0 }
 0x88b   :  { %v3623_v23 = vpop.f32.mrb[88].mxu1  ;;  %v3512_v42 = vpop.f32.mrb[57].mxu0  ;;  %v3231_v43 = vmul.f32 %v8227_v57, %v8225_v27  ;;  %v3511_v19 = vadd.f32 %v3510_v41, %v9980_v17 }
 0x88c   :  { %v3625_v16 = vpop.f32.mrb[89].mxu1  ;;  %v3514_v39 = vpop.f32.mrb[58].mxu0  ;;  %v3624_v0 = vadd.f32 %v3623_v23, %v9984_v56  ;;  %v3513_v53 = vadd.f32 %v3512_v42, %v9988_v44 }
 0x88d   :  { %v3627_v9 = vpop.f32.mrb[90].mxu1  ;;  %v3515_v40 = vadd.f32 %v3514_v39, %v9980_v17  ;;  %v3516_v49 = vpop.f32.mrb[59].mxu0  ;;  %v3232_v6 = vpack.c.bf16 %v3231_v43, %v3230_v14  ;;  %v3626_v29 = vadd.f32 %v3625_v16, %v9992_v7 }
 0x88e   :  { %v3628_v63 = vadd.f32 %v3627_v9, %v9984_v56  ;;  %v3629_v5 = vpop.f32.mrb[91].mxu1  ;;  %v3517_v52 = vadd.f32 %v3516_v49, %v9988_v44 }
 0x88f   :  { %v3630_v30 = vadd.f32 %v3629_v5, %v9992_v7  ;;  %v10035_v27 = vpack.c.bf16 %v3515_v40, %v3511_v19  ;;  %3559 = vmatmul.mubr.bf16.gmra.mrb[76].mxu0 %v3232_v6  ;;  %3672 = vmatmul.mubr.bf16.gmra.mrb[108].mxu1 %v3232_v6 }
 0x890   :  { %v10037_v57 = vpack.c.bf16 %v3628_v63, %v3624_v0  ;;  %v10039_v39 = vpack.c.bf16 %v3517_v52, %v3513_v53  ;;  %3982 = vmatprep.mubr.bf16.mxu0 %v10995_v18  ;;  %4025 = vmatprep.mubr.bf16.mxu1 %v10995_v18 }
 0x891   :  { %v10041_v41 = vpack.c.bf16 %v3630_v30, %v3626_v29 }
 0x892   :  { %v3520_v14 = vpop.f32.mrb[60].mxu0  ;;  %v3633_v23 = vpop.f32.mrb[92].mxu1 }
 0x893   :  { %11022 = vst [vmem:[#allocation5_spill] sm:$0xff] %v10041_v41  ;;  %v3522_v42 = vpop.f32.mrb[61].mxu0  ;;  %v3635_v16 = vpop.f32.mrb[93].mxu1  ;;  %v3521_v19 = vadd.f32 %v3520_v14, %v9980_v17  ;;  %v3634_v0 = vadd.f32 %v3633_v23, %v9984_v56 }
 0x894   :  { %v3524_v43 = vpop.f32.mrb[62].mxu0  ;;  %v3637_v9 = vpop.f32.mrb[94].mxu1  ;;  %v3523_v6 = vadd.f32 %v3522_v42, %v9988_v44  ;;  %v3636_v53 = vadd.f32 %v3635_v16, %v9992_v7 }
 0x895   :  { %v3525_v40 = vadd.f32 %v3524_v43, %v9980_v17  ;;  %v3638_v63 = vadd.f32 %v3637_v9, %v9984_v56  ;;  %v3526_v49 = vpop.f32.mrb[63].mxu0  ;;  %v3639_v5 = vpop.f32.mrb[95].mxu1 }
 0x896   :  { %v3527_v29 = vadd.f32 %v3526_v49, %v9988_v44  ;;  %v3640_v52 = vadd.f32 %v3639_v5, %v9992_v7 }
 0x897   :  { %v10053_v30 = vpack.c.bf16 %v3525_v40, %v3521_v19  ;;  %v10055_v41 = vpack.c.bf16 %v3638_v63, %v3634_v0  ;;  %3983 = vmatmul.mubr.bf16.vlgmr.msra.gmra.mrb[80].mxu0 %v10995_v18  ;;  %4026 = vmatmul.mubr.bf16.vlgmr.msra.gmra.mrb[112].mxu1 %v10995_v18 }
 0x898   :  { %v10059_v14 = vpack.c.bf16 %v3527_v29, %v3523_v6  ;;  %v10061_v23 = vpack.c.bf16 %v3640_v52, %v3636_v53  ;;  %4299 = vmatpush1.bf16.msra.mxu0 %v9752_v62  ;;  %4342 = vmatpush1.bf16.msra.mxu1 %v9792_v60 }
 0x899   :  { %11023 = vst [vmem:[#allocation14_spill] sm:$0xff] %v10055_v41  ;;  %4300 = vmatprep.subr.bf16.mxu0 %v9799_v3  ;;  %4343 = vmatprep.subr.bf16.mxu1 %v9804_v46 }
 0x89a   :  { %11024 = vst [vmem:[#allocation6_spill] sm:$0xff] %v10059_v14  ;;  %11025 = vst [vmem:[#allocation15_spill] sm:$0xff] %v10061_v23  ;;  %v3530_v42 = vpop.f32.mrb[64].mxu0  ;;  %v3643_v16 = vpop.f32.mrb[96].mxu1  ;;  %4330 = vmatprep.mubr.bf16.mxu0 %v10995_v18  ;;  %4373 = vmatprep.mubr.bf16.mxu1 %v10995_v18 }
 0x89b   :  { %v3532_v43 = vpop.f32.mrb[65].mxu0  ;;  %v3645_v9 = vpop.f32.mrb[97].mxu1  ;;  %v3531_v19 = vadd.f32 %v3530_v42, %v9980_v17  ;;  %v3644_v62 = vadd.f32 %v3643_v16, %v9984_v56 }
 0x89c   :  { %v3534_v0 = vpop.f32.mrb[66].mxu0  ;;  %v3647_v40 = vpop.f32.mrb[98].mxu1  ;;  %4301 = vmatpush1.bf16.msra.mxu0 %v9809_v47  ;;  %4344 = vmatpush1.bf16.msra.mxu1 %v9820_v45  ;;  %v3533_v53 = vadd.f32 %v3532_v43, %v9988_v44  ;;  %v3646_v29 = vadd.f32 %v3645_v9, %v9992_v7 }
 0x89d   :  { %v3535_v63 = vadd.f32 %v3534_v0, %v9980_v17  ;;  %v3648_v49 = vadd.f32 %v3647_v40, %v9984_v56  ;;  %v3536_v5 = vpop.f32.mrb[67].mxu0  ;;  %v3649_v6 = vpop.f32.mrb[99].mxu1  ;;  %4302 = vmatprep.subr.bf16.mxu0 %v9814_v54  ;;  %4345 = vmatprep.subr.bf16.mxu1 %v9832_v15 }
 0x89e   :  { %v3537_v52 = vadd.f32 %v3536_v5, %v9988_v44  ;;  %v3650_v42 = vadd.f32 %v3649_v6, %v9992_v7 }
 0x89f   :  { %v10081_v23 = vpack.c.bf16 %v3535_v63, %v3531_v19  ;;  %v10083_v16 = vpack.c.bf16 %v3648_v49, %v3644_v62 }
 0x8a0   :  { %v10085_v0 = vpack.c.bf16 %v3537_v52, %v3533_v53  ;;  %v10087_v40 = vpack.c.bf16 %v3650_v42, %v3646_v29  ;;  %4303 = vmatpush1.bf16.msra.mxu0 %v9827_v58  ;;  %4346 = vmatpush1.bf16.msra.mxu1 %v9844_v48 }
 0x8a1   :  { %11026 = vst [vmem:[#allocation7_spill] sm:$0xff] %v10081_v23  ;;  %11027 = vst [vmem:[#allocation16_spill] sm:$0xff] %v10083_v16  ;;  %4304 = vmatprep.subr.bf16.mxu0 %v9838_v10  ;;  %4347 = vmatprep.subr.bf16.mxu1 %v9850_v1 }
 0x8a2   :  { %11028 = vst [vmem:[#allocation8_spill] sm:$0xff] %v10085_v0  ;;  %11029 = vst [vmem:[#allocation17_spill] sm:$0xff] %v10087_v40  ;;  %v3540_v43 = vpop.f32.mrb[68].mxu0  ;;  %v3653_v9 = vpop.f32.mrb[100].mxu1 }
 0x8a3   :  { %v3542_v5 = vpop.f32.mrb[69].mxu0  ;;  %v3655_v6 = vpop.f32.mrb[101].mxu1  ;;  %v3541_v19 = vadd.f32 %v3540_v43, %v9980_v17  ;;  %v3654_v49 = vadd.f32 %v3653_v9, %v9984_v56 }
 0x8a4   :  { %v3544_v62 = vpop.f32.mrb[70].mxu0  ;;  %v3657_v63 = vpop.f32.mrb[102].mxu1  ;;  %4305 = vmatpush1.bf16.msra.mxu0 %v9856_v12  ;;  %4348 = vmatpush1.bf16.msra.mxu1 %v9868_v55  ;;  %v3543_v43 = vadd.f32 %v3542_v5, %v9988_v44  ;;  %v3656_v40 = vadd.f32 %v3655_v6, %v9992_v7 }
 0x8a5   :  { %v3545_v53 = vadd.f32 %v3544_v62, %v9980_v17  ;;  %v3658_v29 = vadd.f32 %v3657_v63, %v9984_v56  ;;  %v3546_v52 = vpop.f32.mrb[71].mxu0  ;;  %v3659_v42 = vpop.f32.mrb[103].mxu1  ;;  %4306 = vmatprep.subr.bf16.mxu0 %v9862_v28  ;;  %4349 = vmatprep.subr.bf16.mxu1 %v9887_v20 }
 0x8a6   :  { %v3547_v0 = vadd.f32 %v3546_v52, %v9988_v44  ;;  %v3660_v16 = vadd.f32 %v3659_v42, %v9992_v7 }
 0x8a7   :  { %v10105_v23 = vpack.c.bf16 %v3545_v53, %v3541_v19  ;;  %v10107_v9 = vpack.c.bf16 %v3658_v29, %v3654_v49 }
 0x8a8   :  { %v10109_v62 = vpack.c.bf16 %v3547_v0, %v3543_v43  ;;  %v10111_v63 = vpack.c.bf16 %v3660_v16, %v3656_v40  ;;  %4307 = vmatpush1.bf16.msra.mxu0 %v9875_v24  ;;  %4350 = vmatpush1.bf16.msra.mxu1 %v9892_v61 }
 0x8a9   :  { %11030 = vst [vmem:[#allocation9_spill] sm:$0xff] %v10105_v23  ;;  %11031 = vst [vmem:[#allocation18_spill] sm:$0xff] %v10107_v9  ;;  %4308 = vmatprep.subr.bf16.mxu0 %v9881_v26  ;;  %4351 = vmatprep.subr.bf16.mxu1 %v9916_v2 }
 0x8aa   :  { %11032 = vst [vmem:[#allocation10_spill] sm:$0xff] %v10109_v62  ;;  %11033 = vst [vmem:[#allocation19_spill] sm:$0xff] %v10111_v63  ;;  %v3550_v5 = vpop.f32.mrb[72].mxu0  ;;  %v3663_v6 = vpop.f32.mrb[104].mxu1 }
 0x8ab   :  { %v3552_v52 = vpop.f32.mrb[73].mxu0  ;;  %v3665_v42 = vpop.f32.mrb[105].mxu1  ;;  %v3551_v19 = vadd.f32 %v3550_v5, %v9980_v17  ;;  %v3664_v16 = vadd.f32 %v3663_v6, %v9984_v56 }
 0x8ac   :  { %v3554_v49 = vpop.f32.mrb[74].mxu0  ;;  %v3667_v53 = vpop.f32.mrb[106].mxu1  ;;  %4309 = vmatpush1.bf16.msra.mxu0 %v9899_v4  ;;  %4352 = vmatpush1.bf16.msra.mxu1 %v9911_v32  ;;  %v3553_v5 = vadd.f32 %v3552_v52, %v9988_v44  ;;  %v3666_v63 = vadd.f32 %v3665_v42, %v9992_v7 }
 0x8ad   :  { %v3555_v0 = vadd.f32 %v3554_v49, %v9980_v17  ;;  %v3668_v40 = vadd.f32 %v3667_v53, %v9984_v56  ;;  %v3556_v29 = vpop.f32.mrb[75].mxu0  ;;  %v3669_v43 = vpop.f32.mrb[107].mxu1  ;;  %4310 = vmatprep.subr.bf16.mxu0 %v9905_v31  ;;  %4353 = vmatprep.subr.bf16.mxu1 %v9930_v34 }
 0x8ae   :  { %v3557_v62 = vadd.f32 %v3556_v29, %v9988_v44  ;;  %v3670_v9 = vadd.f32 %v3669_v43, %v9992_v7 }
 0x8af   :  { %v10129_v23 = vpack.c.bf16 %v3555_v0, %v3551_v19  ;;  %v10131_v6 = vpack.c.bf16 %v3668_v40, %v3664_v16 }
 0x8b0   :  { %v10133_v49 = vpack.c.bf16 %v3557_v62, %v3553_v5  ;;  %v10135_v53 = vpack.c.bf16 %v3670_v9, %v3666_v63  ;;  %4311 = vmatpush1.bf16.msra.mxu0 %v9923_v33  ;;  %4354 = vmatpush1.bf16.msra.mxu1 %v9940_v36 }
 0x8b1   :  { %11034 = vst [vmem:[#allocation22_spill] sm:$0xff] %v10129_v23  ;;  %11035 = vst [vmem:[#allocation23_spill] sm:$0xff] %v10131_v6  ;;  %4312 = vmatprep.subr.bf16.mxu0 %v9935_v35  ;;  %4355 = vmatprep.subr.bf16.mxu1 %v9959_v38 }
 0x8b2   :  { %11036 = vst [vmem:[#allocation11_spill] sm:$0xff] %v10133_v49  ;;  %11037 = vst [vmem:[#allocation20_spill] sm:$0xff] %v10135_v53 }
 0x8b4   :  { %4313 = vmatpush1.bf16.msra.mxu0 %v9947_v21  ;;  %4356 = vmatpush1.bf16.msra.mxu1 %v9954_v37 }
 0x8b5   :  { %4689 = vmatprep.subr.bf16.mxu1 %v9787_v25 }
 0x962   :  { %v3560_v52 = vpop.f32.mrb[76].mxu0  ;;  %v3673_v42 = vpop.f32.mrb[108].mxu1 }
 0x963   :  { %v3562_v62 = vpop.f32.mrb[77].mxu0  ;;  %v3675_v19 = vpop.f32.mrb[109].mxu1  ;;  %v3561_v16 = vadd.f32 %v3560_v52, %v9980_v17  ;;  %v3674_v0 = vadd.f32 %v3673_v42, %v9984_v56 }
 0x964   :  { %v3564_v9 = vpop.f32.mrb[78].mxu0  ;;  %v3677_v63 = vpop.f32.mrb[110].mxu1  ;;  %v3563_v53 = vadd.f32 %v3562_v62, %v9988_v44  ;;  %v3676_v25 = vadd.f32 %v3675_v19, %v9992_v7  ;;  %v3751_v19 = vunpack.c.l.bf16 %v10007_v11 }
 0x965   :  { %v3565_v40 = vadd.f32 %v3564_v9, %v9980_v17  ;;  %v3678_v29 = vadd.f32 %v3677_v63, %v9984_v56  ;;  %v3566_v43 = vpop.f32.mrb[79].mxu0  ;;  %v3679_v5 = vpop.f32.mrb[111].mxu1  ;;  %v3750_v17 = vunpack.c.l.bf16 %v10003_v13  ;;  %v3752_v56 = vunpack.c.l.bf16 %v10005_v8  ;;  %v11042_v63 = vld [vmem:[#allocation13_spill] sm:$0xff] }
 0x966   :  { %v3567_v49 = vadd.f32 %v3566_v43, %v9988_v44  ;;  %v3680_v6 = vadd.f32 %v3679_v5, %v9992_v7  ;;  %v3753_v44 = vunpack.c.l.bf16 %v11042_v63 }
 0x967   :  { %v10152_v23 = vpack.c.bf16 %v3565_v40, %v3561_v16  ;;  %v10154_v14 = vpack.c.bf16 %v3678_v29, %v3674_v0  ;;  %v3754_v0 = vunpack.c.h.bf16 %v10003_v13 }
 0x968   :  { %v10156_v52 = vpack.c.bf16 %v3567_v49, %v3563_v53  ;;  %v10158_v42 = vpack.c.bf16 %v3680_v6, %v3676_v25  ;;  %v3756_v49 = vunpack.c.h.bf16 %v10005_v8  ;;  %v3755_v25 = vunpack.c.h.bf16 %v10007_v11 }
 0x969   :  { %11038 = vst [vmem:[#allocation12_spill] sm:$0xff] %v10152_v23  ;;  %11039 = vst [vmem:[#allocation21_spill] sm:$0xff] %v10154_v14 }
 0x96a   :  { %11040 = vst [vmem:[#allocation4_spill] sm:$0xff] %v10156_v52  ;;  %11041 = vst [vmem:[#allocation24_spill] sm:$0xff] %v10158_v42  ;;  %v3984_v9 = vpop.f32.mrb[80].mxu0  ;;  %v4027_v62 = vpop.f32.mrb[112].mxu1  ;;  %v3757_v42 = vunpack.c.h.bf16 %v11042_v63 }
 0x96b   :  { %v4036_v43 = vadd.f32 %v3984_v9, %v3750_v17  ;;  %v4038_v7 = vadd.f32 %v4027_v62, %v3752_v56  ;;  %v3986_v16 = vpop.f32.mrb[81].mxu0  ;;  %v4029_v40 = vpop.f32.mrb[113].mxu1 }
 0x96c   :  { %v4037_v6 = vadd.f32 %v3986_v16, %v3751_v19  ;;  %v4039_v53 = vadd.f32 %v4029_v40, %v3753_v44  ;;  %v3988_v29 = vpop.f32.mrb[82].mxu0  ;;  %v4031_v5 = vpop.f32.mrb[114].mxu1 }
 0x96d   :  { %v7282_v52 = vmul.f32 -1.442695, %v4036_v43  ;;  %v4040_v14 = vadd.f32 %v3988_v29, %v3754_v0  ;;  %v4042_v23 = vadd.f32 %v4031_v5, %v3756_v49  ;;  %v3990_v41 = vpop.f32.mrb[83].mxu0  ;;  %v4033_v17 = vpop.f32.mrb[115].mxu1 }
 0x96e   :  { %v7284_v56 = vmul.f32 -1.442695, %v4037_v6  ;;  %v4041_v9 = vadd.f32 %v3990_v41, %v3755_v25  ;;  %v4043_v62 = vadd.f32 %v4033_v17, %v3757_v42  ;;  %v7286_v19 = vmul.f32 -1.442695, %v4039_v53 }
 0x96f   :  { %8228 = vpow2.f32 %v7282_v52  ;;  %v7283_v13 = vmul.f32 -1.442695, %v4040_v14 }
 0x970   :  { %8230 = vpow2.f32 %v7284_v56  ;;  %v7285_v8 = vmul.f32 -1.442695, %v4041_v9  ;;  %v7287_v63 = vmul.f32 -1.442695, %v4043_v62 }
 0x971   :  { %8232 = vpow2.f32 %v7283_v13 }
 0x972   :  { %8234 = vpow2.f32 %v7285_v8 }
 0x973   :  { %8236 = vtanh.f32 %v4038_v7 }
 0x974   :  { %8238 = vpow2.f32 %v7286_v19 }
 0x975   :  { %8240 = vtanh.f32 %v4042_v23 }
 0x979   :  { %v8229_v44 = vpop.eup %8228 }
 0x97a   :  { %v8231_v11 = vpop.eup %8230  ;;  %v4050_v16 = vadd.f32 1.0, %v8229_v44 }
 0x97b   :  { %v4062_v43 = vadd.f32 1.0, %v8231_v11  ;;  %v8233_v40 = vpop.eup %8232 }
 0x97c   :  { %8242 = vrcp.f32 %v4050_v16  ;;  %v4051_v41 = vadd.f32 1.0, %v8233_v40  ;;  %v8235_v42 = vpop.eup %8234 }
 0x97d   :  { %8244 = vrcp.f32 %v4062_v43  ;;  %v4063_v14 = vadd.f32 1.0, %v8235_v42  ;;  %v8237_v52 = vpop.eup %8236 }
 0x97e   :  { %8246 = vpow2.f32 %v7287_v63  ;;  %v8239_v0 = vpop.eup %8238 }
 0x97f   :  { %8248 = vrcp.f32 %v4051_v41  ;;  %v8241_v49 = vpop.eup %8240  ;;  %v4076_v17 = vadd.f32 1.0, %v8239_v0 }
 0x980   :  { %8250 = vrcp.f32 %v4063_v14 }
 0x981   :  { %8252 = vrcp.f32 %v4076_v17 }
 0x986   :  { %v8243_v6 = vpop.eup %8242 }
 0x987   :  { %v8245_v7 = vpop.eup %8244  ;;  %v4084_v53 = vmul.f32 %v8243_v6, %v8237_v52 }
 0x988   :  { %v8247_v29 = vpop.eup %8246  ;;  %v4082_v5 = vmul.f32 0.0, %v8245_v7 }
 0x989   :  { %v8249_v25 = vpop.eup %8248  ;;  %v4077_v62 = vadd.f32 1.0, %v8247_v29 }
 0x98a   :  { %v10168_v23 = vadd.f32 %v4084_v53, %v4082_v5  ;;  %v4085_v56 = vmul.f32 %v8249_v25, %v8241_v49  ;;  %v8251_v9 = vpop.eup %8250 }
 0x98b   :  { %v4083_v13 = vmul.f32 0.0, %v8251_v9  ;;  %v8253_v19 = vpop.eup %8252 }
 0x98c   :  { %8254 = vtanh.f32 %v10168_v23 }
 0x98d   :  { %v10171_v8 = vadd.f32 %v4085_v56, %v4083_v13  ;;  %8256 = vrcp.f32 %v4077_v62 }
 0x98f   :  { %8258 = vtanh.f32 %v10171_v8 }
 0x996   :  { %v8255_v44 = vpop.eup %8254 }
 0x997   :  { %v8257_v11 = vpop.eup %8256  ;;  %v4090_v63 = vmul.f32 %v8255_v44, %v8253_v19 }
 0x999   :  { %v8259_v16 = vpop.eup %8258 }
 0x99a   :  { %v4091_v43 = vmul.f32 %v8259_v16, %v8257_v11 }
 0x99c   :  { %v10174_v40 = vpack.c.bf16 %v4091_v43, %v4090_v63 }
 0x99e   :  { %4331 = vmatmul.mubr.bf16.vlgmr.msra.gmra.mrb[84].mxu0 %v10174_v40  ;;  %4374 = vmatmul.mubr.bf16.vlgmr.msra.gmra.mrb[116].mxu1 %v10174_v40 }
 0x99f   :  { %4690 = vmatpush1.bf16.msra.mxu1 %v9792_v60  ;;  %4678 = vmatprep.mubr.bf16.mxu0 %v10995_v18  ;;  %v10198_v60 = vld [vmem:[%s10921_s5 + $0x4] ss:$16 sps:$4 sm:$0xff]  }
 0x9a0   :  { %4691 = vmatprep.subr.bf16.mxu1 %v9804_v46  ;;  %4721 = vmatprep.mubr.bf16.mxu1 %v10995_v18  ;;  %v10203_v46 = vld [vmem:[%s10921_s5] ss:$16 sps:$4 sm:$0xff]  }
 0x9a1   :  { %4646 = vmatprep.subr.bf16.mxu0 %v10198_v60 }
 0x9a2   :  { %4647 = vmatpush1.bf16.msra.mxu0 %v10203_v46 }
 0x9a3   :  { %4692 = vmatpush1.bf16.msra.mxu1 %v9820_v45  ;;  %4648 = vmatprep.subr.bf16.mxu0 %v9799_v3  ;;  %v4098_v3 = vunpack.c.l.bf16 %v10019_v59 }
 0x9a4   :  { %4693 = vmatprep.subr.bf16.mxu1 %v9832_v15  ;;  %v4101_v15 = vunpack.c.l.bf16 %v10025_v22 }
 0x9a6   :  { %4649 = vmatpush1.bf16.msra.mxu0 %v9809_v47  ;;  %v4100_v47 = vunpack.c.l.bf16 %v10021_v51 }
 0x9a7   :  { %4694 = vmatpush1.bf16.msra.mxu1 %v9844_v48  ;;  %4650 = vmatprep.subr.bf16.mxu0 %v9814_v54 }
 0x9a8   :  { %4695 = vmatprep.subr.bf16.mxu1 %v9850_v1 }
 0x9aa   :  { %4651 = vmatpush1.bf16.msra.mxu0 %v9827_v58  ;;  %v4099_v58 = vunpack.c.l.bf16 %v10023_v50 }
 0x9ab   :  { %4696 = vmatpush1.bf16.msra.mxu1 %v9868_v55  ;;  %4652 = vmatprep.subr.bf16.mxu0 %v9838_v10  ;;  %v4104_v55 = vunpack.c.h.bf16 %v10021_v51 }
 0x9ac   :  { %4697 = vmatprep.subr.bf16.mxu1 %v9887_v20 }
 0x9ae   :  { %4653 = vmatpush1.bf16.msra.mxu0 %v9856_v12 }
 0x9af   :  { %4698 = vmatpush1.bf16.msra.mxu1 %v9892_v61  ;;  %4654 = vmatprep.subr.bf16.mxu0 %v9862_v28  ;;  %v4102_v28 = vunpack.c.h.bf16 %v10019_v59 }
 0x9b0   :  { %4699 = vmatprep.subr.bf16.mxu1 %v9916_v2 }
 0x9b2   :  { %4655 = vmatpush1.bf16.msra.mxu0 %v9875_v24 }
 0x9b3   :  { %4700 = vmatpush1.bf16.msra.mxu1 %v9911_v32  ;;  %4656 = vmatprep.subr.bf16.mxu0 %v9881_v26 }
 0x9b4   :  { %4701 = vmatprep.subr.bf16.mxu1 %v9930_v34 }
 0x9b6   :  { %4657 = vmatpush1.bf16.msra.mxu0 %v9899_v4  ;;  %v4103_v4 = vunpack.c.h.bf16 %v10023_v50 }
 0x9b7   :  { %4702 = vmatpush1.bf16.msra.mxu1 %v9940_v36  ;;  %4658 = vmatprep.subr.bf16.mxu0 %v9905_v31  ;;  %v4105_v31 = vunpack.c.h.bf16 %v10025_v22 }
 0x9b8   :  { %4703 = vmatprep.subr.bf16.mxu1 %v9959_v38 }
 0x9ba   :  { %4659 = vmatpush1.bf16.msra.mxu0 %v9923_v33 }
 0x9bb   :  { %4704 = vmatpush1.bf16.msra.mxu1 %v9954_v37  ;;  %4660 = vmatprep.subr.bf16.mxu0 %v9935_v35 }
 0x9be   :  { %4661 = vmatpush1.bf16.msra.mxu0 %v9947_v21 }
 0x9bf   :  { %4994 = vmatprep.subr.bf16.mxu0 %v10198_v60 }
 0xa71   :  { %v4332_v54 = vpop.f32.mrb[84].mxu0  ;;  %v4375_v45 = vpop.f32.mrb[116].mxu1 }
 0xa72   :  { %v4384_v10 = vadd.f32 %v4332_v54, %v4098_v3  ;;  %v4386_v48 = vadd.f32 %v4375_v45, %v4100_v47  ;;  %v4334_v1 = vpop.f32.mrb[85].mxu0  ;;  %v4377_v12 = vpop.f32.mrb[117].mxu1 }
 0xa73   :  { %v4385_v24 = vadd.f32 %v4334_v1, %v4099_v58  ;;  %v4387_v26 = vadd.f32 %v4377_v12, %v4101_v15  ;;  %v4336_v20 = vpop.f32.mrb[86].mxu0  ;;  %v4379_v61 = vpop.f32.mrb[118].mxu1  ;;  %v10265_v1 = vld [vmem:[%s10921_s5 + $0x2c] ss:$16 sps:$4 sm:$0xff]   ;;  %v10270_v12 = vld [vmem:[%s10921_s5 + $0x20] ss:$16 sps:$4 sm:$0xff]  }
 0xa74   :  { %v7320_v32 = vmul.f32 -1.442695, %v4384_v10  ;;  %v4388_v2 = vadd.f32 %v4336_v20, %v4102_v28  ;;  %v4390_v33 = vadd.f32 %v4379_v61, %v4104_v55  ;;  %v4338_v34 = vpop.f32.mrb[87].mxu0  ;;  %v4381_v35 = vpop.f32.mrb[119].mxu1  ;;  %v10253_v10 = vld [vmem:[%s10921_s5 + $0x8] ss:$16 sps:$4 sm:$0xff]  }
 0xa75   :  { %v7322_v36 = vmul.f32 -1.442695, %v4385_v24  ;;  %v4389_v21 = vadd.f32 %v4338_v34, %v4103_v4  ;;  %v4391_v37 = vadd.f32 %v4381_v35, %v4105_v31  ;;  %v7324_v51 = vmul.f32 -1.442695, %v4387_v26  ;;  %v10275_v28 = vld [vmem:[%s10921_s5 + $0x28] ss:$16 sps:$4 sm:$0xff]  }
 0xa76   :  { %8260 = vpow2.f32 %v7320_v32  ;;  %v7321_v38 = vmul.f32 -1.442695, %v4388_v2  ;;  %v10284_v55 = vld [vmem:[%s10921_s5 + $0x44] ss:$16 sps:$4 sm:$0xff]   ;;  %v10289_v24 = vld [vmem:[%s10921_s5 + $0x4c] ss:$16 sps:$4 sm:$0xff]  }
 0xa77   :  { %8262 = vpow2.f32 %v7322_v36  ;;  %v7323_v59 = vmul.f32 -1.442695, %v4389_v21  ;;  %v7325_v22 = vmul.f32 -1.442695, %v4391_v37  ;;  %v10294_v26 = vld [vmem:[%s10921_s5 + $0x40] ss:$16 sps:$4 sm:$0xff]  }
 0xa78   :  { %8264 = vpow2.f32 %v7321_v38  ;;  %v10299_v20 = vld [vmem:[%s10921_s5 + $0x48] ss:$16 sps:$4 sm:$0xff]   ;;  %v10308_v61 = vld [vmem:[%s10921_s5 + $0x64] ss:$16 sps:$4 sm:$0xff]   ;;  %v10313_v4 = vld [vmem:[%s10921_s5 + $0x6c] ss:$16 sps:$4 sm:$0xff]  }
 0xa79   :  { %8266 = vpow2.f32 %v7323_v59  ;;  %v10318_v31 = vld [vmem:[%s10921_s5 + $0x60] ss:$16 sps:$4 sm:$0xff]   ;;  %v10323_v32 = vld [vmem:[%s10921_s5 + $0x68] ss:$16 sps:$4 sm:$0xff]   ;;  %v10332_v2 = vld [vmem:[%s10921_s5 + $0x84] ss:$16 sps:$4 sm:$0xff]  }
 0xa7a   :  { %8268 = vtanh.f32 %v4386_v48  ;;  %v10260_v48 = vld [vmem:[%s10921_s5 + $0x24] ss:$16 sps:$4 sm:$0xff]   ;;  %v10342_v34 = vld [vmem:[%s10921_s5 + $0x80] ss:$16 sps:$4 sm:$0xff]   ;;  %v10347_v35 = vld [vmem:[%s10921_s5 + $0x88] ss:$16 sps:$4 sm:$0xff]  }
 0xa7b   :  { %8270 = vpow2.f32 %v7324_v51  ;;  %v10354_v36 = vld [vmem:[%s10921_s5 + $0xa4] ss:$16 sps:$4 sm:$0xff]   ;;  %v10359_v21 = vld [vmem:[%s10921_s5 + $0xac] ss:$16 sps:$4 sm:$0xff]   ;;  %v10366_v37 = vld [vmem:[%s10921_s5 + $0xa0] ss:$16 sps:$4 sm:$0xff]  }
 0xa7c   :  { %8272 = vtanh.f32 %v4390_v33  ;;  %v10337_v33 = vld [vmem:[%s10921_s5 + $0x8c] ss:$16 sps:$4 sm:$0xff]   ;;  %v10371_v38 = vld [vmem:[%s10921_s5 + $0xa8] ss:$16 sps:$4 sm:$0xff]   ;;  %v10378_v59 = vld [vmem:[%s10921_s5 + $0xc4] ss:$16 sps:$4 sm:$0xff]  }
 0xa7d   :  { %v10383_v51 = vld [vmem:[%s10921_s5 + $0xcc] ss:$16 sps:$4 sm:$0xff]  }
 0xa80   :  { %v8261_v41 = vpop.eup %8260 }
 0xa81   :  { %v8263_v50 = vpop.eup %8262  ;;  %v4398_v42 = vadd.f32 1.0, %v8261_v41  ;;  %v10390_v41 = vld [vmem:[%s10921_s5 + $0xc0] ss:$16 sps:$4 sm:$0xff]  }
 0xa82   :  { %v4410_v14 = vadd.f32 1.0, %v8263_v50  ;;  %v8265_v52 = vpop.eup %8264  ;;  %v10395_v50 = vld [vmem:[%s10921_s5 + $0xc8] ss:$16 sps:$4 sm:$0xff]  }
 0xa83   :  { %8274 = vrcp.f32 %v4398_v42  ;;  %v4399_v0 = vadd.f32 1.0, %v8265_v52  ;;  %v8267_v49 = vpop.eup %8266  ;;  %v10402_v42 = vld [vmem:[%s10921_s5 + $0xe4] ss:$16 sps:$4 sm:$0xff]   ;;  %v10419_v52 = vld [vmem:[%s10921_s5 + $0xe8] ss:$16 sps:$4 sm:$0xff]  }
 0xa84   :  { %8276 = vrcp.f32 %v4410_v14  ;;  %v4411_v6 = vadd.f32 1.0, %v8267_v49  ;;  %v8269_v7 = vpop.eup %8268  ;;  %v10414_v14 = vld [vmem:[%s10921_s5 + $0xe0] ss:$16 sps:$4 sm:$0xff]   ;;  %v4448_v49 = vunpack.c.l.bf16 %v10037_v57 }
 0xa85   :  { %8278 = vpow2.f32 %v7325_v22  ;;  %v8271_v53 = vpop.eup %8270  ;;  %v10407_v22 = vld [vmem:[%s10921_s5 + $0xec] ss:$16 sps:$4 sm:$0xff]  }
 0xa86   :  { %8280 = vrcp.f32 %v4399_v0  ;;  %v8273_v29 = vpop.eup %8272  ;;  %v4424_v13 = vadd.f32 1.0, %v8271_v53  ;;  %v4446_v0 = vunpack.c.l.bf16 %v10035_v27  ;;  %v4447_v53 = vunpack.c.l.bf16 %v10039_v39 }
 0xa87   :  { %8282 = vrcp.f32 %v4411_v6 }
 0xa88   :  { %8284 = vrcp.f32 %v4424_v13  ;;  %v4452_v13 = vunpack.c.h.bf16 %v10037_v57 }
 0xa8d   :  { %v8275_v5 = vpop.eup %8274 }
 0xa8e   :  { %v8277_v25 = vpop.eup %8276  ;;  %v4432_v17 = vmul.f32 %v8275_v5, %v8269_v7 }
 0xa8f   :  { %v8279_v56 = vpop.eup %8278  ;;  %v4430_v9 = vmul.f32 %v8277_v25, %v10168_v23 }
 0xa90   :  { %v8281_v62 = vpop.eup %8280  ;;  %v4425_v16 = vadd.f32 1.0, %v8279_v56 }
 0xa91   :  { %v10231_v19 = vadd.f32 %v4432_v17, %v4430_v9  ;;  %v4433_v44 = vmul.f32 %v8281_v62, %v8273_v29  ;;  %v8283_v11 = vpop.eup %8282  ;;  %v11043_v29 = vld [vmem:[#allocation5_spill] sm:$0xff]  ;;  %v4450_v62 = vunpack.c.h.bf16 %v10035_v27 }
 0xa92   :  { %v4431_v63 = vmul.f32 %v8283_v11, %v10171_v8  ;;  %v8285_v3 = vpop.eup %8284  ;;  %v10248_v8 = vld [vmem:[%s10921_s5 + $0xc] ss:$16 sps:$4 sm:$0xff]   ;;  %v4449_v5 = vunpack.c.l.bf16 %v11043_v29 }
 0xa93   :  { %8286 = vtanh.f32 %v10231_v19  ;;  %5037 = vmatprep.subr.bf16.mxu1 %v10248_v8 }
 0xa94   :  { %v10235_v43 = vadd.f32 %v4433_v44, %v4431_v63  ;;  %8288 = vrcp.f32 %v4425_v16 }
 0xa96   :  { %8290 = vtanh.f32 %v10235_v43 }
 0xa9d   :  { %v8287_v47 = vpop.eup %8286 }
 0xa9e   :  { %v8289_v23 = vpop.eup %8288  ;;  %v4438_v45 = vmul.f32 %v8287_v47, %v8285_v3  ;;  %v4451_v3 = vunpack.c.h.bf16 %v10039_v39  ;;  %v4453_v47 = vunpack.c.h.bf16 %v11043_v29 }
 0xaa0   :  { %v8291_v54 = vpop.eup %8290 }
 0xaa1   :  { %v4439_v58 = vmul.f32 %v8291_v54, %v8289_v23 }
 0xaa3   :  { %v10238_v15 = vpack.c.bf16 %v4439_v58, %v4438_v45 }
 0xaa5   :  { %4679 = vmatmul.mubr.bf16.vlgmr.msra.gmra.mrb[88].mxu0 %v10238_v15  ;;  %4722 = vmatmul.mubr.bf16.vlgmr.msra.gmra.mrb[120].mxu1 %v10238_v15 }
 0xaa6   :  { %4995 = vmatpush1.bf16.msra.mxu0 %v10203_v46  ;;  %5026 = vmatprep.mubr.bf16.mxu0 %v10995_v18 }
 0xaa7   :  { %5069 = vmatprep.mubr.bf16.mxu1 %v10995_v18  ;;  %5038 = vmatpush1.bf16.msra.mxu1 %v10253_v10 }
 0xaa8   :  { %4996 = vmatprep.subr.bf16.mxu0 %v10260_v48  ;;  %5039 = vmatprep.subr.bf16.mxu1 %v10265_v1 }
 0xaaa   :  { %4997 = vmatpush1.bf16.msra.mxu0 %v10270_v12 }
 0xaab   :  { %5040 = vmatpush1.bf16.msra.mxu1 %v10275_v28  ;;  %4998 = vmatprep.subr.bf16.mxu0 %v10284_v55 }
 0xaac   :  { %5041 = vmatprep.subr.bf16.mxu1 %v10289_v24 }
 0xaae   :  { %4999 = vmatpush1.bf16.msra.mxu0 %v10294_v26 }
 0xaaf   :  { %5042 = vmatpush1.bf16.msra.mxu1 %v10299_v20  ;;  %5000 = vmatprep.subr.bf16.mxu0 %v10308_v61 }
 0xab0   :  { %5043 = vmatprep.subr.bf16.mxu1 %v10313_v4 }
 0xab2   :  { %5001 = vmatpush1.bf16.msra.mxu0 %v10318_v31 }
 0xab3   :  { %5044 = vmatpush1.bf16.msra.mxu1 %v10323_v32  ;;  %5002 = vmatprep.subr.bf16.mxu0 %v10332_v2 }
 0xab4   :  { %5045 = vmatprep.subr.bf16.mxu1 %v10337_v33 }
 0xab6   :  { %5003 = vmatpush1.bf16.msra.mxu0 %v10342_v34 }
 0xab7   :  { %5046 = vmatpush1.bf16.msra.mxu1 %v10347_v35  ;;  %5004 = vmatprep.subr.bf16.mxu0 %v10354_v36 }
 0xab8   :  { %5047 = vmatprep.subr.bf16.mxu1 %v10359_v21 }
 0xaba   :  { %5005 = vmatpush1.bf16.msra.mxu0 %v10366_v37 }
 0xabb   :  { %5048 = vmatpush1.bf16.msra.mxu1 %v10371_v38  ;;  %5006 = vmatprep.subr.bf16.mxu0 %v10378_v59 }
 0xabc   :  { %5049 = vmatprep.subr.bf16.mxu1 %v10383_v51 }
 0xabe   :  { %5007 = vmatpush1.bf16.msra.mxu0 %v10390_v41 }
 0xabf   :  { %5050 = vmatpush1.bf16.msra.mxu1 %v10395_v50  ;;  %5008 = vmatprep.subr.bf16.mxu0 %v10402_v42 }
 0xac0   :  { %5051 = vmatprep.subr.bf16.mxu1 %v10407_v22 }
 0xac2   :  { %5009 = vmatpush1.bf16.msra.mxu0 %v10414_v14 }
 0xac3   :  { %5052 = vmatpush1.bf16.msra.mxu1 %v10419_v52  ;;  %5342 = vmatprep.subr.bf16.mxu0 %v10198_v60 }
 0xac4   :  { %5385 = vmatprep.subr.bf16.mxu1 %v10248_v8 }
 0xb78   :  { %v4680_v6 = vpop.f32.mrb[88].mxu0  ;;  %v4723_v7 = vpop.f32.mrb[120].mxu1 }
 0xb79   :  { %v4732_v25 = vadd.f32 %v4680_v6, %v4446_v0  ;;  %v4734_v17 = vadd.f32 %v4723_v7, %v4448_v49  ;;  %v4682_v56 = vpop.f32.mrb[89].mxu0  ;;  %v4725_v9 = vpop.f32.mrb[121].mxu1 }
 0xb7a   :  { %v4733_v44 = vadd.f32 %v4682_v56, %v4447_v53  ;;  %v4735_v11 = vadd.f32 %v4725_v9, %v4449_v5  ;;  %v4684_v16 = vpop.f32.mrb[90].mxu0  ;;  %v4727_v63 = vpop.f32.mrb[122].mxu1 }
 0xb7b   :  { %v7358_v23 = vmul.f32 -1.442695, %v4732_v25  ;;  %v4736_v54 = vadd.f32 %v4684_v16, %v4450_v62  ;;  %v4738_v45 = vadd.f32 %v4727_v63, %v4452_v13  ;;  %v4686_v58 = vpop.f32.mrb[91].mxu0  ;;  %v4729_v0 = vpop.f32.mrb[123].mxu1 }
 0xb7c   :  { %v7360_v49 = vmul.f32 -1.442695, %v4733_v44  ;;  %v4737_v6 = vadd.f32 %v4686_v58, %v4451_v3  ;;  %v4739_v7 = vadd.f32 %v4729_v0, %v4453_v47  ;;  %v7362_v53 = vmul.f32 -1.442695, %v4735_v11 }
 0xb7d   :  { %8292 = vpow2.f32 %v7358_v23  ;;  %v7359_v27 = vmul.f32 -1.442695, %v4736_v54 }
 0xb7e   :  { %8294 = vpow2.f32 %v7360_v49  ;;  %v7361_v57 = vmul.f32 -1.442695, %v4737_v6  ;;  %v7363_v29 = vmul.f32 -1.442695, %v4739_v7 }
 0xb7f   :  { %8296 = vpow2.f32 %v7359_v27 }
 0xb80   :  { %8298 = vpow2.f32 %v7361_v57 }
 0xb81   :  { %8300 = vtanh.f32 %v4734_v17 }
 0xb82   :  { %8302 = vpow2.f32 %v7362_v53 }
 0xb83   :  { %8304 = vtanh.f32 %v4738_v45 }
 0xb87   :  { %v8293_v5 = vpop.eup %8292 }
 0xb88   :  { %v8295_v39 = vpop.eup %8294  ;;  %v4746_v56 = vadd.f32 1.0, %v8293_v5 }
 0xb89   :  { %v4758_v25 = vadd.f32 1.0, %v8295_v39  ;;  %v8297_v9 = vpop.eup %8296 }
 0xb8a   :  { %8306 = vrcp.f32 %v4746_v56  ;;  %v4747_v62 = vadd.f32 1.0, %v8297_v9  ;;  %v8299_v13 = vpop.eup %8298  ;;  %v11044_v9 = vld [vmem:[#allocation14_spill] sm:$0xff] }
 0xb8b   :  { %8308 = vrcp.f32 %v4758_v25  ;;  %v4759_v44 = vadd.f32 1.0, %v8299_v13  ;;  %v8301_v16 = vpop.eup %8300 }
 0xb8c   :  { %8310 = vpow2.f32 %v7363_v29  ;;  %v8303_v63 = vpop.eup %8302 }
 0xb8d   :  { %8312 = vrcp.f32 %v4747_v62  ;;  %v8305_v11 = vpop.eup %8304  ;;  %v4772_v45 = vadd.f32 1.0, %v8303_v63  ;;  %v4796_v62 = vunpack.c.l.bf16 %v11044_v9 }
 0xb8e   :  { %8314 = vrcp.f32 %v4759_v44 }
 0xb8f   :  { %8316 = vrcp.f32 %v4772_v45 }
 0xb94   :  { %v8307_v3 = vpop.eup %8306 }
 0xb95   :  { %v8309_v17 = vpop.eup %8308  ;;  %v4780_v47 = vmul.f32 %v8307_v3, %v8301_v16  ;;  %v11045_v16 = vld [vmem:[#allocation6_spill] sm:$0xff] }
 0xb96   :  { %v8311_v23 = vpop.eup %8310  ;;  %v4778_v54 = vmul.f32 %v8309_v17, %v10231_v19  ;;  %v4795_v63 = vunpack.c.l.bf16 %v11045_v16 }
 0xb97   :  { %v8313_v58 = vpop.eup %8312  ;;  %v4773_v7 = vadd.f32 1.0, %v8311_v23 }
 0xb98   :  { %v10436_v0 = vadd.f32 %v4780_v47, %v4778_v54  ;;  %v4781_v49 = vmul.f32 %v8313_v58, %v8305_v11  ;;  %v8315_v6 = vpop.eup %8314  ;;  %v11046_v11 = vld [vmem:[#allocation15_spill] sm:$0xff]  ;;  %v4798_v58 = vunpack.c.h.bf16 %v10053_v30 }
 0xb99   :  { %v4779_v27 = vmul.f32 %v8315_v6, %v10235_v43  ;;  %v8317_v53 = vpop.eup %8316  ;;  %v4794_v43 = vunpack.c.l.bf16 %v10053_v30  ;;  %v4797_v3 = vunpack.c.l.bf16 %v11046_v11 }
 0xb9a   :  { %8318 = vtanh.f32 %v10436_v0 }
 0xb9b   :  { %v10440_v57 = vadd.f32 %v4781_v49, %v4779_v27  ;;  %8320 = vrcp.f32 %v4773_v7  ;;  %v4799_v27 = vunpack.c.h.bf16 %v11045_v16 }
 0xb9d   :  { %8322 = vtanh.f32 %v10440_v57 }
 0xba4   :  { %v8319_v5 = vpop.eup %8318 }
 0xba5   :  { %v8321_v19 = vpop.eup %8320  ;;  %v4786_v56 = vmul.f32 %v8319_v5, %v8317_v53  ;;  %v4801_v53 = vunpack.c.h.bf16 %v11046_v11 }
 0xba7   :  { %v8323_v39 = vpop.eup %8322 }
 0xba8   :  { %v4787_v29 = vmul.f32 %v8323_v39, %v8321_v19 }
 0xbaa   :  { %v10443_v25 = vpack.c.bf16 %v4787_v29, %v4786_v56 }
 0xbac   :  { %5027 = vmatmul.mubr.bf16.vlgmr.msra.gmra.mrb[92].mxu0 %v10443_v25  ;;  %5070 = vmatmul.mubr.bf16.vlgmr.msra.gmra.mrb[124].mxu1 %v10443_v25 }
 0xbad   :  { %5343 = vmatpush1.bf16.msra.mxu0 %v10203_v46  ;;  %5386 = vmatpush1.bf16.msra.mxu1 %v10253_v10 }
 0xbae   :  { %5344 = vmatprep.subr.bf16.mxu0 %v10260_v48  ;;  %5387 = vmatprep.subr.bf16.mxu1 %v10265_v1 }
 0xbaf   :  { %5374 = vmatprep.mubr.bf16.mxu0 %v10995_v18  ;;  %5417 = vmatprep.mubr.bf16.mxu1 %v10995_v18 }
 0xbb1   :  { %5345 = vmatpush1.bf16.msra.mxu0 %v10270_v12  ;;  %5388 = vmatpush1.bf16.msra.mxu1 %v10275_v28 }
 0xbb2   :  { %5346 = vmatprep.subr.bf16.mxu0 %v10284_v55  ;;  %5389 = vmatprep.subr.bf16.mxu1 %v10289_v24 }
 0xbb5   :  { %5347 = vmatpush1.bf16.msra.mxu0 %v10294_v26  ;;  %5390 = vmatpush1.bf16.msra.mxu1 %v10299_v20 }
 0xbb6   :  { %5348 = vmatprep.subr.bf16.mxu0 %v10308_v61  ;;  %5391 = vmatprep.subr.bf16.mxu1 %v10313_v4 }
 0xbb9   :  { %5349 = vmatpush1.bf16.msra.mxu0 %v10318_v31  ;;  %5392 = vmatpush1.bf16.msra.mxu1 %v10323_v32 }
 0xbba   :  { %5350 = vmatprep.subr.bf16.mxu0 %v10332_v2  ;;  %5393 = vmatprep.subr.bf16.mxu1 %v10337_v33 }
 0xbbd   :  { %5351 = vmatpush1.bf16.msra.mxu0 %v10342_v34  ;;  %5394 = vmatpush1.bf16.msra.mxu1 %v10347_v35 }
 0xbbe   :  { %5352 = vmatprep.subr.bf16.mxu0 %v10354_v36  ;;  %5395 = vmatprep.subr.bf16.mxu1 %v10359_v21 }
 0xbc1   :  { %5353 = vmatpush1.bf16.msra.mxu0 %v10366_v37  ;;  %5396 = vmatpush1.bf16.msra.mxu1 %v10371_v38 }
 0xbc2   :  { %5354 = vmatprep.subr.bf16.mxu0 %v10378_v59  ;;  %5397 = vmatprep.subr.bf16.mxu1 %v10383_v51 }
 0xbc5   :  { %5355 = vmatpush1.bf16.msra.mxu0 %v10390_v41  ;;  %5398 = vmatpush1.bf16.msra.mxu1 %v10395_v50 }
 0xbc6   :  { %5356 = vmatprep.subr.bf16.mxu0 %v10402_v42  ;;  %5399 = vmatprep.subr.bf16.mxu1 %v10407_v22 }
 0xbc9   :  { %5357 = vmatpush1.bf16.msra.mxu0 %v10414_v14  ;;  %5400 = vmatpush1.bf16.msra.mxu1 %v10419_v52 }
 0xbca   :  { %5690 = vmatprep.subr.bf16.mxu0 %v10198_v60  ;;  %5733 = vmatprep.subr.bf16.mxu1 %v10248_v8  ;;  %v4800_v60 = vunpack.c.h.bf16 %v11044_v9 }
 0xc7f   :  { %v5028_v13 = vpop.f32.mrb[92].mxu0  ;;  %v5071_v44 = vpop.f32.mrb[124].mxu1 }
 0xc80   :  { %v5080_v17 = vadd.f32 %v5028_v13, %v4794_v43  ;;  %v5082_v47 = vadd.f32 %v5071_v44, %v4796_v62  ;;  %v5030_v23 = vpop.f32.mrb[93].mxu0  ;;  %v5073_v54 = vpop.f32.mrb[125].mxu1 }
 0xc81   :  { %v5081_v45 = vadd.f32 %v5030_v23, %v4795_v63  ;;  %v5083_v49 = vadd.f32 %v5073_v54, %v4797_v3  ;;  %v5032_v6 = vpop.f32.mrb[94].mxu0  ;;  %v5075_v7 = vpop.f32.mrb[126].mxu1 }
 0xc82   :  { %v7396_v5 = vmul.f32 -1.442695, %v5080_v17  ;;  %v5084_v19 = vadd.f32 %v5032_v6, %v4798_v58  ;;  %v5086_v39 = vadd.f32 %v5075_v7, %v4800_v60  ;;  %v5034_v56 = vpop.f32.mrb[95].mxu0  ;;  %v5077_v29 = vpop.f32.mrb[127].mxu1 }
 0xc83   :  { %v7398_v43 = vmul.f32 -1.442695, %v5081_v45  ;;  %v5085_v62 = vadd.f32 %v5034_v56, %v4799_v27  ;;  %v5087_v13 = vadd.f32 %v5077_v29, %v4801_v53  ;;  %v7400_v44 = vmul.f32 -1.442695, %v5083_v49 }
 0xc84   :  { %8324 = vpow2.f32 %v7396_v5  ;;  %v7397_v30 = vmul.f32 -1.442695, %v5084_v19 }
 0xc85   :  { %8326 = vpow2.f32 %v7398_v43  ;;  %v7399_v9 = vmul.f32 -1.442695, %v5085_v62  ;;  %v7401_v11 = vmul.f32 -1.442695, %v5087_v13 }
 0xc86   :  { %8328 = vpow2.f32 %v7397_v30 }
 0xc87   :  { %8330 = vpow2.f32 %v7399_v9 }
 0xc88   :  { %8332 = vtanh.f32 %v5082_v47 }
 0xc89   :  { %8334 = vpow2.f32 %v7400_v44 }
 0xc8a   :  { %8336 = vtanh.f32 %v5086_v39 }
 0xc8e   :  { %v8325_v63 = vpop.eup %8324 }
 0xc8f   :  { %v8327_v16 = vpop.eup %8326  ;;  %v5094_v3 = vadd.f32 1.0, %v8325_v63 }
 0xc90   :  { %v5106_v17 = vadd.f32 1.0, %v8327_v16  ;;  %v8329_v23 = vpop.eup %8328 }
 0xc91   :  { %8338 = vrcp.f32 %v5094_v3  ;;  %v5095_v54 = vadd.f32 1.0, %v8329_v23  ;;  %v8331_v58 = vpop.eup %8330 }
 0xc92   :  { %8340 = vrcp.f32 %v5106_v17  ;;  %v5107_v60 = vadd.f32 1.0, %v8331_v58  ;;  %v8333_v45 = vpop.eup %8332  ;;  %v11048_v17 = vld [vmem:[#allocation16_spill] sm:$0xff] }
 0xc93   :  { %8342 = vpow2.f32 %v7401_v11  ;;  %v8335_v6 = vpop.eup %8334  ;;  %v5144_v23 = vunpack.c.l.bf16 %v11048_v17 }
 0xc94   :  { %8344 = vrcp.f32 %v5095_v54  ;;  %v8337_v49 = vpop.eup %8336  ;;  %v5120_v39 = vadd.f32 1.0, %v8335_v6  ;;  %v11050_v6 = vld [vmem:[#allocation17_spill] sm:$0xff] }
 0xc95   :  { %8346 = vrcp.f32 %v5107_v60  ;;  %v11049_v60 = vld [vmem:[#allocation8_spill] sm:$0xff] }
 0xc96   :  { %8348 = vrcp.f32 %v5120_v39 }
 0xc9b   :  { %v8339_v7 = vpop.eup %8338 }
 0xc9c   :  { %v8341_v47 = vpop.eup %8340  ;;  %v5128_v27 = vmul.f32 %v8339_v7, %v8333_v45  ;;  %v5143_v45 = vunpack.c.l.bf16 %v11049_v60 }
 0xc9d   :  { %v8343_v53 = vpop.eup %8342  ;;  %v5126_v5 = vmul.f32 %v8341_v47, %v10436_v0 }
 0xc9e   :  { %v8345_v19 = vpop.eup %8344  ;;  %v5121_v62 = vadd.f32 1.0, %v8343_v53 }
 0xc9f   :  { %v10490_v56 = vadd.f32 %v5128_v27, %v5126_v5  ;;  %v5129_v29 = vmul.f32 %v8345_v19, %v8337_v49  ;;  %v8347_v43 = vpop.eup %8346  ;;  %v5145_v49 = vunpack.c.l.bf16 %v11050_v6  ;;  %v5148_v19 = vunpack.c.h.bf16 %v11048_v17 }
 0xca0   :  { %v5127_v13 = vmul.f32 %v8347_v43, %v10440_v57  ;;  %v8349_v9 = vpop.eup %8348 }
 0xca1   :  { %8350 = vtanh.f32 %v10490_v56 }
 0xca2   :  { %v10494_v30 = vadd.f32 %v5129_v29, %v5127_v13  ;;  %8352 = vrcp.f32 %v5121_v62  ;;  %v5147_v62 = vunpack.c.h.bf16 %v11049_v60  ;;  %v5149_v13 = vunpack.c.h.bf16 %v11050_v6 }
 0xca4   :  { %8354 = vtanh.f32 %v10494_v30 }
 0xcab   :  { %v8351_v44 = vpop.eup %8350 }
 0xcac   :  { %v8353_v0 = vpop.eup %8352  ;;  %v5134_v16 = vmul.f32 %v8351_v44, %v8349_v9 }
 0xcae   :  { %v8355_v63 = vpop.eup %8354 }
 0xcaf   :  { %v5135_v3 = vmul.f32 %v8355_v63, %v8353_v0 }
 0xcb1   :  { %v10497_v11 = vpack.c.bf16 %v5135_v3, %v5134_v16 }
 0xcb3   :  { %5375 = vmatmul.mubr.bf16.vlgmr.msra.gmra.mrb[96].mxu0 %v10497_v11  ;;  %5418 = vmatmul.mubr.bf16.vlgmr.msra.gmra.mrb[128].mxu1 %v10497_v11 }
 0xcb4   :  { %5691 = vmatpush1.bf16.msra.mxu0 %v10203_v46  ;;  %5734 = vmatpush1.bf16.msra.mxu1 %v10253_v10  ;;  %v11047_v46 = vld [vmem:[#allocation7_spill] sm:$0xff] }
 0xcb5   :  { %5692 = vmatprep.subr.bf16.mxu0 %v10260_v48  ;;  %5735 = vmatprep.subr.bf16.mxu1 %v10265_v1  ;;  %v5142_v57 = vunpack.c.l.bf16 %v11047_v46  ;;  %v5146_v5 = vunpack.c.h.bf16 %v11047_v46 }
 0xcb6   :  { %5722 = vmatprep.mubr.bf16.mxu0 %v10995_v18  ;;  %5765 = vmatprep.mubr.bf16.mxu1 %v10995_v18 }
 0xcb8   :  { %5693 = vmatpush1.bf16.msra.mxu0 %v10270_v12  ;;  %5736 = vmatpush1.bf16.msra.mxu1 %v10275_v28 }
 0xcb9   :  { %5694 = vmatprep.subr.bf16.mxu0 %v10284_v55  ;;  %5737 = vmatprep.subr.bf16.mxu1 %v10289_v24 }
 0xcbc   :  { %5695 = vmatpush1.bf16.msra.mxu0 %v10294_v26  ;;  %5738 = vmatpush1.bf16.msra.mxu1 %v10299_v20 }
 0xcbd   :  { %5696 = vmatprep.subr.bf16.mxu0 %v10308_v61  ;;  %5739 = vmatprep.subr.bf16.mxu1 %v10313_v4 }
 0xcc0   :  { %5697 = vmatpush1.bf16.msra.mxu0 %v10318_v31  ;;  %5740 = vmatpush1.bf16.msra.mxu1 %v10323_v32 }
 0xcc1   :  { %5698 = vmatprep.subr.bf16.mxu0 %v10332_v2  ;;  %5741 = vmatprep.subr.bf16.mxu1 %v10337_v33 }
 0xcc4   :  { %5699 = vmatpush1.bf16.msra.mxu0 %v10342_v34  ;;  %5742 = vmatpush1.bf16.msra.mxu1 %v10347_v35 }
 0xcc5   :  { %5700 = vmatprep.subr.bf16.mxu0 %v10354_v36  ;;  %5743 = vmatprep.subr.bf16.mxu1 %v10359_v21 }
 0xcc8   :  { %5701 = vmatpush1.bf16.msra.mxu0 %v10366_v37  ;;  %5744 = vmatpush1.bf16.msra.mxu1 %v10371_v38 }
 0xcc9   :  { %5702 = vmatprep.subr.bf16.mxu0 %v10378_v59  ;;  %5745 = vmatprep.subr.bf16.mxu1 %v10383_v51 }
 0xccc   :  { %5703 = vmatpush1.bf16.msra.mxu0 %v10390_v41  ;;  %5746 = vmatpush1.bf16.msra.mxu1 %v10395_v50 }
 0xccd   :  { %5704 = vmatprep.subr.bf16.mxu0 %v10402_v42  ;;  %5747 = vmatprep.subr.bf16.mxu1 %v10407_v22 }
 0xcd0   :  { %5705 = vmatpush1.bf16.msra.mxu0 %v10414_v14  ;;  %5748 = vmatpush1.bf16.msra.mxu1 %v10419_v52 }
 0xcd1   :  { %6081 = vmatprep.subr.bf16.mxu1 %v10248_v8 }
 0xd86   :  { %v5376_v54 = vpop.f32.mrb[96].mxu0  ;;  %v5419_v58 = vpop.f32.mrb[128].mxu1 }
 0xd87   :  { %v5428_v7 = vadd.f32 %v5376_v54, %v5142_v57  ;;  %v5430_v47 = vadd.f32 %v5419_v58, %v5144_v23  ;;  %v5378_v27 = vpop.f32.mrb[97].mxu0  ;;  %v5421_v53 = vpop.f32.mrb[129].mxu1 }
 0xd88   :  { %v5429_v39 = vadd.f32 %v5378_v27, %v5143_v45  ;;  %v5431_v8 = vadd.f32 %v5421_v53, %v5145_v49  ;;  %v5380_v29 = vpop.f32.mrb[98].mxu0  ;;  %v5423_v43 = vpop.f32.mrb[130].mxu1 }
 0xd89   :  { %v7434_v9 = vmul.f32 -1.442695, %v5428_v7  ;;  %v5432_v44 = vadd.f32 %v5380_v29, %v5146_v5  ;;  %v5434_v0 = vadd.f32 %v5423_v43, %v5148_v19  ;;  %v5382_v63 = vpop.f32.mrb[99].mxu0  ;;  %v5425_v16 = vpop.f32.mrb[131].mxu1 }
 0xd8a   :  { %v7436_v3 = vmul.f32 -1.442695, %v5429_v39  ;;  %v5433_v57 = vadd.f32 %v5382_v63, %v5147_v62  ;;  %v5435_v23 = vadd.f32 %v5425_v16, %v5149_v13  ;;  %v7438_v54 = vmul.f32 -1.442695, %v5431_v8 }
 0xd8b   :  { %8356 = vpow2.f32 %v7434_v9  ;;  %v7435_v46 = vmul.f32 -1.442695, %v5432_v44 }
 0xd8c   :  { %8358 = vpow2.f32 %v7436_v3  ;;  %v7437_v17 = vmul.f32 -1.442695, %v5433_v57  ;;  %v7439_v6 = vmul.f32 -1.442695, %v5435_v23 }
 0xd8d   :  { %8360 = vpow2.f32 %v7435_v46 }
 0xd8e   :  { %8362 = vpow2.f32 %v7437_v17 }
 0xd8f   :  { %8364 = vtanh.f32 %v5430_v47 }
 0xd90   :  { %8366 = vpow2.f32 %v7438_v54 }
 0xd91   :  { %8368 = vtanh.f32 %v5434_v0 }
 0xd95   :  { %v8357_v58 = vpop.eup %8356 }
 0xd96   :  { %v8359_v60 = vpop.eup %8358  ;;  %v5442_v45 = vadd.f32 1.0, %v8357_v58 }
 0xd97   :  { %v5454_v49 = vadd.f32 1.0, %v8359_v60  ;;  %v8361_v7 = vpop.eup %8360 }
 0xd98   :  { %8370 = vrcp.f32 %v5442_v45  ;;  %v5443_v27 = vadd.f32 1.0, %v8361_v7  ;;  %v8363_v53 = vpop.eup %8362 }
 0xd99   :  { %8372 = vrcp.f32 %v5454_v49  ;;  %v5455_v5 = vadd.f32 1.0, %v8363_v53  ;;  %v8365_v19 = vpop.eup %8364 }
 0xd9a   :  { %8374 = vpow2.f32 %v7439_v6  ;;  %v8367_v39 = vpop.eup %8366 }
 0xd9b   :  { %8376 = vrcp.f32 %v5443_v27  ;;  %v8369_v8 = vpop.eup %8368  ;;  %v5468_v44 = vadd.f32 1.0, %v8367_v39 }
 0xd9c   :  { %8378 = vrcp.f32 %v5455_v5 }
 0xd9d   :  { %8380 = vrcp.f32 %v5468_v44 }
 0xda2   :  { %v8371_v29 = vpop.eup %8370 }
 0xda3   :  { %v8373_v47 = vpop.eup %8372  ;;  %v5476_v43 = vmul.f32 %v8371_v29, %v8365_v19 }
 0xda4   :  { %v8375_v62 = vpop.eup %8374  ;;  %v5474_v13 = vmul.f32 %v8373_v47, %v10490_v56 }
 0xda5   :  { %v8377_v9 = vpop.eup %8376  ;;  %v5469_v3 = vadd.f32 1.0, %v8375_v62 }
 0xda6   :  { %v10543_v0 = vadd.f32 %v5476_v43, %v5474_v13  ;;  %v5477_v63 = vmul.f32 %v8377_v9, %v8369_v8  ;;  %v8379_v16 = vpop.eup %8378 }
 0xda7   :  { %v5475_v57 = vmul.f32 %v8379_v16, %v10494_v30  ;;  %v8381_v46 = vpop.eup %8380 }
 0xda8   :  { %8382 = vtanh.f32 %v10543_v0 }
 0xda9   :  { %v10547_v23 = vadd.f32 %v5477_v63, %v5475_v57  ;;  %8384 = vrcp.f32 %v5469_v3 }
 0xdab   :  { %8386 = vtanh.f32 %v10547_v23 }
 0xdb2   :  { %v8383_v17 = vpop.eup %8382 }
 0xdb3   :  { %v8385_v56 = vpop.eup %8384  ;;  %v5482_v58 = vmul.f32 %v8383_v17, %v8381_v46 }
 0xdb5   :  { %v8387_v54 = vpop.eup %8386 }
 0xdb6   :  { %v5483_v60 = vmul.f32 %v8387_v54, %v8385_v56 }
 0xdb8   :  { %v10550_v45 = vpack.c.bf16 %v5483_v60, %v5482_v58 }
 0xdba   :  { %5723 = vmatmul.mubr.bf16.vlgmr.msra.gmra.mrb[100].mxu0 %v10550_v45  ;;  %5766 = vmatmul.mubr.bf16.vlgmr.msra.gmra.mrb[132].mxu1 %v10550_v45 }
 0xdbb   :  { %6082 = vmatpush1.bf16.msra.mxu1 %v10253_v10  ;;  %6070 = vmatprep.mubr.bf16.mxu0 %v10995_v18  ;;  %v7918_v10 = vld [vmem:[%s10921_s5 + $0x4] ss:$16 sps:$4 sm:$0xff]  }
 0xdbc   :  { %6083 = vmatprep.subr.bf16.mxu1 %v10265_v1  ;;  %6113 = vmatprep.mubr.bf16.mxu1 %v10995_v18  ;;  %v10577_v1 = vld [vmem:[%s10921_s5] ss:$16 sps:$4 sm:$0xff]  }
 0xdbd   :  { %6038 = vmatprep.subr.bf16.mxu0 %v7918_v10 }
 0xdbe   :  { %6039 = vmatpush1.bf16.msra.mxu0 %v10577_v1 }
 0xdbf   :  { %6084 = vmatpush1.bf16.msra.mxu1 %v10275_v28  ;;  %6040 = vmatprep.subr.bf16.mxu0 %v10260_v48  ;;  %v11051_v48 = vld [vmem:[#allocation9_spill] sm:$0xff]  ;;  %v11052_v28 = vld [vmem:[#allocation18_spill] sm:$0xff] }
 0xdc0   :  { %6085 = vmatprep.subr.bf16.mxu1 %v10289_v24 }
 0xdc2   :  { %6041 = vmatpush1.bf16.msra.mxu0 %v10270_v12  ;;  %v5490_v12 = vunpack.c.l.bf16 %v11051_v48 }
 0xdc3   :  { %6086 = vmatpush1.bf16.msra.mxu1 %v10299_v20  ;;  %6042 = vmatprep.subr.bf16.mxu0 %v10284_v55  ;;  %v5492_v55 = vunpack.c.l.bf16 %v11052_v28  ;;  %v11053_v20 = vld [vmem:[#allocation10_spill] sm:$0xff] }
 0xdc4   :  { %6087 = vmatprep.subr.bf16.mxu1 %v10313_v4  ;;  %v11054_v4 = vld [vmem:[#allocation19_spill] sm:$0xff] }
 0xdc6   :  { %6043 = vmatpush1.bf16.msra.mxu0 %v10294_v26 }
 0xdc7   :  { %6088 = vmatpush1.bf16.msra.mxu1 %v10323_v32  ;;  %6044 = vmatprep.subr.bf16.mxu0 %v10308_v61  ;;  %v5491_v61 = vunpack.c.l.bf16 %v11053_v20 }
 0xdc8   :  { %6089 = vmatprep.subr.bf16.mxu1 %v10337_v33 }
 0xdca   :  { %6045 = vmatpush1.bf16.msra.mxu0 %v10318_v31  ;;  %v5493_v31 = vunpack.c.l.bf16 %v11054_v4 }
 0xdcb   :  { %6090 = vmatpush1.bf16.msra.mxu1 %v10347_v35  ;;  %6046 = vmatprep.subr.bf16.mxu0 %v10332_v2  ;;  %v5494_v35 = vunpack.c.h.bf16 %v11051_v48 }
 0xdcc   :  { %6091 = vmatprep.subr.bf16.mxu1 %v10359_v21 }
 0xdce   :  { %6047 = vmatpush1.bf16.msra.mxu0 %v10342_v34 }
 0xdcf   :  { %6092 = vmatpush1.bf16.msra.mxu1 %v10371_v38  ;;  %6048 = vmatprep.subr.bf16.mxu0 %v10354_v36  ;;  %v5496_v36 = vunpack.c.h.bf16 %v11052_v28 }
 0xdd0   :  { %6093 = vmatprep.subr.bf16.mxu1 %v10383_v51  ;;  %v5495_v51 = vunpack.c.h.bf16 %v11053_v20 }
 0xdd2   :  { %6049 = vmatpush1.bf16.msra.mxu0 %v10366_v37 }
 0xdd3   :  { %6094 = vmatpush1.bf16.msra.mxu1 %v10395_v50  ;;  %6050 = vmatprep.subr.bf16.mxu0 %v10378_v59 }
 0xdd4   :  { %6095 = vmatprep.subr.bf16.mxu1 %v10407_v22 }
 0xdd6   :  { %6051 = vmatpush1.bf16.msra.mxu0 %v10390_v41  ;;  %v5497_v41 = vunpack.c.h.bf16 %v11054_v4 }
 0xdd7   :  { %6096 = vmatpush1.bf16.msra.mxu1 %v10419_v52  ;;  %6052 = vmatprep.subr.bf16.mxu0 %v10402_v42 }
 0xdda   :  { %6053 = vmatpush1.bf16.msra.mxu0 %v10414_v14 }
 0xddb   :  { %6386 = vmatprep.subr.bf16.mxu0 %v7918_v10 }
 0xe8d   :  { %v5724_v24 = vpop.f32.mrb[100].mxu0  ;;  %v5767_v26 = vpop.f32.mrb[132].mxu1 }
 0xe8e   :  { %v5776_v32 = vadd.f32 %v5724_v24, %v5490_v12  ;;  %v5778_v2 = vadd.f32 %v5767_v26, %v5492_v55  ;;  %v5726_v33 = vpop.f32.mrb[101].mxu0  ;;  %v5769_v34 = vpop.f32.mrb[133].mxu1 }
 0xe8f   :  { %v5777_v21 = vadd.f32 %v5726_v33, %v5491_v61  ;;  %v5779_v37 = vadd.f32 %v5769_v34, %v5493_v31  ;;  %v5728_v38 = vpop.f32.mrb[102].mxu0  ;;  %v5771_v59 = vpop.f32.mrb[134].mxu1  ;;  %v7919_v31 = vld [vmem:[%s10921_s5 + $0x8] ss:$16 sps:$4 sm:$0xff]   ;;  %v7930_v33 = vld [vmem:[%s10921_s5 + $0x44] ss:$16 sps:$4 sm:$0xff]  }
 0xe90   :  { %v7472_v50 = vmul.f32 -1.442695, %v5776_v32  ;;  %v5780_v42 = vadd.f32 %v5728_v38, %v5494_v35  ;;  %v5782_v22 = vadd.f32 %v5771_v59, %v5496_v36  ;;  %v5730_v14 = vpop.f32.mrb[103].mxu0  ;;  %v5773_v52 = vpop.f32.mrb[135].mxu1  ;;  %v7924_v32 = vld [vmem:[%s10921_s5 + $0x24] ss:$16 sps:$4 sm:$0xff]  }
 0xe91   :  { %v7474_v30 = vmul.f32 -1.442695, %v5777_v21  ;;  %v5781_v6 = vadd.f32 %v5730_v14, %v5495_v51  ;;  %v5783_v49 = vadd.f32 %v5773_v52, %v5497_v41  ;;  %v7476_v53 = vmul.f32 -1.442695, %v5779_v37  ;;  %v7928_v34 = vld [vmem:[%s10921_s5 + $0x40] ss:$16 sps:$4 sm:$0xff]  }
 0xe92   :  { %8388 = vpow2.f32 %v7472_v50  ;;  %v7473_v7 = vmul.f32 -1.442695, %v5780_v42  ;;  %v7933_v35 = vld [vmem:[%s10921_s5 + $0x4c] ss:$16 sps:$4 sm:$0xff]   ;;  %v7931_v36 = vld [vmem:[%s10921_s5 + $0x48] ss:$16 sps:$4 sm:$0xff]  }
 0xe93   :  { %8390 = vpow2.f32 %v7474_v30  ;;  %v7475_v27 = vmul.f32 -1.442695, %v5781_v6  ;;  %v7477_v8 = vmul.f32 -1.442695, %v5783_v49  ;;  %v7936_v21 = vld [vmem:[%s10921_s5 + $0x64] ss:$16 sps:$4 sm:$0xff]  }
 0xe94   :  { %8392 = vpow2.f32 %v7473_v7  ;;  %v7934_v37 = vld [vmem:[%s10921_s5 + $0x60] ss:$16 sps:$4 sm:$0xff]   ;;  %v7939_v38 = vld [vmem:[%s10921_s5 + $0x6c] ss:$16 sps:$4 sm:$0xff]   ;;  %v7937_v59 = vld [vmem:[%s10921_s5 + $0x68] ss:$16 sps:$4 sm:$0xff]  }
 0xe95   :  { %8394 = vpow2.f32 %v7475_v27  ;;  %v7942_v51 = vld [vmem:[%s10921_s5 + $0x84] ss:$16 sps:$4 sm:$0xff]   ;;  %v7940_v41 = vld [vmem:[%s10921_s5 + $0x80] ss:$16 sps:$4 sm:$0xff]   ;;  %v7945_v50 = vld [vmem:[%s10921_s5 + $0x8c] ss:$16 sps:$4 sm:$0xff]  }
 0xe96   :  { %8396 = vtanh.f32 %v5778_v2  ;;  %v7925_v2 = vld [vmem:[%s10921_s5 + $0x28] ss:$16 sps:$4 sm:$0xff]   ;;  %v7946_v14 = vld [vmem:[%s10921_s5 + $0xa0] ss:$16 sps:$4 sm:$0xff]   ;;  %v7951_v52 = vld [vmem:[%s10921_s5 + $0xac] ss:$16 sps:$4 sm:$0xff]  }
 0xe97   :  { %8398 = vpow2.f32 %v7476_v53  ;;  %v7943_v42 = vld [vmem:[%s10921_s5 + $0x88] ss:$16 sps:$4 sm:$0xff]   ;;  %v7954_v6 = vld [vmem:[%s10921_s5 + $0xc4] ss:$16 sps:$4 sm:$0xff]   ;;  %v7952_v49 = vld [vmem:[%s10921_s5 + $0xc0] ss:$16 sps:$4 sm:$0xff]  }
 0xe98   :  { %8400 = vtanh.f32 %v5782_v22  ;;  %v7948_v22 = vld [vmem:[%s10921_s5 + $0xa4] ss:$16 sps:$4 sm:$0xff]   ;;  %v7949_v30 = vld [vmem:[%s10921_s5 + $0xa8] ss:$16 sps:$4 sm:$0xff]   ;;  %v7957_v7 = vld [vmem:[%s10921_s5 + $0xcc] ss:$16 sps:$4 sm:$0xff]  }
 0xe99   :  { %v7955_v27 = vld [vmem:[%s10921_s5 + $0xc8] ss:$16 sps:$4 sm:$0xff]   ;;  %v7960_v53 = vld [vmem:[%s10921_s5 + $0xe4] ss:$16 sps:$4 sm:$0xff]  }
 0xe9c   :  { %v8389_v5 = vpop.eup %8388 }
 0xe9d   :  { %v8391_v19 = vpop.eup %8390  ;;  %v5790_v39 = vadd.f32 1.0, %v8389_v5  ;;  %v7963_v5 = vld [vmem:[%s10921_s5 + $0xec] ss:$16 sps:$4 sm:$0xff]  }
 0xe9e   :  { %v5802_v29 = vadd.f32 1.0, %v8391_v19  ;;  %v8393_v47 = vpop.eup %8392  ;;  %v7958_v19 = vld [vmem:[%s10921_s5 + $0xe0] ss:$16 sps:$4 sm:$0xff]  }
 0xe9f   :  { %8402 = vrcp.f32 %v5790_v39  ;;  %v5791_v43 = vadd.f32 1.0, %v8393_v47  ;;  %v8395_v62 = vpop.eup %8394  ;;  %v7961_v39 = vld [vmem:[%s10921_s5 + $0xe8] ss:$16 sps:$4 sm:$0xff]  }
 0xea0   :  { %8404 = vrcp.f32 %v5802_v29  ;;  %v5803_v13 = vadd.f32 1.0, %v8395_v62  ;;  %v8397_v9 = vpop.eup %8396  ;;  %v11055_v29 = vld [vmem:[#allocation22_spill] sm:$0xff] }
 0xea1   :  { %8406 = vpow2.f32 %v7477_v8  ;;  %v8399_v44 = vpop.eup %8398  ;;  %v10710_v8 = vld [vmem:[%s10923_s7] sm:$0xff]   ;;  %v5838_v47 = vunpack.c.l.bf16 %v11055_v29 }
 0xea2   :  { %8408 = vrcp.f32 %v5791_v43  ;;  %v8401_v63 = vpop.eup %8400  ;;  %v5816_v54 = vadd.f32 1.0, %v8399_v44  ;;  %v11056_v43 = vld [vmem:[#allocation23_spill] sm:$0xff] }
 0xea3   :  { %8410 = vrcp.f32 %v5803_v13  ;;  %v5840_v62 = vunpack.c.l.bf16 %v11056_v43  ;;  %v11057_v44 = vld [vmem:[#allocation11_spill] sm:$0xff] }
 0xea4   :  { %8412 = vrcp.f32 %v5816_v54  ;;  %v5842_v54 = vunpack.c.h.bf16 %v11055_v29 }
 0xea9   :  { %v8403_v16 = vpop.eup %8402 }
 0xeaa   :  { %v8405_v3 = vpop.eup %8404  ;;  %v5824_v57 = vmul.f32 %v8403_v16, %v8397_v9  ;;  %v11058_v16 = vld [vmem:[#allocation20_spill] sm:$0xff] }
 0xeab   :  { %v8407_v46 = vpop.eup %8406  ;;  %v5822_v17 = vmul.f32 %v8405_v3, %v10543_v0  ;;  %v5841_v3 = vunpack.c.l.bf16 %v11058_v16 }
 0xeac   :  { %v8409_v56 = vpop.eup %8408  ;;  %v5817_v48 = vadd.f32 1.0, %v8407_v46 }
 0xead   :  { %v10603_v58 = vadd.f32 %v5824_v57, %v5822_v17  ;;  %v5825_v60 = vmul.f32 %v8409_v56, %v8401_v63  ;;  %v8411_v10 = vpop.eup %8410  ;;  %v5839_v63 = vunpack.c.l.bf16 %v11057_v44 }
 0xeae   :  { %v5823_v12 = vmul.f32 %v8411_v10, %v10547_v23  ;;  %v8413_v55 = vpop.eup %8412  ;;  %v7921_v23 = vld [vmem:[%s10921_s5 + $0xc] ss:$16 sps:$4 sm:$0xff]  }
 0xeaf   :  { %8414 = vtanh.f32 %v10603_v58  ;;  %6429 = vmatprep.subr.bf16.mxu1 %v7921_v23 }
 0xeb0   :  { %v10607_v28 = vadd.f32 %v5825_v60, %v5823_v12  ;;  %8416 = vrcp.f32 %v5817_v48  ;;  %v5844_v60 = vunpack.c.h.bf16 %v11056_v43 }
 0xeb2   :  { %8418 = vtanh.f32 %v10607_v28 }
 0xeb9   :  { %v8415_v24 = vpop.eup %8414 }
 0xeba   :  { %v8417_v0 = vpop.eup %8416  ;;  %v5830_v20 = vmul.f32 %v8415_v24, %v8413_v55  ;;  %v5843_v24 = vunpack.c.h.bf16 %v11057_v44 }
 0xebc   :  { %v8419_v26 = vpop.eup %8418 }
 0xebd   :  { %v5831_v61 = vmul.f32 %v8419_v26, %v8417_v0  ;;  %v5845_v0 = vunpack.c.h.bf16 %v11058_v16 }
 0xebf   :  { %v10610_v4 = vpack.c.bf16 %v5831_v61, %v5830_v20 }
 0xec1   :  { %6071 = vmatmul.mubr.bf16.vlgmr.msra.gmra.mrb[104].mxu0 %v10610_v4  ;;  %6114 = vmatmul.mubr.bf16.vlgmr.msra.gmra.mrb[136].mxu1 %v10610_v4 }
 0xec2   :  { %6387 = vmatpush1.bf16.msra.mxu0 %v10577_v1  ;;  %6418 = vmatprep.mubr.bf16.mxu0 %v10995_v18  ;;  %v7922_v1 = vld [vmem:[%s10921_s5 + $0x20] ss:$16 sps:$4 sm:$0xff]  }
 0xec3   :  { %6461 = vmatprep.mubr.bf16.mxu1 %v10995_v18  ;;  %6430 = vmatpush1.bf16.msra.mxu1 %v7919_v31  ;;  %v7927_v18 = vld [vmem:[%s10921_s5 + $0x2c] ss:$16 sps:$4 sm:$0xff]  }
 0xec4   :  { %6388 = vmatprep.subr.bf16.mxu0 %v7924_v32  ;;  %6431 = vmatprep.subr.bf16.mxu1 %v7927_v18 }
 0xec6   :  { %6389 = vmatpush1.bf16.msra.mxu0 %v7922_v1 }
 0xec7   :  { %6432 = vmatpush1.bf16.msra.mxu1 %v7925_v2  ;;  %6390 = vmatprep.subr.bf16.mxu0 %v7930_v33 }
 0xec8   :  { %6433 = vmatprep.subr.bf16.mxu1 %v7933_v35 }
 0xeca   :  { %6391 = vmatpush1.bf16.msra.mxu0 %v7928_v34 }
 0xecb   :  { %6434 = vmatpush1.bf16.msra.mxu1 %v7931_v36  ;;  %6392 = vmatprep.subr.bf16.mxu0 %v7936_v21 }
 0xecc   :  { %6435 = vmatprep.subr.bf16.mxu1 %v7939_v38 }
 0xece   :  { %6393 = vmatpush1.bf16.msra.mxu0 %v7934_v37 }
 0xecf   :  { %6436 = vmatpush1.bf16.msra.mxu1 %v7937_v59  ;;  %6394 = vmatprep.subr.bf16.mxu0 %v7942_v51 }
 0xed0   :  { %6437 = vmatprep.subr.bf16.mxu1 %v7945_v50 }
 0xed2   :  { %6395 = vmatpush1.bf16.msra.mxu0 %v7940_v41 }
 0xed3   :  { %6438 = vmatpush1.bf16.msra.mxu1 %v7943_v42  ;;  %6396 = vmatprep.subr.bf16.mxu0 %v7948_v22 }
 0xed4   :  { %6439 = vmatprep.subr.bf16.mxu1 %v7951_v52 }
 0xed6   :  { %6397 = vmatpush1.bf16.msra.mxu0 %v7946_v14 }
 0xed7   :  { %6440 = vmatpush1.bf16.msra.mxu1 %v7949_v30  ;;  %6398 = vmatprep.subr.bf16.mxu0 %v7954_v6 }
 0xed8   :  { %6441 = vmatprep.subr.bf16.mxu1 %v7957_v7 }
 0xeda   :  { %6399 = vmatpush1.bf16.msra.mxu0 %v7952_v49 }
 0xedb   :  { %6442 = vmatpush1.bf16.msra.mxu1 %v7955_v27  ;;  %6400 = vmatprep.subr.bf16.mxu0 %v7960_v53 }
 0xedc   :  { %6443 = vmatprep.subr.bf16.mxu1 %v7963_v5 }
 0xede   :  { %6401 = vmatpush1.bf16.msra.mxu0 %v7958_v19 }
 0xedf   :  { %6444 = vmatpush1.bf16.msra.mxu1 %v7961_v39  ;;  %7579 = vmatprep.subr.bf16.mxu0 %v10710_v8 }
 0xf94   :  { %v6072_v13 = vpop.f32.mrb[104].mxu0  ;;  %v6115_v9 = vpop.f32.mrb[136].mxu1 }
 0xf95   :  { %v6124_v57 = vadd.f32 %v6072_v13, %v5838_v47  ;;  %v6126_v46 = vadd.f32 %v6115_v9, %v5840_v62  ;;  %v6074_v17 = vpop.f32.mrb[105].mxu0  ;;  %v6117_v56 = vpop.f32.mrb[137].mxu1 }
 0xf96   :  { %v6125_v10 = vadd.f32 %v6074_v17, %v5839_v63  ;;  %v6127_v48 = vadd.f32 %v6117_v56, %v5841_v3  ;;  %v6076_v12 = vpop.f32.mrb[106].mxu0  ;;  %v6119_v55 = vpop.f32.mrb[138].mxu1  ;;  %v7965_v3 = vld [vmem:[%s10923_s7 + $0x8] sm:$0xff]   ;;  %v7971_v17 = vld [vmem:[%s10923_s7 + $0x38] sm:$0xff]   ;;  %v11059_v56 = vld [vmem:[#allocation12_spill] sm:$0xff] }
 0xf97   :  { %v7510_v26 = vmul.f32 -1.442695, %v6124_v57  ;;  %v6128_v20 = vadd.f32 %v6076_v12, %v5842_v54  ;;  %v6130_v61 = vadd.f32 %v6119_v55, %v5844_v60  ;;  %v6078_v23 = vpop.f32.mrb[107].mxu0  ;;  %v6121_v31 = vpop.f32.mrb[139].mxu1  ;;  %v7967_v57 = vld [vmem:[%s10923_s7 + $0x18] sm:$0xff]   ;;  %v6186_v54 = vunpack.c.l.bf16 %v11059_v56  ;;  %v11060_v60 = vld [vmem:[#allocation21_spill] sm:$0xff] }
 0xf98   :  { %v7512_v32 = vmul.f32 -1.442695, %v6125_v10  ;;  %v6129_v1 = vadd.f32 %v6078_v23, %v5843_v24  ;;  %v6131_v18 = vadd.f32 %v6121_v31, %v5845_v0  ;;  %v7514_v34 = vmul.f32 -1.442695, %v6127_v48  ;;  %v11061_v55 = vld [vmem:[#allocation4_spill] sm:$0xff] }
 0xf99   :  { %8420 = vpow2.f32 %v7510_v26  ;;  %v7511_v2 = vmul.f32 -1.442695, %v6128_v20  ;;  %v6188_v10 = vunpack.c.l.bf16 %v11060_v60  ;;  %v6187_v24 = vunpack.c.l.bf16 %v11061_v55  ;;  %v11062_v0 = vld [vmem:[#allocation24_spill] sm:$0xff] }
 0xf9a   :  { %8422 = vpow2.f32 %v7512_v32  ;;  %v7513_v33 = vmul.f32 -1.442695, %v6129_v1  ;;  %v7515_v37 = vmul.f32 -1.442695, %v6131_v18  ;;  %v6189_v26 = vunpack.c.l.bf16 %v11062_v0 }
 0xf9b   :  { %8424 = vpow2.f32 %v7511_v2  ;;  %v6191_v1 = vunpack.c.h.bf16 %v11061_v55  ;;  %v6193_v18 = vunpack.c.h.bf16 %v11062_v0 }
 0xf9c   :  { %8426 = vpow2.f32 %v7513_v33 }
 0xf9d   :  { %8428 = vtanh.f32 %v6126_v46  ;;  %v7968_v46 = vld [vmem:[%s10923_s7 + $0x20] sm:$0xff]  }
 0xf9e   :  { %8430 = vpow2.f32 %v7514_v34 }
 0xf9f   :  { %8432 = vtanh.f32 %v6130_v61 }
 0xfa3   :  { %v8421_v35 = vpop.eup %8420 }
 0xfa4   :  { %v8423_v36 = vpop.eup %8422  ;;  %v6138_v21 = vadd.f32 1.0, %v8421_v35 }
 0xfa5   :  { %v6150_v38 = vadd.f32 1.0, %v8423_v36  ;;  %v8425_v59 = vpop.eup %8424 }
 0xfa6   :  { %8434 = vrcp.f32 %v6138_v21  ;;  %v6139_v51 = vadd.f32 1.0, %v8425_v59  ;;  %v8427_v41 = vpop.eup %8426 }
 0xfa7   :  { %8436 = vrcp.f32 %v6150_v38  ;;  %v6151_v50 = vadd.f32 1.0, %v8427_v41  ;;  %v8429_v42 = vpop.eup %8428 }
 0xfa8   :  { %8438 = vpow2.f32 %v7515_v37  ;;  %v8431_v22 = vpop.eup %8430 }
 0xfa9   :  { %8440 = vrcp.f32 %v6139_v51  ;;  %v8433_v14 = vpop.eup %8432  ;;  %v6164_v53 = vadd.f32 1.0, %v8431_v22 }
 0xfaa   :  { %8442 = vrcp.f32 %v6151_v50 }
 0xfab   :  { %8444 = vrcp.f32 %v6164_v53 }
 0xfb0   :  { %v8435_v52 = vpop.eup %8434 }
 0xfb1   :  { %v8437_v30 = vpop.eup %8436  ;;  %v6172_v6 = vmul.f32 %v8435_v52, %v8429_v42 }
 0xfb2   :  { %v8439_v49 = vpop.eup %8438  ;;  %v6170_v7 = vmul.f32 %v8437_v30, %v10603_v58 }
 0xfb3   :  { %v8441_v27 = vpop.eup %8440  ;;  %v6165_v29 = vadd.f32 1.0, %v8439_v49 }
 0xfb4   :  { %v10722_v5 = vadd.f32 %v6172_v6, %v6170_v7  ;;  %v6173_v19 = vmul.f32 %v8441_v27, %v8433_v14  ;;  %v8443_v39 = vpop.eup %8442 }
 0xfb5   :  { %v6171_v47 = vmul.f32 %v8443_v39, %v10607_v28  ;;  %v8445_v62 = vpop.eup %8444  ;;  %v7966_v28 = vld [vmem:[%s10923_s7 + $0x10] sm:$0xff]  }
 0xfb6   :  { %8446 = vtanh.f32 %v10722_v5 }
 0xfb7   :  { %v10726_v43 = vadd.f32 %v6173_v19, %v6171_v47  ;;  %8448 = vrcp.f32 %v6165_v29 }
 0xfb9   :  { %8450 = vtanh.f32 %v10726_v43 }
 0xfc0   :  { %v8447_v13 = vpop.eup %8446 }
 0xfc1   :  { %v8449_v58 = vpop.eup %8448  ;;  %v6178_v44 = vmul.f32 %v8447_v13, %v8445_v62 }
 0xfc3   :  { %v8451_v9 = vpop.eup %8450 }
 0xfc4   :  { %v6179_v63 = vmul.f32 %v8451_v9, %v8449_v58  ;;  %v10769_v9 = vld [vmem:[%s10924_s8] ss:$0 sm:$0xff] }
 0xfc6   :  { %v6180_v16 = vpack.c.bf16 %v6179_v63, %v6178_v44 }
 0xfc8   :  { %6419 = vmatmul.mubr.bf16.vlgmr.msra.gmra.mrb[108].mxu0 %v6180_v16  ;;  %6462 = vmatmul.mubr.bf16.vlgmr.msra.gmra.mrb[140].mxu1 %v6180_v16 }
 0xfc9   :  { %7580 = vmatpush3.bf16.msra.mxu0 %v10710_v8  ;;  %7595 = vmatprep.mubr.bf16.mxu0 %v10174_v40  ;;  %v7969_v40 = vld [vmem:[%s10923_s7 + $0x28] sm:$0xff]   ;;  %v7970_v8 = vld [vmem:[%s10923_s7 + $0x30] sm:$0xff]  }
 0xfca   :  { %7581 = vmatprep.subr.bf16.mxu0 %v7965_v3 }
 0xfcd   :  { %7582 = vmatpush3.bf16.msra.mxu0 %v7965_v3 }
 0xfce   :  { %7583 = vmatprep.subr.bf16.mxu0 %v7966_v28 }
 0xfd1   :  { %7584 = vmatpush3.bf16.msra.mxu0 %v7966_v28 }
 0xfd2   :  { %7585 = vmatprep.subr.bf16.mxu0 %v7967_v57 }
 0xfd5   :  { %7586 = vmatpush3.bf16.msra.mxu0 %v7967_v57 }
 0xfd6   :  { %7587 = vmatprep.subr.bf16.mxu0 %v7968_v46 }
 0xfd9   :  { %7588 = vmatpush3.bf16.msra.mxu0 %v7968_v46 }
 0xfda   :  { %7589 = vmatprep.subr.bf16.mxu0 %v7969_v40 }
 0xfdd   :  { %7590 = vmatpush3.bf16.msra.mxu0 %v7969_v40 }
 0xfde   :  { %7591 = vmatprep.subr.bf16.mxu0 %v7970_v8 }
 0xfe1   :  { %7592 = vmatpush3.bf16.msra.mxu0 %v7970_v8 }
 0xfe2   :  { %7593 = vmatprep.subr.bf16.mxu0 %v7971_v17 }
 0xfe5   :  { %7594 = vmatpush3.bf16.msra.mxu0 %v7971_v17 }
 0xfe8   :  { %7596 = vmatmul.mubr.bf16.vlgmr.msra.gmra.mrb[112].mxu0 %v10238_v15 }
 0xfe9   :  { %7599 = vmatprep.mubr.bf16.mxu0 %v10443_v25 }
 0xff0   :  { %7600 = vmatmul.mubr.bf16.gmra.mrb[116].mxu0 %v10497_v11  ;;  %v6190_v11 = vunpack.c.h.bf16 %v11059_v56 }
 0xff1   :  { %7603 = vmatprep.mubr.bf16.mxu0 %v10550_v45  ;;  %v6192_v45 = vunpack.c.h.bf16 %v11060_v60 }
 0xff8   :  { %7604 = vmatmul.mubr.bf16.gmra.mrb[120].mxu0 %v10610_v4 }
 0xff9   :  { %7607 = vmatprep.mubr.bf16.mxu0 %v6180_v16 }
0x109b   :  { %v6420_v48 = vpop.f32.mrb[108].mxu0  ;;  %v6463_v12 = vpop.f32.mrb[140].mxu1 }
0x109c   :  { %v6472_v15 = vadd.f32 %v6420_v48, %v6186_v54  ;;  %v6474_v20 = vadd.f32 %v6463_v12, %v6188_v10  ;;  %v6422_v25 = vpop.f32.mrb[109].mxu0  ;;  %v6465_v61 = vpop.f32.mrb[141].mxu1 }
0x109d   :  { %v6473_v4 = vadd.f32 %v6422_v25, %v6187_v24  ;;  %v6475_v23 = vadd.f32 %v6465_v61, %v6189_v26  ;;  %v6424_v31 = vpop.f32.mrb[110].mxu0  ;;  %v6467_v32 = vpop.f32.mrb[142].mxu1 }
0x109e   :  { %v7548_v2 = vmul.f32 -1.442695, %v6472_v15  ;;  %v6476_v33 = vadd.f32 %v6424_v31, %v6190_v11  ;;  %v6478_v34 = vadd.f32 %v6467_v32, %v6192_v45  ;;  %v6426_v35 = vpop.f32.mrb[111].mxu0  ;;  %v6469_v36 = vpop.f32.mrb[143].mxu1 }
0x109f   :  { %v7550_v21 = vmul.f32 -1.442695, %v6473_v4  ;;  %v6477_v37 = vadd.f32 %v6426_v35, %v6191_v1  ;;  %v6479_v38 = vadd.f32 %v6469_v36, %v6193_v18  ;;  %v7552_v41 = vmul.f32 -1.442695, %v6475_v23 }
0x10a0   :  { %8452 = vpow2.f32 %v7548_v2  ;;  %v7549_v59 = vmul.f32 -1.442695, %v6476_v33 }
0x10a1   :  { %8454 = vpow2.f32 %v7550_v21  ;;  %v7551_v51 = vmul.f32 -1.442695, %v6477_v37  ;;  %v7553_v14 = vmul.f32 -1.442695, %v6479_v38 }
0x10a2   :  { %8456 = vpow2.f32 %v7549_v59 }
0x10a3   :  { %8458 = vpow2.f32 %v7551_v51 }
0x10a4   :  { %8460 = vtanh.f32 %v6474_v20 }
0x10a5   :  { %8462 = vpow2.f32 %v7552_v41 }
0x10a6   :  { %8464 = vtanh.f32 %v6478_v34 }
0x10aa   :  { %v8453_v50 = vpop.eup %8452 }
0x10ab   :  { %v8455_v42 = vpop.eup %8454  ;;  %v6486_v22 = vadd.f32 1.0, %v8453_v50 }
0x10ac   :  { %v6498_v52 = vadd.f32 1.0, %v8455_v42  ;;  %v8457_v30 = vpop.eup %8456 }
0x10ad   :  { %8466 = vrcp.f32 %v6486_v22  ;;  %v6487_v6 = vadd.f32 1.0, %v8457_v30  ;;  %v8459_v49 = vpop.eup %8458 }
0x10ae   :  { %8468 = vrcp.f32 %v6498_v52  ;;  %v6499_v7 = vadd.f32 1.0, %v8459_v49  ;;  %v8461_v27 = vpop.eup %8460 }
0x10af   :  { %8470 = vpow2.f32 %v7553_v14  ;;  %v8463_v53 = vpop.eup %8462 }
0x10b0   :  { %8472 = vrcp.f32 %v6487_v6  ;;  %v8465_v19 = vpop.eup %8464  ;;  %v6512_v62 = vadd.f32 1.0, %v8463_v53 }
0x10b1   :  { %8474 = vrcp.f32 %v6499_v7 }
0x10b2   :  { %8476 = vrcp.f32 %v6512_v62 }
0x10b7   :  { %v8467_v39 = vpop.eup %8466 }
0x10b8   :  { %v8469_v29 = vpop.eup %8468  ;;  %v6520_v47 = vmul.f32 %v8467_v39, %v8461_v27 }
0x10b9   :  { %v8471_v13 = vpop.eup %8470  ;;  %v6518_v58 = vmul.f32 %v8469_v29, %v10722_v5 }
0x10ba   :  { %v8473_v44 = vpop.eup %8472  ;;  %v6513_v57 = vadd.f32 1.0, %v8471_v13 }
0x10bb   :  { %v6521_v63 = vmul.f32 %v8473_v44, %v8465_v19  ;;  %v7597_v16 = vpop.f32.mrb[112].mxu0  ;;  %v6522_v3 = vadd.f32 %v6520_v47, %v6518_v58  ;;  %v8475_v28 = vpop.eup %8474 }
0x10bc   :  { %v6652_v46 = vadd.f32 %v7597_v16, %v10769_v9  ;;  %v6643_v40 = vpop.f32.mrb[113].mxu0  ;;  %v6519_v8 = vmul.f32 %v8475_v28, %v10726_v43  ;;  %v8477_v24 = vpop.eup %8476 }
0x10bd   :  { %v6644_v17 = vadd.f32 %v10769_v9, %v6643_v40  ;;  %v7598_v5 = vpop.f32.mrb[114].mxu0  ;;  %8478 = vtanh.f32 %v6522_v3 }
0x10be   :  { %6710 = vmax.xlane.f32.xlu1 %v6652_v46  ;;  %v6646_v56 = vpop.f32.mrb[115].mxu0  ;;  %v6523_v54 = vadd.f32 %v6521_v63, %v6519_v8  ;;  %8480 = vrcp.f32 %v6513_v57  ;;  %v6655_v60 = vadd.f32 %v7598_v5, %v10769_v9 }
0x10bf   :  { %6706 = vmax.xlane.f32.xlu0 %v6644_v17  ;;  %v6647_v10 = vadd.f32 %v10769_v9, %v6646_v56 }
0x10c0   :  { %8482 = vtanh.f32 %v6523_v54 }
0x10c2   :  { %6712 = vmax.xlane.f32.xlu1 %v6655_v60 }
0x10c3   :  { %v7601_v48 = vpop.f32.mrb[116].mxu0  ;;  %6708 = vmax.xlane.f32.xlu0 %v6647_v10 }
0x10c4   :  { %v6668_v12 = vadd.f32 %v7601_v48, %v10769_v9  ;;  %v6659_v43 = vpop.f32.mrb[117].mxu0 }
0x10c5   :  { %v7602_v55 = vpop.f32.mrb[118].mxu0  ;;  %v6660_v25 = vadd.f32 %v10769_v9, %v6659_v43 }
0x10c6   :  { %v10778_v0 = vadd.f32 %v7602_v55, %v10769_v9  ;;  %v6662_v26 = vpop.f32.mrb[119].mxu0 }
0x10c7   :  { %v8479_v15 = vpop.eup %8478  ;;  %6718 = vmax.xlane.f32.xlu0 %v6668_v12  ;;  %v6663_v11 = vadd.f32 %v10769_v9, %v6662_v26 }
0x10c8   :  { %6720 = vmax.xlane.f32.xlu1 %v10778_v0  ;;  %v6526_v20 = vmul.f32 %v8479_v15, %v8477_v24  ;;  %v8481_v61 = vpop.eup %8480 }
0x10ca   :  { %v8483_v45 = vpop.eup %8482 }
0x10cb   :  { %v7605_v4 = vpop.f32.mrb[120].mxu0  ;;  %6714 = vmax.xlane.f32.xlu0 %v6660_v25  ;;  %v6527_v32 = vmul.f32 %v8483_v45, %v8481_v61 }
0x10cc   :  { %v10784_v23 = vadd.f32 %v7605_v4, %v10769_v9  ;;  %v6675_v31 = vpop.f32.mrb[121].mxu0  ;;  %6716 = vmax.xlane.f32.xlu1 %v6663_v11 }
0x10cd   :  { %v7606_v1 = vpop.f32.mrb[122].mxu0  ;;  %v6528_v33 = vpack.c.bf16 %v6527_v32, %v6526_v20  ;;  %v6676_v34 = vadd.f32 %v10769_v9, %v6675_v31 }
0x10ce   :  { %v10787_v18 = vadd.f32 %v7606_v1, %v10769_v9  ;;  %v6678_v2 = vpop.f32.mrb[123].mxu0 }
0x10cf   :  { %6726 = vmax.xlane.f32.xlu0 %v10784_v23  ;;  %7608 = vmatmul.mubr.bf16.gmra.mrb[124].mxu0 %v6528_v33  ;;  %v6679_v35 = vadd.f32 %v10769_v9, %v6678_v2 }
0x10d0   :  { %6728 = vmax.xlane.f32.xlu1 %v10787_v18 }
0x10d3   :  { %6722 = vmax.xlane.f32.xlu0 %v6676_v34 }
0x10d4   :  { %6724 = vmax.xlane.f32.xlu1 %v6679_v35 }
0x114b   :  { %v6711_v21 = vpop.xlane.xlu1 %6710 }
0x114c   :  { %v6707_v36 = vpop.xlane.xlu0 %6706  ;;  %v10797_v14 = vsub.f32 %v6652_v46, %v6711_v21 }
0x114d   :  { %v10793_v41 = vsub.f32 %v6644_v17, %v6707_v36 }
0x114e   :  { %v6758_v27 = vmul.f32 1.442695, %v10797_v14 }
0x114f   :  { %v6713_v38 = vpop.xlane.xlu1 %6712  ;;  %v6754_v52 = vmul.f32 1.442695, %v10793_v41 }
0x1150   :  { %v6709_v37 = vpop.xlane.xlu0 %6708  ;;  %v10800_v30 = vsub.f32 %v6655_v60, %v6713_v38 }
0x1151   :  { %v10795_v42 = vsub.f32 %v6647_v10, %v6709_v37  ;;  %8484 = vpow2.f32 %v6754_v52 }
0x1152   :  { %v6760_v62 = vmul.f32 1.442695, %v10800_v30 }
0x1153   :  { %v6756_v6 = vmul.f32 1.442695, %v10795_v42 }
0x1154   :  { %v6719_v59 = vpop.xlane.xlu0 %6718 }
0x1155   :  { %v6721_v51 = vpop.xlane.xlu1 %6720  ;;  %8486 = vpow2.f32 %v6756_v6  ;;  %v10814_v63 = vsub.f32 %v6668_v12, %v6719_v59 }
0x1156   :  { %8488 = vpow2.f32 %v6758_v27  ;;  %v10819_v57 = vsub.f32 %v10778_v0, %v6721_v51 }
0x1157   :  { %8490 = vpow2.f32 %v6760_v62  ;;  %v6766_v17 = vmul.f32 1.442695, %v10814_v63 }
0x1158   :  { %v6715_v50 = vpop.xlane.xlu0 %6714  ;;  %v6768_v54 = vmul.f32 1.442695, %v10819_v57 }
0x1159   :  { %v6717_v22 = vpop.xlane.xlu1 %6716  ;;  %v10804_v53 = vsub.f32 %v6660_v25, %v6715_v50 }
0x115a   :  { %v10810_v13 = vsub.f32 %v6663_v11, %v6717_v22 }
0x115b   :  { %v6762_v16 = vmul.f32 1.442695, %v10804_v53  ;;  %v8485_v56 = vpop.eup %8484 }
0x115c   :  { %v6727_v49 = vpop.xlane.xlu0 %6726  ;;  %v6764_v46 = vmul.f32 1.442695, %v10810_v13 }
0x115d   :  { %v6729_v39 = vpop.xlane.xlu1 %6728  ;;  %8492 = vpow2.f32 %v6762_v16  ;;  %v10830_v48 = vsub.f32 %v10784_v23, %v6727_v49 }
0x115e   :  { %8494 = vpow2.f32 %v6764_v46  ;;  %v10834_v43 = vsub.f32 %v10787_v18, %v6729_v39 }
0x115f   :  { %v8487_v10 = vpop.eup %8486  ;;  %8496 = vpow2.f32 %v6766_v17  ;;  %v6774_v0 = vmul.f32 1.442695, %v10830_v48 }
0x1160   :  { %v6723_v3 = vpop.xlane.xlu0 %6722  ;;  %v8489_v12 = vpop.eup %8488  ;;  %8498 = vpow2.f32 %v6768_v54  ;;  %v6776_v15 = vmul.f32 1.442695, %v10834_v43 }
0x1161   :  { %v6725_v40 = vpop.xlane.xlu1 %6724  ;;  %v10824_v5 = vsub.f32 %v6676_v34, %v6723_v3  ;;  %v8491_v24 = vpop.eup %8490 }
0x1162   :  { %v10827_v60 = vsub.f32 %v6679_v35, %v6725_v40 }
0x1164   :  { %v6772_v55 = vmul.f32 1.442695, %v10827_v60 }
0x1167   :  { %v8493_v26 = vpop.eup %8492 }
0x1168   :  { %v8495_v20 = vpop.eup %8494 }
0x1169   :  { %v8497_v25 = vpop.eup %8496 }
0x116a   :  { %v8499_v61 = vpop.eup %8498 }
0x11a2   :  { %v7609_v7 = vpop.f32.mrb[124].mxu0 }
0x11a3   :  { %v6691_v19 = vpop.f32.mrb[125].mxu0  ;;  %v6700_v28 = vadd.f32 %v7609_v7, %v10769_v9 }
0x11a4   :  { %v10807_v29 = vadd.f32 %v10769_v9, %v6691_v19  ;;  %v7610_v47 = vpop.f32.mrb[126].mxu0 }
0x11a5   :  { %v6694_v58 = vpop.f32.mrb[127].mxu0  ;;  %v6703_v8 = vadd.f32 %v7610_v47, %v10769_v9 }
0x11a6   :  { %v6695_v44 = vadd.f32 %v10769_v9, %v6694_v58  ;;  %6730 = vmax.xlane.f32.xlu0 %v10807_v29  ;;  %v6770_v9 = vmul.f32 1.442695, %v10824_v5 }
0x11a8   :  { %6732 = vmax.xlane.f32.xlu1 %v6695_v44  ;;  %8500 = vpow2.f32 %v6770_v9 }
0x11a9   :  { %8502 = vpow2.f32 %v6772_v55 }
0x11aa   :  { %6734 = vmax.xlane.f32.xlu0 %v6700_v28  ;;  %8504 = vpow2.f32 %v6774_v0 }
0x11ab   :  { %8506 = vpow2.f32 %v6776_v15 }
0x11ac   :  { %6736 = vmax.xlane.f32.xlu1 %v6703_v8 }
0x11ae   :  { %6786 = vadd.xlane.f32.xlu0 %v8485_v56 }
0x11b0   :  { %6788 = vadd.xlane.f32.xlu1 %v8487_v10 }
0x11b2   :  { %6790 = vadd.xlane.f32.xlu0 %v8489_v12  ;;  %v8501_v11 = vpop.eup %8500 }
0x11b3   :  { %v8503_v45 = vpop.eup %8502 }
0x11b4   :  { %6792 = vadd.xlane.f32.xlu1 %v8491_v24  ;;  %v8505_v4 = vpop.eup %8504 }
0x11b5   :  { %v8507_v23 = vpop.eup %8506 }
0x11b6   :  { %6794 = vadd.xlane.f32.xlu0 %v8493_v26 }
0x11b8   :  { %6796 = vadd.xlane.f32.xlu1 %v8495_v20 }
0x11ba   :  { %6798 = vadd.xlane.f32.xlu0 %v8497_v25 }
0x11bc   :  { %6800 = vadd.xlane.f32.xlu1 %v8499_v61 }
0x11be   :  { %6802 = vadd.xlane.f32.xlu0 %v8501_v11 }
0x11c0   :  { %6804 = vadd.xlane.f32.xlu1 %v8503_v45 }
0x11c2   :  { %6806 = vadd.xlane.f32.xlu0 %v8505_v4 }
0x11c4   :  { %6808 = vadd.xlane.f32.xlu1 %v8507_v23 }
0x1233   :  { %v6731_v31 = vpop.xlane.xlu0 %6730 }
0x1234   :  { %v10840_v32 = vsub.f32 %v10807_v29, %v6731_v31 }
0x1235   :  { %v6733_v1 = vpop.xlane.xlu1 %6732 }
0x1236   :  { %v6778_v18 = vmul.f32 1.442695, %v10840_v32  ;;  %v10843_v2 = vsub.f32 %v6695_v44, %v6733_v1 }
0x1237   :  { %v6735_v33 = vpop.xlane.xlu0 %6734 }
0x1238   :  { %8508 = vpow2.f32 %v6778_v18  ;;  %v6780_v34 = vmul.f32 1.442695, %v10843_v2  ;;  %v10846_v35 = vsub.f32 %v6700_v28, %v6735_v33 }
0x1239   :  { %v6737_v36 = vpop.xlane.xlu1 %6736 }
0x123a   :  { %8510 = vpow2.f32 %v6780_v34  ;;  %v6782_v21 = vmul.f32 1.442695, %v10846_v35  ;;  %v10849_v37 = vsub.f32 %v6703_v8, %v6737_v36 }
0x123b   :  { %v6787_v38 = vpop.xlane.xlu0 %6786 }
0x123c   :  { %8512 = vpow2.f32 %v6782_v21  ;;  %v6784_v59 = vmul.f32 1.442695, %v10849_v37 }
0x123d   :  { %8514 = vlog2.f32 %v6787_v38  ;;  %v6789_v51 = vpop.xlane.xlu1 %6788 }
0x123e   :  { %8516 = vpow2.f32 %v6784_v59 }
0x123f   :  { %8518 = vlog2.f32 %v6789_v51  ;;  %v6791_v50 = vpop.xlane.xlu0 %6790 }
0x1240   :  { %8520 = vlog2.f32 %v6791_v50 }
0x1241   :  { %v6793_v22 = vpop.xlane.xlu1 %6792 }
0x1242   :  { %v8509_v52 = vpop.eup %8508  ;;  %8522 = vlog2.f32 %v6793_v22 }
0x1243   :  { %6810 = vadd.xlane.f32.xlu0 %v8509_v52  ;;  %v6795_v6 = vpop.xlane.xlu0 %6794 }
0x1244   :  { %v8511_v49 = vpop.eup %8510  ;;  %8524 = vlog2.f32 %v6795_v6 }
0x1245   :  { %6812 = vadd.xlane.f32.xlu1 %v8511_v49  ;;  %v6797_v7 = vpop.xlane.xlu1 %6796 }
0x1246   :  { %v8513_v27 = vpop.eup %8512  ;;  %8526 = vlog2.f32 %v6797_v7 }
0x1247   :  { %v8515_v19 = vpop.eup %8514  ;;  %6814 = vadd.xlane.f32.xlu0 %v8513_v27  ;;  %v6799_v39 = vpop.xlane.xlu0 %6798 }
0x1248   :  { %v8517_v29 = vpop.eup %8516  ;;  %v6819_v47 = vmul.f32 0.6931472, %v8515_v19  ;;  %8528 = vlog2.f32 %v6799_v39 }
0x1249   :  { %v8519_v62 = vpop.eup %8518  ;;  %6816 = vadd.xlane.f32.xlu1 %v8517_v29  ;;  %v6801_v58 = vpop.xlane.xlu1 %6800 }
0x124a   :  { %v8521_v44 = vpop.eup %8520  ;;  %v6850_v16 = vsub.f32 %v10793_v41, %v6819_v47  ;;  %v6821_v3 = vmul.f32 0.6931472, %v8519_v62  ;;  %8530 = vlog2.f32 %v6801_v58 }
0x124b   :  { %v6823_v28 = vmul.f32 0.6931472, %v8521_v44  ;;  %v6803_v46 = vpop.xlane.xlu0 %6802 }
0x124c   :  { %v8523_v40 = vpop.eup %8522  ;;  %6866 = vst [vmem:[%s10925_s9] sm:$0xff] %v6850_v16  ;;  %v6851_v8 = vsub.f32 %v10795_v42, %v6821_v3  ;;  %8532 = vlog2.f32 %v6803_v46 }
0x124d   :  { %v6852_v17 = vsub.f32 %v10797_v14, %v6823_v28  ;;  %v6825_v56 = vmul.f32 0.6931472, %v8523_v40  ;;  %v6805_v54 = vpop.xlane.xlu1 %6804 }
0x124e   :  { %v8525_v10 = vpop.eup %8524  ;;  %6867 = vst [vmem:[%s10925_s9 + $0x8] sm:$0xff] %v6851_v8  ;;  %8534 = vlog2.f32 %v6805_v54 }
0x124f   :  { %6868 = vst [vmem:[%s10925_s9 + $0x10] sm:$0xff] %v6852_v17  ;;  %v6853_v41 = vsub.f32 %v10800_v30, %v6825_v56  ;;  %v6827_v9 = vmul.f32 0.6931472, %v8525_v10  ;;  %v6807_v12 = vpop.xlane.xlu0 %6806 }
0x1250   :  { %v8527_v42 = vpop.eup %8526  ;;  %8536 = vlog2.f32 %v6807_v12 }
0x1251   :  { %6869 = vst [vmem:[%s10925_s9 + $0x18] sm:$0xff] %v6853_v41  ;;  %v6854_v14 = vsub.f32 %v10804_v53, %v6827_v9  ;;  %v6829_v55 = vmul.f32 0.6931472, %v8527_v42  ;;  %v6809_v24 = vpop.xlane.xlu1 %6808 }
0x1252   :  { %v8529_v0 = vpop.eup %8528  ;;  %8538 = vlog2.f32 %v6809_v24 }
0x1253   :  { %6870 = vst [vmem:[%s10925_s9 + $0x20] sm:$0xff] %v6854_v14  ;;  %v6855_v30 = vsub.f32 %v10810_v13, %v6829_v55  ;;  %v6831_v26 = vmul.f32 0.6931472, %v8529_v0 }
0x1254   :  { %v8531_v15 = vpop.eup %8530 }
0x1255   :  { %6871 = vst [vmem:[%s10925_s9 + $0x28] sm:$0xff] %v6855_v30  ;;  %v6856_v20 = vsub.f32 %v10814_v63, %v6831_v26  ;;  %v6833_v25 = vmul.f32 0.6931472, %v8531_v15 }
0x1256   :  { %v8533_v53 = vpop.eup %8532 }
0x1257   :  { %6872 = vst [vmem:[%s10925_s9 + $0x30] sm:$0xff] %v6856_v20  ;;  %v6857_v61 = vsub.f32 %v10819_v57, %v6833_v25  ;;  %v6835_v11 = vmul.f32 0.6931472, %v8533_v53 }
0x1258   :  { %v8535_v45 = vpop.eup %8534 }
0x1259   :  { %6873 = vst [vmem:[%s10925_s9 + $0x38] sm:$0xff] %v6857_v61  ;;  %v6858_v13 = vsub.f32 %v10824_v5, %v6835_v11  ;;  %v6837_v4 = vmul.f32 0.6931472, %v8535_v45 }
0x125a   :  { %v8537_v23 = vpop.eup %8536 }
0x125b   :  { %6874 = vst [vmem:[%s10925_s9 + $0x40] sm:$0xff] %v6858_v13  ;;  %v6859_v63 = vsub.f32 %v10827_v60, %v6837_v4  ;;  %v6839_v31 = vmul.f32 0.6931472, %v8537_v23 }
0x125c   :  { %v8539_v1 = vpop.eup %8538 }
0x125d   :  { %6875 = vst [vmem:[%s10925_s9 + $0x48] sm:$0xff] %v6859_v63  ;;  %v6860_v57 = vsub.f32 %v10830_v48, %v6839_v31  ;;  %v6841_v18 = vmul.f32 0.6931472, %v8539_v1 }
0x125f   :  { %6876 = vst [vmem:[%s10925_s9 + $0x50] sm:$0xff] %v6860_v57  ;;  %v6861_v5 = vsub.f32 %v10834_v43, %v6841_v18 }
0x1261   :  { %6877 = vst [vmem:[%s10925_s9 + $0x58] sm:$0xff] %v6861_v5 }
0x12d0   :  { %v6811_v60 = vpop.xlane.xlu0 %6810 }
0x12d1   :  { %8540 = vlog2.f32 %v6811_v60 }
0x12d2   :  { %v6813_v33 = vpop.xlane.xlu1 %6812 }
0x12d3   :  { %8542 = vlog2.f32 %v6813_v33 }
0x12d4   :  { %v6815_v34 = vpop.xlane.xlu0 %6814 }
0x12d5   :  { %8544 = vlog2.f32 %v6815_v34 }
0x12d6   :  { %v6817_v36 = vpop.xlane.xlu1 %6816 }
0x12d7   :  { %8546 = vlog2.f32 %v6817_v36 }
0x12db   :  { %v8541_v48 = vpop.eup %8540 }
0x12dc   :  { %v6843_v21 = vmul.f32 0.6931472, %v8541_v48 }
0x12dd   :  { %v8543_v38 = vpop.eup %8542 }
0x12de   :  { %v6862_v59 = vsub.f32 %v10840_v32, %v6843_v21  ;;  %v6845_v51 = vmul.f32 0.6931472, %v8543_v38 }
0x12df   :  { %v8545_v50 = vpop.eup %8544 }
0x12e0   :  { %6878 = vst [vmem:[%s10925_s9 + $0x60] sm:$0xff] %v6862_v59  ;;  %v6863_v43 = vsub.f32 %v10843_v2, %v6845_v51  ;;  %v6847_v22 = vmul.f32 0.6931472, %v8545_v50 }
0x12e1   :  { %v8547_v52 = vpop.eup %8546 }
0x12e2   :  { %6879 = vst [vmem:[%s10925_s9 + $0x68] sm:$0xff] %v6863_v43  ;;  %v6864_v6 = vsub.f32 %v10846_v35, %v6847_v22  ;;  %v6849_v49 = vmul.f32 0.6931472, %v8547_v52 }
0x12e4   :  { %6880 = vst [vmem:[%s10925_s9 + $0x70] sm:$0xff] %v6864_v6  ;;  %v6865_v32 = vsub.f32 %v10849_v37, %v6849_v49 }
0x12e6   :  { %6881 = vst [vmem:[%s10925_s9 + $0x78] sm:$0xff] %v6865_v32 }

</bundles_post_ra>
